<compile_context>
chip_gen: v7x
topology: tpu7x:2x2x1
jax: 0.10.0
libtpu: 0.0.40
codegen_flags: <defaults>
</compile_context>

<pallas_src>
import functools

import jax
import jax.numpy as jnp
import numpy as np
from jax import lax
from jax.experimental import pallas as pl
from jax.experimental.pallas import tpu as pltpu


def _vq_kernel(f_ref, e_ref, et_ref, esq_ref, q_ref, idx_ref, sse_ref, *, vocab):
    """One grid step = one (C, TW) token tile of one batch element.

    f_ref   : (1, C, TW)  feature tile, tokens on the lane axis
    e_ref   : (V, C)      codebook (VMEM-resident, constant across the grid)
    et_ref  : (C, V)      codebook transposed (for the gather matmul)
    esq_ref : (V, 1)      precomputed ||e_v||^2
    q_ref   : (1, C, TW)  quantized tile
    idx_ref : (1, 1, TW)  argmin indices (lane-dense)
    sse_ref : (1, 1, TW)  per-token sum_c (f - q)^2 (lane-dense)
    """
    f = f_ref[0]          # (C, TW) f32
    e = e_ref[...]        # (V, C)  f32
    et = et_ref[...]      # (C, V)  f32
    esq = esq_ref[...]    # (V, 1)  f32

    # scores[v, t] = ||e_v||^2 - 2 <e_v, f_t>
    # (the per-token ||f_t||^2 term is constant over v and does not affect argmin)
    fe = lax.dot_general(e, f, (((1,), (0,)), ((), ())),
                         preferred_element_type=jnp.float32)        # (V, TW)
    scores = esq - 2.0 * fe

    blk_min = jnp.min(scores, axis=0, keepdims=True)                # (1, TW)
    ids = lax.broadcasted_iota(jnp.int32, scores.shape, 0)          # (V, TW)
    # first index attaining the minimum -> matches torch.argmin tie rule
    blk_arg = jnp.min(jnp.where(scores == blk_min, ids, vocab),
                      axis=0, keepdims=True)                        # (1, TW) int32

    # Codebook gather as a single one-hot matmul (MXU), already in (C, TW) layout.
    onehot = (ids == blk_arg).astype(jnp.float32)                   # (V, TW)
    q = lax.dot_general(et, onehot, (((1,), (0,)), ((), ())),
                        preferred_element_type=jnp.float32)         # (C, TW)

    q_ref[0] = q
    idx_ref[0] = blk_arg
    # Fused per-token SSE -> saves the wrapper an extra HBM pass over f and q.
    sse_ref[0] = jnp.sum((f - q) ** 2, axis=0, keepdims=True)       # (1, TW)


def vq_nearest_pallas(f_bct, codebook):
    """f_bct: (B, C, T) f32 with T % 128 == 0; codebook: (V, C) f32.

    Returns (quantized (B, C, T), indices (B, 1, T) int32, per-token SSE (B, 1, T)).
    """
    B, C, T = f_bct.shape
    V, C2 = codebook.shape
    assert C == C2 and T % 128 == 0

    # Largest token tile in {512, 256, 128} that divides T (all multiples of 128).
    TW = 128
    for cand in (512, 256):
        if T % cand == 0:
            TW = cand
            break

    et = codebook.T                                            # (C, V), tiny one-off
    esq = jnp.sum(codebook * codebook, axis=1, keepdims=True)  # (V, 1)

    grid = (B, T // TW)

    q, idx, sse = pl.pallas_call(
        functools.partial(_vq_kernel, vocab=V),
        out_shape=(jax.ShapeDtypeStruct((B, C, T), jnp.float32),
                   jax.ShapeDtypeStruct((B, 1, T), jnp.int32),
                   jax.ShapeDtypeStruct((B, 1, T), jnp.float32)),
        grid_spec=pltpu.PrefetchScalarGridSpec(
            num_scalar_prefetch=0,
            grid=grid,
            in_specs=[
                pl.BlockSpec((1, C, TW), lambda b, j: (b, 0, j)),  # feature tile
                pl.BlockSpec((V, C), lambda b, j: (0, 0)),         # codebook (resident)
                pl.BlockSpec((C, V), lambda b, j: (0, 0)),         # codebook^T (resident)
                pl.BlockSpec((V, 1), lambda b, j: (0, 0)),         # ||e||^2 (resident)
            ],
            out_specs=(
                pl.BlockSpec((1, C, TW), lambda b, j: (b, 0, j)),  # quantized (lane-dense)
                pl.BlockSpec((1, 1, TW), lambda b, j: (b, 0, j)),  # indices   (lane-dense)
                pl.BlockSpec((1, 1, TW), lambda b, j: (b, 0, j)),  # SSE       (lane-dense)
            ),
        ),
        compiler_params=pltpu.CompilerParams(
            dimension_semantics=("parallel", "parallel")),
    )(f_bct, codebook, et, esq)

    return q, idx, sse


def emitter_vq_forward(f_BChw, codebook, beta=0.25):
    """Mirrors EmitterVectorQuantizer.forward: returns (quantized, vq_loss, indices)."""
    B, C, H, W = f_BChw.shape
    HW = H * W
    HWp = ((HW + 127) // 128) * 128          # pad token count to a lane multiple

    f3 = f_BChw.reshape(B, C, HW)            # NCHW-native view: free reshape, no transpose
    if HWp != HW:
        f3 = jnp.pad(f3, ((0, 0), (0, 0), (0, HWp - HW)))

    q3, idx3, sse3 = vq_nearest_pallas(f3, codebook)

    quantized = q3[:, :, :HW].reshape(B, C, H, W)
    indices = idx3[:, 0, :HW].reshape(B, H, W)

    # commitment_loss and embedding_loss are numerically the same MSE in forward
    mse = jnp.sum(sse3[:, 0, :HW]) / (B * C * H * W)
    vq_loss = mse + beta * mse

    # straight-through estimator (forward value == quantized)
    quantized_st = f_BChw + lax.stop_gradient(quantized - f_BChw)
    return quantized_st, vq_loss, indices


if __name__ == "__main__":
    # Small, forward-consistent shapes (real module uses embed_dim=768, vocab=8192).
    B, C, H, W = 2, 128, 16, 16
    vocab_size = 512
    beta = 0.25

    key = jax.random.PRNGKey(0)
    k_f, k_e = jax.random.split(key)
    f_BChw = jax.random.normal(k_f, (B, C, H, W), dtype=jnp.float32)
    # nn.Embedding weight init: uniform(-1/vocab, 1/vocab), deterministic here.
    codebook = jax.random.uniform(k_e, (vocab_size, C), dtype=jnp.float32,
                                  minval=-1.0 / vocab_size, maxval=1.0 / vocab_size)

    quantized, vq_loss, indices = jax.block_until_ready(
        jax.jit(functools.partial(emitter_vq_forward, beta=beta))(f_BChw, codebook))

    # Reference in float64 numpy (ground-truth nearest-code search, same math as torch).
    f_np = np.asarray(f_BChw)
    cb_np = np.asarray(codebook)
    f_flat64 = f_np.transpose(0, 2, 3, 1).reshape(-1, C).astype(np.float64)
    cb64 = cb_np.astype(np.float64)
    dist = (np.sum(f_flat64 ** 2, axis=1, keepdims=True)
            + np.sum(cb64 ** 2, axis=1)
            - 2.0 * f_flat64 @ cb64.T)
    ref_idx = np.argmin(dist, axis=1)
    ref_q = cb_np[ref_idx].reshape(B, H, W, C).transpose(0, 3, 1, 2)          # f32 gather
    ref_st = f_np + (ref_q - f_np)                                            # f32 ST arithmetic
    ref_loss = (1.0 + beta) * np.mean((f_np.astype(np.float64)
                                       - ref_q.astype(np.float64)) ** 2)

    assert quantized.shape == (B, C, H, W)
    assert indices.shape == (B, H, W)
    np.testing.assert_array_equal(np.asarray(indices).ravel(), ref_idx)
    np.testing.assert_allclose(np.asarray(quantized), ref_st, rtol=1e-5, atol=1e-6)
    np.testing.assert_allclose(float(vq_loss), float(ref_loss), rtol=1e-4)

    print("KERNEL_OK")
</pallas_src>

<mosaic_0001>
module attributes {stable_mosaic.version = 11 : i64} {
  func.func @_vq_kernel(%arg0: i32, %arg1: i32, %arg2: memref<1x128x256xf32, #tpu.memory_space<vmem>>, %arg3: memref<512x128xf32, #tpu.memory_space<vmem>>, %arg4: memref<128x512xf32, #tpu.memory_space<vmem>>, %arg5: memref<512x1xf32, #tpu.memory_space<vmem>>, %arg6: memref<1x128x256xf32, #tpu.memory_space<vmem>>, %arg7: memref<1x1x256xi32, #tpu.memory_space<vmem>>, %arg8: memref<1x1x256xf32, #tpu.memory_space<vmem>>) attributes {dimension_semantics = [#tpu.dimension_semantics<parallel>, #tpu.dimension_semantics<parallel>], iteration_bounds = array<i64: 2, 1>, scalar_prefetch = 0 : i64, scratch_operands = 0 : i64, tpu.core_type = #tpu.core_type<tc>, window_params = [{transform_indices = @transform_0, window_bounds = array<i64: 1, 128, 256>}, {pipeline_mode = #tpu.pipeline_mode<synchronous>, transform_indices = @transform_1, window_bounds = array<i64: 512, 128>}, {pipeline_mode = #tpu.pipeline_mode<synchronous>, transform_indices = @transform_2, window_bounds = array<i64: 128, 512>}, {pipeline_mode = #tpu.pipeline_mode<synchronous>, transform_indices = @transform_3, window_bounds = array<i64: 512, 1>}, {transform_indices = @transform_4, window_bounds = array<i64: 1, 128, 256>}, {transform_indices = @transform_5, window_bounds = array<i64: 1, 1, 256>}, {transform_indices = @transform_6, window_bounds = array<i64: 1, 1, 256>}]} {
    %c0 = arith.constant 0 : index
    %c0_0 = arith.constant 0 : index
    %c0_1 = arith.constant 0 : index
    %0 = vector.load %arg2[%c0, %c0_0, %c0_1] : memref<1x128x256xf32, #tpu.memory_space<vmem>>, vector<1x128x256xf32>
    %1 = vector.shape_cast %0 : vector<1x128x256xf32> to vector<128x256xf32>
    %c0_2 = arith.constant 0 : index
    %c0_3 = arith.constant 0 : index
    %2 = vector.load %arg3[%c0_2, %c0_3] : memref<512x128xf32, #tpu.memory_space<vmem>>, vector<512x128xf32>
    %c0_4 = arith.constant 0 : index
    %c0_5 = arith.constant 0 : index
    %3 = vector.load %arg4[%c0_4, %c0_5] : memref<128x512xf32, #tpu.memory_space<vmem>>, vector<128x512xf32>
    %c0_6 = arith.constant 0 : index
    %c0_7 = arith.constant 0 : index
    %4 = vector.load %arg5[%c0_6, %c0_7] : memref<512x1xf32, #tpu.memory_space<vmem>>, vector<512x1xf32>
    %cst = arith.constant dense<0.000000e+00> : vector<512x256xf32>
    %5 = tpu.matmul %2, %1, %cst {dimension_numbers = #tpu.dot_dimension_numbers<[1], [0], [0], [1], [0, 0, 1, 1], [], []>} : vector<512x128xf32>, vector<128x256xf32>, vector<512x256xf32> -> vector<512x256xf32>
    %cst_8 = arith.constant 2.000000e+00 : f32
    %6 = vector.broadcast %cst_8 : f32 to vector<512x256xf32>
    %7 = arith.mulf %6, %5 : vector<512x256xf32>
    %8 = vector.broadcast %4 : vector<512x1xf32> to vector<512x256xf32>
    %9 = arith.subf %8, %7 : vector<512x256xf32>
    %cst_9 = arith.constant dense<0x7F800000> : vector<256xf32>
    %10 = vector.multi_reduction <minimumf>, %9, %cst_9 [0] : vector<512x256xf32> to vector<256xf32>
    %11 = vector.shape_cast %10 : vector<256xf32> to vector<1x256xf32>
    %12 = tpu.iota {dimensions = array<i32: 0>} : vector<512x256xi32>
    %13 = vector.broadcast %11 : vector<1x256xf32> to vector<512x256xf32>
    %14 = arith.cmpf oeq, %9, %13 : vector<512x256xf32>
    %c512_i32 = arith.constant 512 : i32
    %15 = vector.broadcast %c512_i32 : i32 to vector<512x256xi32>
    %16 = arith.select %14, %12, %15 : vector<512x256xi1>, vector<512x256xi32>
    %cst_10 = arith.constant dense<2147483647> : vector<256xi32>
    %17 = vector.multi_reduction <minsi>, %16, %cst_10 [0] : vector<512x256xi32> to vector<256xi32>
    %18 = vector.shape_cast %17 : vector<256xi32> to vector<1x256xi32>
    %19 = vector.broadcast %18 : vector<1x256xi32> to vector<512x256xi32>
    %20 = arith.cmpi eq, %12, %19 : vector<512x256xi32>
    %21 = arith.extui %20 : vector<512x256xi1> to vector<512x256xi32>
    %22 = arith.sitofp %21 : vector<512x256xi32> to vector<512x256xf32>
    %cst_11 = arith.constant dense<0.000000e+00> : vector<128x256xf32>
    %23 = tpu.matmul %3, %22, %cst_11 {dimension_numbers = #tpu.dot_dimension_numbers<[1], [0], [0], [1], [0, 0, 1, 1], [], []>} : vector<128x512xf32>, vector<512x256xf32>, vector<128x256xf32> -> vector<128x256xf32>
    %c0_12 = arith.constant 0 : index
    %c0_13 = arith.constant 0 : index
    %c0_14 = arith.constant 0 : index
    %24 = vector.load %arg6[%c0_12, %c0_13, %c0_14] : memref<1x128x256xf32, #tpu.memory_space<vmem>>, vector<1x128x256xf32>
    %25 = vector.shape_cast %24 : vector<1x128x256xf32> to vector<128x256xf32>
    %26 = vector.shape_cast %23 : vector<128x256xf32> to vector<1x128x256xf32>
    tpu.vector_store %arg6[%c0_12, %c0_13, %c0_14], %26 {strides = array<i32>} : memref<1x128x256xf32, #tpu.memory_space<vmem>>, vector<1x128x256xf32>,
    %c0_15 = arith.constant 0 : index
    %c0_16 = arith.constant 0 : index
    %c0_17 = arith.constant 0 : index
    %27 = vector.load %arg7[%c0_15, %c0_16, %c0_17] : memref<1x1x256xi32, #tpu.memory_space<vmem>>, vector<1x1x256xi32>
    %28 = vector.shape_cast %27 : vector<1x1x256xi32> to vector<1x256xi32>
    %29 = vector.shape_cast %18 : vector<1x256xi32> to vector<1x1x256xi32>
    tpu.vector_store %arg7[%c0_15, %c0_16, %c0_17], %29 {strides = array<i32>} : memref<1x1x256xi32, #tpu.memory_space<vmem>>, vector<1x1x256xi32>,
    %30 = arith.subf %1, %23 : vector<128x256xf32>
    %31 = arith.mulf %30, %30 : vector<128x256xf32>
    %cst_18 = arith.constant dense<0.000000e+00> : vector<256xf32>
    %32 = vector.multi_reduction <add>, %31, %cst_18 [0] : vector<128x256xf32> to vector<256xf32>
    %33 = vector.shape_cast %32 : vector<256xf32> to vector<1x256xf32>
    %c0_19 = arith.constant 0 : index
    %c0_20 = arith.constant 0 : index
    %c0_21 = arith.constant 0 : index
    %34 = vector.load %arg8[%c0_19, %c0_20, %c0_21] : memref<1x1x256xf32, #tpu.memory_space<vmem>>, vector<1x1x256xf32>
    %35 = vector.shape_cast %34 : vector<1x1x256xf32> to vector<1x256xf32>
    %36 = vector.shape_cast %33 : vector<1x256xf32> to vector<1x1x256xf32>
    tpu.vector_store %arg8[%c0_19, %c0_20, %c0_21], %36 {strides = array<i32>} : memref<1x1x256xf32, #tpu.memory_space<vmem>>, vector<1x1x256xf32>,
    return
  }
  func.func @transform_0(%arg0: i32, %arg1: i32) -> (i32, i32, i32) {
    %c0_i32 = arith.constant 0 : i32
    %c0_i32_0 = arith.constant 0 : i32
    return %arg0, %c0_i32, %arg1 : i32, i32, i32
  }
  func.func @transform_1(%arg0: i32, %arg1: i32) -> (i32, i32) {
    %c0_i32 = arith.constant 0 : i32
    %c0_i32_0 = arith.constant 0 : i32
    %c0_i32_1 = arith.constant 0 : i32
    return %c0_i32, %c0_i32_0 : i32, i32
  }
  func.func @transform_2(%arg0: i32, %arg1: i32) -> (i32, i32) {
    %c0_i32 = arith.constant 0 : i32
    %c0_i32_0 = arith.constant 0 : i32
    %c0_i32_1 = arith.constant 0 : i32
    return %c0_i32, %c0_i32_0 : i32, i32
  }
  func.func @transform_3(%arg0: i32, %arg1: i32) -> (i32, i32) {
    %c0_i32 = arith.constant 0 : i32
    %c0_i32_0 = arith.constant 0 : i32
    %c0_i32_1 = arith.constant 0 : i32
    return %c0_i32, %c0_i32_0 : i32, i32
  }
  func.func @transform_4(%arg0: i32, %arg1: i32) -> (i32, i32, i32) {
    %c0_i32 = arith.constant 0 : i32
    %c0_i32_0 = arith.constant 0 : i32
    return %arg0, %c0_i32, %arg1 : i32, i32, i32
  }
  func.func @transform_5(%arg0: i32, %arg1: i32) -> (i32, i32, i32) {
    %c0_i32 = arith.constant 0 : i32
    %c0_i32_0 = arith.constant 0 : i32
    return %arg0, %c0_i32, %arg1 : i32, i32, i32
  }
  func.func @transform_6(%arg0: i32, %arg1: i32) -> (i32, i32, i32) {
    %c0_i32 = arith.constant 0 : i32
    %c0_i32_0 = arith.constant 0 : i32
    return %arg0, %c0_i32, %arg1 : i32, i32, i32
  }
}

</mosaic_0001>

<bundles_post_ra>
// kernel: squeeze.2
= control target key start
LH: loop header
LB: loop body
LE: loop exit
PB: predicated region body
PF: predicated region fallthrough
CT: control target
= control target key end

     0   :  { %s149_s0 = inlined_call_operand.vmem [shape: s32[2,256], index: 0, kind: input, shape index: {}]   ;;  %s150_s1 = inlined_call_operand.hbm [shape: s32[2,16,16], index: 1, kind: output, shape index: {}]  }
   0x1   :  { %v71_v0 = vld [vmem:[%s149_s0 + $0x2] sm:$0x3]  ;;  %v9_v1 = vld [vmem:[%s149_s0] sm:$0x3] }
   0x2   :  { %8 = vst [vmem:[#allocation2 + $0x8] sm:$0x3] %v71_v0  ;;  %10 = vst [vmem:[#allocation2] sm:$0x3] %v9_v1 }
   0x3   :  { %2 = vsyncpa [#allocation1], 0  ;;  %vm12_vm0 = vcmask 130048   ;;  %s104_s0 = smov 112   ;;  %s105_s10 = smov 80  }
   0x4   :  { %s106_s11 = smov 96   ;;  %s107_s12 = smov 64  }
   0x5   :  { %s108_s13 = smov 48   ;;  %s109_s14 = smov 32  }
   0x6   :  { %s110_s15 = smov 16   ;;  %s111_s16 = smov [#allocation0]  }
   0x7   :  { %s65_s17 = sshll.u32 %s111_s16, 4  ;;  %s66_s17 = int_to_ptr.vmem [resolvable:$true] %s65_s17 }
   0x8   :  { %s80_s18 = scalar_lea.vmem %s66_s17, 512  ;;  %p85_p1 = scmp.lt.s32.totalorder %s66_s17, %s66_s17 }
   0x9   :  { %v19_v2 = vld.sshfl [vmem:[#allocation2] sm:$0xff pattern:$0x99999180]   ;;  %p81_p0 = scmp.ne.s32.totalorder %s66_s17, %s80_s18  ;;  %p86_p2 = scmp.lt.s32.totalorder %s80_s18, %s80_s18 }
   0xa   :  { %v11_v3 = vld [vmem:[#allocation2] sm:$0x3]   ;;  %20 = vrot.lane.b32.xlu0 %v19_v2, %s104_s0  ;;  %32 = vrot.lane.b32.xlu1 %v19_v2, %s105_s10  ;;  %v15_v4 = vld [vmem:[#allocation2 + $0x8] sm:$0x3]  }
   0xb   :  { %13 = vst.msk [vmem:[#allocation0] ss:$16 sm:$0x3] %vm12_vm0, %v11_v3   ;;  %18 = vst.msk [vmem:[#allocation0 + $0x8] ss:$16 sm:$0x3] %vm12_vm0, %v15_v4   ;;  %p87_p3 = por %p86_p2, %p85_p1 }
   0xd   :  { %p88_p4 = pnand %p87_p3, %p81_p0 }
   0xe   :  { %26 = vrot.lane.b32.xlu0 %v19_v2, %s106_s11  ;;  %38 = vrot.lane.b32.xlu1 %v19_v2, %s107_s12 }
  0x12   :  { %44 = vrot.lane.b32.xlu0 %v19_v2, %s108_s13  ;;  %50 = vrot.lane.b32.xlu1 %v19_v2, %s109_s14 }
  0x16   :  { %56 = vrot.lane.b32.xlu0 %v19_v2, %s110_s15 }
  0x7c   :  { %v21_v5 = vpop.permute.xlu0 %20   ;;  %v33_v6 = vpop.permute.xlu1 %32  }
  0x7d   :  { %24 = vst.msk [vmem:[#allocation0 + $0x1] ss:$8 sm:$0xf] %vm12_vm0, %v21_v5   ;;  %36 = vst.msk [vmem:[#allocation0 + $0x3] ss:$8 sm:$0xf] %vm12_vm0, %v33_v6  }
  0x80   :  { %v27_v7 = vpop.permute.xlu0 %26   ;;  %v39_v8 = vpop.permute.xlu1 %38  }
  0x81   :  { %30 = vst.msk [vmem:[#allocation0 + $0x2] ss:$8 sm:$0xf] %vm12_vm0, %v27_v7   ;;  %42 = vst.msk [vmem:[#allocation0 + $0x4] ss:$8 sm:$0xf] %vm12_vm0, %v39_v8  }
  0x84   :  { %v45_v9 = vpop.permute.xlu0 %44   ;;  %v51_v10 = vpop.permute.xlu1 %50  }
  0x85   :  { %48 = vst.msk [vmem:[#allocation0 + $0x5] ss:$8 sm:$0xf] %vm12_vm0, %v45_v9   ;;  %54 = vst.msk [vmem:[#allocation0 + $0x6] ss:$8 sm:$0xf] %vm12_vm0, %v51_v10  }
  0x88   :  { %v57_v11 = vpop.permute.xlu0 %56  }
  0x89   :  { %60 = vst.msk [vmem:[#allocation0 + $0x7] ss:$8 sm:$0xf] %vm12_vm0, %v57_v11  }
  0x8a   :  { %91 = shalt.err (!%p88_p4)
}
  0x8b   :  { %s92_s21 = scalar_lea.hbm %s150_s1, 512 }
  0x8c   :  { %p93_p5 = scmp.ne.s32.totalorder %s150_s1, %s92_s21  ;;  %p96_p6 = scmp.lt.u32.totalorder %s92_s21, %s150_s1 }
  0x8e   :  { %p98_p7 = pnand %p96_p6, %p93_p5 }
  0x90   :  { %101 = shalt.err (!%p98_p7)
}
  0x91   :  { %68 = dma.vmem_to_hbm [thread:$0]  %s66_s17, 512, %s150_s1, [#allocation1]  }
  0x92   :  { %102 = dma.done.wait [#allocation1], 512  }
  0x93   :  { %103 = vsyncadd [#allocation1], 4294966784 }
  0x94   :  { %70 = vsyncpa [#allocation1], 1 }

// kernel: emitter_vq_forward.1
= control target key start
LH: loop header
LB: loop body
LE: loop exit
PB: predicated region body
PF: predicated region fallthrough
CT: control target
= control target key end

     0   :  { %s3974_s21 = smov 0   ;;  %s3976_s22 = smov 0   ;;  %s6764_s0 = inlined_call_operand.vmem [shape: f32[2,128,256], index: 0, kind: input, shape index: {}]   ;;  %s6765_s1 = inlined_call_operand.vmem [shape: f32[512,128], index: 1, kind: input, shape index: {}]   ;;  %s6766_s2 = inlined_call_operand.vmem [shape: f32[128,512], index: 2, kind: input, shape index: {}]   ;;  %s6767_s3 = inlined_call_operand.vmem [shape: f32[512,1], index: 3, kind: input, shape index: {}]   ;;  %s6768_s4 = inlined_call_operand.vmem [shape: f32[2,128,256], index: 4, kind: output, shape index: {0}]   ;;  %s6769_s5 = inlined_call_operand.vmem [shape: s32[2,1,256], index: 5, kind: output, shape index: {1}]   ;;  %s6770_s6 = inlined_call_operand.vmem [shape: f32[2,1,256], index: 6, kind: output, shape index: {2}]  }
   0x1   :  { %s3978_s23 = smov 0  }
   0x2 LB: > { %s29_s24 = sadd.s32 1, %s3929_s22  ;;  %p3374_p0 = scmp.ge.s32.totalorder %s3933_s23, 1  ;;  %s3933_s23 = sphi %s3978_s23, %s17_s23   ;;  %s3929_s22 = sphi %s3976_s22, %s7580_s22   ;;  %s3925_s21 = sphi %s3974_s21, %s7579_s21  }
   0x3   : > { %p31_p1 = scmp.ge.s32.totalorder %s29_s24, 2  ;;  %p242_p2 = scmp.lt.s32.totalorder %s3933_s23, 3 }
   0x5   : > { %s7582_s24 = smov (%p31_p1, %s29_s24), 0  ;;  %p243_p3 = pnand %p3374_p0, %p242_p2 }
   0x7   : > { %246 = sbr.rel (%p243_p3) target bundleno = 1061 (0x425), region = 36 }
   0xe   : > { %p297_p4 = scmp.lt.s32.totalorder %s3925_s21, 1  ;;  %v3935_v0 = vmov 0.0   ;;  %v3936_v1 = vmov 0   ;;  %v496_v2 = vld [vmem:[%s6767_s3 + $0x10] sm:$0xff]  ;;  %v494_v28 = vld [vmem:[%s6767_s3] sm:$0xff]  ;;  %v497_v29 = vld [vmem:[%s6767_s3 + $0x18] sm:$0xff] }
   0xf   : > { %622 = vmatprep.mubr.f32.mxu0 %v3935_v0  ;;  %910 = vmatprep.mubr.f32.mxu1 %v3935_v0  ;;  %v495_v31 = vld [vmem:[%s6767_s3 + $0x8] sm:$0xff]  ;;  %v498_v39 = vld [vmem:[%s6767_s3 + $0x20] sm:$0xff]  ;;  %v501_v45 = vld [vmem:[%s6767_s3 + $0x38] sm:$0xff] }
  0x10   : > { %s7584_s21 = smov (!%p297_p4, %s3925_s21), 1  ;;  %3878 = vset.pattern.permute.xlu1 %v3936_v1  ;;  %3877 = vset.pattern.permute.xlu0 %v3936_v1  ;;  %v499_v37 = vld [vmem:[%s6767_s3 + $0x28] sm:$0xff]  ;;  %v500_v47 = vld [vmem:[%s6767_s3 + $0x30] sm:$0xff]  ;;  %v502_v55 = vld [vmem:[%s6767_s3 + $0x40] sm:$0xff] }
  0x11   : > { %s3639_s25 = sshll.u32 %s7584_s21, 8  ;;  %1147 = vperm.xlu1 %3878, %v496_v2   ;;  %1137 = vperm.xlu0 %3877, %v494_v28   ;;  %v503_v53 = vld [vmem:[%s6767_s3 + $0x48] sm:$0xff]  ;;  %v505_v59 = vld [vmem:[%s6767_s3 + $0x58] sm:$0xff]  ;;  %v504_v61 = vld [vmem:[%s6767_s3 + $0x50] sm:$0xff]  ;;  %s3379_s11 = sshll.u32 %s7584_s21, 1 }
  0x12   : > { %s4002_s28 = scalar_lea.vmem %s6764_s0, %s3639_s25  ;;  %v507_v62 = vld [vmem:[%s6767_s3 + $0x68] sm:$0xff]  ;;  %v366_v63 = vld [vmem:[%s6765_s1] sm:$0xff]  ;;  %v373_v28 = vld [vmem:[%s6765_s1 + $0x38] sm:$0xff]  ;;  %s323_s14 = scalar_lea.vmem %s6769_s5, %s3379_s11 }
  0x13   : > { %v335_v3 = vld [vmem:[%s4002_s28 + $0x8] sm:$0xff]  ;;  %v337_v4 = vld [vmem:[%s4002_s28 + $0x18] sm:$0xff]  ;;  %v334_v5 = vld [vmem:[%s4002_s28] sm:$0xff]  ;;  %s6680_s30 = scalar_lea.vmem %s6768_s4, %s3639_s25  ;;  %s332_s7 = scalar_lea.vmem %s6770_s6, %s3379_s11 }
  0x14   : > { %v3641_v6 = vpack.c.bf16 %v337_v4, %v335_v3  ;;  %v336_v7 = vld [vmem:[%s4002_s28 + $0x10] sm:$0xff]  ;;  %v339_v8 = vld [vmem:[%s4002_s28 + $0x28] sm:$0xff]  ;;  %v341_v9 = vld [vmem:[%s4002_s28 + $0x38] sm:$0xff] }
  0x15   : > { %v3643_v10 = vpack.c.bf16 %v336_v7, %v334_v5  ;;  %v3645_v11 = vpack.c.bf16 %v341_v9, %v339_v8  ;;  %v338_v12 = vld [vmem:[%s4002_s28 + $0x20] sm:$0xff]  ;;  %v340_v13 = vld [vmem:[%s4002_s28 + $0x30] sm:$0xff]  ;;  %v343_v14 = vld [vmem:[%s4002_s28 + $0x48] sm:$0xff]  ;;  %1152 = vperm.xlu1 %3878, %v497_v29   ;;  %1142 = vperm.xlu0 %3877, %v495_v31  }
  0x16   : > { %3642 = vmatprep.subr.bf16.mxu0 %v3641_v6  ;;  %v345_v15 = vld [vmem:[%s4002_s28 + $0x58] sm:$0xff]  ;;  %3801 = vmatprep.subr.bf16.mxu1 %v3641_v6  ;;  %v3647_v16 = vpack.c.bf16 %v340_v13, %v338_v12  ;;  %v342_v18 = vld [vmem:[%s4002_s28 + $0x40] sm:$0xff]  ;;  %v344_v19 = vld [vmem:[%s4002_s28 + $0x50] sm:$0xff] }
  0x17   : > { %3644 = vmatpush1.bf16.msra.mxu0 %v3643_v10  ;;  %3809 = vmatpush1.bf16.msra.mxu1 %v3643_v10  ;;  %v3649_v17 = vpack.c.bf16 %v345_v15, %v343_v14  ;;  %v347_v20 = vld [vmem:[%s4002_s28 + $0x68] sm:$0xff]  ;;  %v349_v21 = vld [vmem:[%s4002_s28 + $0x78] sm:$0xff]  ;;  %v3651_v22 = vpack.c.bf16 %v344_v19, %v342_v18  ;;  %v346_v24 = vld [vmem:[%s4002_s28 + $0x60] sm:$0xff] }
  0x18   : > { %3646 = vmatprep.subr.bf16.mxu0 %v3645_v11  ;;  %3802 = vmatprep.subr.bf16.mxu1 %v3645_v11  ;;  %v3653_v23 = vpack.c.bf16 %v349_v21, %v347_v20  ;;  %v348_v25 = vld [vmem:[%s4002_s28 + $0x70] sm:$0xff]  ;;  %v351_v26 = vld [vmem:[%s4002_s28 + $0x88] sm:$0xff]  ;;  %v353_v27 = vld [vmem:[%s4002_s28 + $0x98] sm:$0xff] }
  0x19   : > { %v3655_v30 = vpack.c.bf16 %v348_v25, %v346_v24  ;;  %v3657_v32 = vpack.c.bf16 %v353_v27, %v351_v26  ;;  %v350_v33 = vld [vmem:[%s4002_s28 + $0x80] sm:$0xff]  ;;  %v352_v34 = vld [vmem:[%s4002_s28 + $0x90] sm:$0xff]  ;;  %v355_v35 = vld [vmem:[%s4002_s28 + $0xa8] sm:$0xff]  ;;  %1162 = vperm.xlu1 %3878, %v499_v37   ;;  %1157 = vperm.xlu0 %3877, %v498_v39  }
  0x1a   : > { %v357_v36 = vld [vmem:[%s4002_s28 + $0xb8] sm:$0xff]  ;;  %v3659_v38 = vpack.c.bf16 %v352_v34, %v350_v33  ;;  %v354_v41 = vld [vmem:[%s4002_s28 + $0xa0] sm:$0xff]  ;;  %v356_v42 = vld [vmem:[%s4002_s28 + $0xb0] sm:$0xff] }
  0x1b   : > { %3648 = vmatpush1.bf16.msra.mxu0 %v3647_v16  ;;  %3810 = vmatpush1.bf16.msra.mxu1 %v3647_v16  ;;  %v3661_v40 = vpack.c.bf16 %v357_v36, %v355_v35  ;;  %v359_v43 = vld [vmem:[%s4002_s28 + $0xc8] sm:$0xff]  ;;  %v361_v44 = vld [vmem:[%s4002_s28 + $0xd8] sm:$0xff]  ;;  %v3663_v46 = vpack.c.bf16 %v356_v42, %v354_v41  ;;  %v358_v49 = vld [vmem:[%s4002_s28 + $0xc0] sm:$0xff] }
  0x1c   : > { %3650 = vmatprep.subr.bf16.mxu0 %v3649_v17  ;;  %3803 = vmatprep.subr.bf16.mxu1 %v3649_v17  ;;  %v3665_v48 = vpack.c.bf16 %v361_v44, %v359_v43  ;;  %v360_v50 = vld [vmem:[%s4002_s28 + $0xd0] sm:$0xff]  ;;  %v363_v51 = vld [vmem:[%s4002_s28 + $0xe8] sm:$0xff]  ;;  %v365_v52 = vld [vmem:[%s4002_s28 + $0xf8] sm:$0xff] }
  0x1d   : > { %1172 = vperm.xlu1 %3878, %v501_v45   ;;  %1167 = vperm.xlu0 %3877, %v500_v47   ;;  %v3667_v54 = vpack.c.bf16 %v360_v50, %v358_v49  ;;  %v3669_v56 = vpack.c.bf16 %v365_v52, %v363_v51  ;;  %v362_v57 = vld [vmem:[%s4002_s28 + $0xe0] sm:$0xff]  ;;  %v364_v58 = vld [vmem:[%s4002_s28 + $0xf0] sm:$0xff]  ;;  %v509_v3 = vld [vmem:[%s6767_s3 + $0x78] sm:$0xff] }
  0x1e   : > { %v3671_v60 = vpack.c.bf16 %v364_v58, %v362_v57  ;;  %v414_v1 = vld [vmem:[%s6765_s1 + $0x180] sm:$0xff]  ;;  %v367_v4 = vld [vmem:[%s6765_s1 + $0x8] sm:$0xff]  ;;  %v508_v6 = vld [vmem:[%s6767_s3 + $0x70] sm:$0xff] }
  0x1f   : > { %3652 = vmatpush1.bf16.msra.mxu0 %v3651_v22  ;;  %3811 = vmatpush1.bf16.msra.mxu1 %v3651_v22  ;;  %v506_v2 = vld [vmem:[%s6767_s3 + $0x60] sm:$0xff]  ;;  %v415_v5 = vld [vmem:[%s6765_s1 + $0x188] sm:$0xff]  ;;  %v368_v8 = vld [vmem:[%s6765_s1 + $0x10] sm:$0xff] }
  0x20   : > { %3654 = vmatprep.subr.bf16.mxu0 %v3653_v23  ;;  %3804 = vmatprep.subr.bf16.mxu1 %v3653_v23  ;;  %v511_v7 = vld [vmem:[%s6767_s3 + $0x88] sm:$0xff]  ;;  %v416_v9 = vld [vmem:[%s6765_s1 + $0x190] sm:$0xff]  ;;  %v510_v10 = vld [vmem:[%s6767_s3 + $0x80] sm:$0xff] }
  0x21   : > { %1182 = vperm.xlu1 %3878, %v503_v53   ;;  %1177 = vperm.xlu0 %3877, %v502_v55   ;;  %v513_v11 = vld [vmem:[%s6767_s3 + $0x98] sm:$0xff]  ;;  %v512_v14 = vld [vmem:[%s6767_s3 + $0x90] sm:$0xff]  ;;  %v515_v15 = vld [vmem:[%s6767_s3 + $0xa8] sm:$0xff] }
  0x22   : > { %v369_v12 = vld [vmem:[%s6765_s1 + $0x18] sm:$0xff]  ;;  %v370_v16 = vld [vmem:[%s6765_s1 + $0x20] sm:$0xff]  ;;  %v371_v20 = vld [vmem:[%s6765_s1 + $0x28] sm:$0xff] }
  0x23   : > { %3656 = vmatpush1.bf16.msra.mxu0 %v3655_v30  ;;  %3812 = vmatpush1.bf16.msra.mxu1 %v3655_v30  ;;  %v417_v13 = vld [vmem:[%s6765_s1 + $0x198] sm:$0xff]  ;;  %v418_v17 = vld [vmem:[%s6765_s1 + $0x1a0] sm:$0xff]  ;;  %v419_v21 = vld [vmem:[%s6765_s1 + $0x1a8] sm:$0xff] }
  0x24   : > { %3658 = vmatprep.subr.bf16.mxu0 %v3657_v32  ;;  %3805 = vmatprep.subr.bf16.mxu1 %v3657_v32  ;;  %v514_v18 = vld [vmem:[%s6767_s3 + $0xa0] sm:$0xff]  ;;  %v517_v19 = vld [vmem:[%s6767_s3 + $0xb8] sm:$0xff]  ;;  %v516_v22 = vld [vmem:[%s6767_s3 + $0xb0] sm:$0xff] }
  0x25   : > { %1192 = vperm.xlu1 %3878, %v505_v59   ;;  %1187 = vperm.xlu0 %3877, %v504_v61   ;;  %v519_v23 = vld [vmem:[%s6767_s3 + $0xc8] sm:$0xff]  ;;  %v372_v24 = vld [vmem:[%s6765_s1 + $0x30] sm:$0xff]  ;;  %v518_v26 = vld [vmem:[%s6767_s3 + $0xc0] sm:$0xff] }
  0x26   : > { %v420_v25 = vld [vmem:[%s6765_s1 + $0x1b0] sm:$0xff]  ;;  %v521_v27 = vld [vmem:[%s6767_s3 + $0xd8] sm:$0xff]  ;;  %v523_v31 = vld [vmem:[%s6767_s3 + $0xe8] sm:$0xff] }
  0x27   : > { %3660 = vmatpush1.bf16.msra.mxu0 %v3659_v38  ;;  %3813 = vmatpush1.bf16.msra.mxu1 %v3659_v38  ;;  %v421_v29 = vld [vmem:[%s6765_s1 + $0x1b8] sm:$0xff]  ;;  %v520_v30 = vld [vmem:[%s6767_s3 + $0xd0] sm:$0xff]  ;;  %v374_v32 = vld [vmem:[%s6765_s1 + $0x40] sm:$0xff] }
  0x28   : > { %3662 = vmatprep.subr.bf16.mxu0 %v3661_v40  ;;  %3806 = vmatprep.subr.bf16.mxu1 %v3661_v40  ;;  %v422_v33 = vld [vmem:[%s6765_s1 + $0x1c0] sm:$0xff]  ;;  %v525_v35 = vld [vmem:[%s6767_s3 + $0xf8] sm:$0xff]  ;;  %v375_v36 = vld [vmem:[%s6765_s1 + $0x48] sm:$0xff] }
  0x29   : > { %1202 = vperm.xlu1 %3878, %v507_v62   ;;  %1197 = vperm.xlu0 %3877, %v506_v2   ;;  %v522_v34 = vld [vmem:[%s6767_s3 + $0xe0] sm:$0xff]  ;;  %v423_v37 = vld [vmem:[%s6765_s1 + $0x1c8] sm:$0xff]  ;;  %v524_v38 = vld [vmem:[%s6767_s3 + $0xf0] sm:$0xff] }
  0x2a   : > { %v527_v39 = vld [vmem:[%s6767_s3 + $0x108] sm:$0xff]  ;;  %v376_v40 = vld [vmem:[%s6765_s1 + $0x50] sm:$0xff]  ;;  %v526_v42 = vld [vmem:[%s6767_s3 + $0x100] sm:$0xff] }
  0x2b   : > { %3664 = vmatpush1.bf16.msra.mxu0 %v3663_v46  ;;  %3814 = vmatpush1.bf16.msra.mxu1 %v3663_v46  ;;  %v424_v41 = vld [vmem:[%s6765_s1 + $0x1d0] sm:$0xff]  ;;  %v529_v43 = vld [vmem:[%s6767_s3 + $0x118] sm:$0xff]  ;;  %v531_v47 = vld [vmem:[%s6767_s3 + $0x128] sm:$0xff] }
  0x2c   : > { %3666 = vmatprep.subr.bf16.mxu0 %v3665_v48  ;;  %3807 = vmatprep.subr.bf16.mxu1 %v3665_v48  ;;  %v377_v44 = vld [vmem:[%s6765_s1 + $0x58] sm:$0xff]  ;;  %v528_v46 = vld [vmem:[%s6767_s3 + $0x110] sm:$0xff]  ;;  %v378_v48 = vld [vmem:[%s6765_s1 + $0x60] sm:$0xff] }
  0x2d   : > { %1212 = vperm.xlu1 %3878, %v509_v3   ;;  %1207 = vperm.xlu0 %3877, %v508_v6   ;;  %v425_v45 = vld [vmem:[%s6765_s1 + $0x1d8] sm:$0xff]  ;;  %v426_v49 = vld [vmem:[%s6765_s1 + $0x1e0] sm:$0xff]  ;;  %v379_v52 = vld [vmem:[%s6765_s1 + $0x68] sm:$0xff] }
  0x2e   : > { %v530_v50 = vld [vmem:[%s6767_s3 + $0x120] sm:$0xff]  ;;  %v533_v51 = vld [vmem:[%s6767_s3 + $0x138] sm:$0xff]  ;;  %v427_v53 = vld [vmem:[%s6765_s1 + $0x1e8] sm:$0xff] }
  0x2f   : > { %3668 = vmatpush1.bf16.msra.mxu0 %v3667_v54  ;;  %3815 = vmatpush1.bf16.msra.mxu1 %v3667_v54  ;;  %v532_v54 = vld [vmem:[%s6767_s3 + $0x130] sm:$0xff]  ;;  %v535_v55 = vld [vmem:[%s6767_s3 + $0x148] sm:$0xff]  ;;  %v534_v58 = vld [vmem:[%s6767_s3 + $0x140] sm:$0xff] }
  0x30   : > { %3670 = vmatprep.subr.bf16.mxu0 %v3669_v56  ;;  %3808 = vmatprep.subr.bf16.mxu1 %v3669_v56  ;;  %v380_v56 = vld [vmem:[%s6765_s1 + $0x70] sm:$0xff]  ;;  %v537_v59 = vld [vmem:[%s6767_s3 + $0x158] sm:$0xff]  ;;  %v538_v2 = vld [vmem:[%s6767_s3 + $0x160] sm:$0xff] }
  0x31   : > { %1222 = vperm.xlu1 %3878, %v511_v7   ;;  %1217 = vperm.xlu0 %3877, %v510_v10   ;;  %v428_v57 = vld [vmem:[%s6765_s1 + $0x1f0] sm:$0xff]  ;;  %v429_v61 = vld [vmem:[%s6765_s1 + $0x1f8] sm:$0xff]  ;;  %v543_v6 = vld [vmem:[%s6767_s3 + $0x188] sm:$0xff] }
  0x32   : > { %v536_v62 = vld [vmem:[%s6767_s3 + $0x150] sm:$0xff]  ;;  %v541_v3 = vld [vmem:[%s6767_s3 + $0x178] sm:$0xff] }
  0x33   : > { %3672 = vmatpush1.bf16.msra.mxu0 %v3671_v60  ;;  %3816 = vmatpush1.bf16.msra.mxu1 %v3671_v60  ;;  %v381_v60 = vld [vmem:[%s6765_s1 + $0x78] sm:$0xff]  ;;  %v384_v7 = vld [vmem:[%s6765_s1 + $0x90] sm:$0xff] }
  0x34   : > { %v385_v10 = vld [vmem:[%s6765_s1 + $0x98] sm:$0xff] }
  0x35   : > { %1232 = vperm.xlu1 %3878, %v513_v11   ;;  %1227 = vperm.xlu0 %3877, %v512_v14   ;;  %v544_v11 = vld [vmem:[%s6767_s3 + $0x190] sm:$0xff]  ;;  %v546_v14 = vld [vmem:[%s6767_s3 + $0x1a0] sm:$0xff] }
  0x36   : > { %623 = vmatmul.mubr.f32.vlgmr.msra.gmra.mrb[0].mxu0 %v366_v63  ;;  %911 = vmatmul.mubr.f32.vlgmr.msra.gmra.mrb[0].mxu1 %v414_v1  ;;  %v539_v63 = vld [vmem:[%s6767_s3 + $0x168] sm:$0xff]  ;;  %v382_v1 = vld [vmem:[%s6765_s1 + $0x80] sm:$0xff] }
  0x37   : > { %628 = vmatprep.mubr.f32.mxu0 %v3935_v0  ;;  %916 = vmatprep.mubr.f32.mxu1 %v3935_v0 }
  0x39   : > { %1242 = vperm.xlu1 %3878, %v515_v15   ;;  %1237 = vperm.xlu0 %3877, %v514_v18   ;;  %v549_v15 = vld [vmem:[%s6767_s3 + $0x1b8] sm:$0xff]  ;;  %v551_v18 = vld [vmem:[%s6767_s3 + $0x1c8] sm:$0xff] }
  0x3a   : > { %629 = vmatmul.mubr.f32.gmra.mrb[2].mxu0 %v367_v4  ;;  %917 = vmatmul.mubr.f32.gmra.mrb[2].mxu1 %v415_v5  ;;  %v383_v4 = vld [vmem:[%s6765_s1 + $0x88] sm:$0xff]  ;;  %v540_v5 = vld [vmem:[%s6767_s3 + $0x170] sm:$0xff] }
  0x3b   : > { %634 = vmatprep.mubr.f32.mxu0 %v3935_v0  ;;  %922 = vmatprep.mubr.f32.mxu1 %v3935_v0 }
  0x3d   : > { %1252 = vperm.xlu1 %3878, %v517_v19   ;;  %1247 = vperm.xlu0 %3877, %v516_v22   ;;  %v388_v19 = vld [vmem:[%s6765_s1 + $0xb0] sm:$0xff]  ;;  %v389_v22 = vld [vmem:[%s6765_s1 + $0xb8] sm:$0xff] }
  0x3e   : > { %635 = vmatmul.mubr.f32.gmra.mrb[4].mxu0 %v368_v8  ;;  %923 = vmatmul.mubr.f32.gmra.mrb[4].mxu1 %v416_v9  ;;  %v542_v8 = vld [vmem:[%s6767_s3 + $0x180] sm:$0xff]  ;;  %v545_v9 = vld [vmem:[%s6767_s3 + $0x198] sm:$0xff] }
  0x3f   : > { %640 = vmatprep.mubr.f32.mxu0 %v3935_v0  ;;  %928 = vmatprep.mubr.f32.mxu1 %v3935_v0 }
  0x41   : > { %1262 = vperm.xlu1 %3878, %v519_v23   ;;  %1257 = vperm.xlu0 %3877, %v518_v26   ;;  %v552_v23 = vld [vmem:[%s6767_s3 + $0x1d0] sm:$0xff]  ;;  %v554_v26 = vld [vmem:[%s6767_s3 + $0x1e0] sm:$0xff] }
  0x42   : > { %641 = vmatmul.mubr.f32.gmra.mrb[6].mxu0 %v369_v12  ;;  %929 = vmatmul.mubr.f32.gmra.mrb[6].mxu1 %v417_v13  ;;  %v547_v12 = vld [vmem:[%s6767_s3 + $0x1a8] sm:$0xff]  ;;  %v386_v13 = vld [vmem:[%s6765_s1 + $0xa0] sm:$0xff] }
  0x43   : > { %646 = vmatprep.mubr.f32.mxu0 %v3935_v0  ;;  %934 = vmatprep.mubr.f32.mxu1 %v3935_v0 }
  0x45   : > { %1272 = vperm.xlu1 %3878, %v521_v27   ;;  %1267 = vperm.xlu0 %3877, %v520_v30   ;;  %v557_v27 = vld [vmem:[%s6767_s3 + $0x1f8] sm:$0xff]  ;;  %v392_v30 = vld [vmem:[%s6765_s1 + $0xd0] sm:$0xff] }
  0x46   : > { %647 = vmatmul.mubr.f32.gmra.mrb[8].mxu0 %v370_v16  ;;  %935 = vmatmul.mubr.f32.gmra.mrb[8].mxu1 %v418_v17  ;;  %v387_v16 = vld [vmem:[%s6765_s1 + $0xa8] sm:$0xff]  ;;  %v548_v17 = vld [vmem:[%s6767_s3 + $0x1b0] sm:$0xff] }
  0x47   : > { %652 = vmatprep.mubr.f32.mxu0 %v3935_v0  ;;  %940 = vmatprep.mubr.f32.mxu1 %v3935_v0 }
  0x49   : > { %1282 = vperm.xlu1 %3878, %v523_v31   ;;  %1277 = vperm.xlu0 %3877, %v522_v34   ;;  %v393_v31 = vld [vmem:[%s6765_s1 + $0xd8] sm:$0xff]  ;;  %v396_v34 = vld [vmem:[%s6765_s1 + $0xf0] sm:$0xff] }
  0x4a   : > { %653 = vmatmul.mubr.f32.gmra.mrb[10].mxu0 %v371_v20  ;;  %941 = vmatmul.mubr.f32.gmra.mrb[10].mxu1 %v419_v21  ;;  %v550_v20 = vld [vmem:[%s6767_s3 + $0x1c0] sm:$0xff]  ;;  %v553_v21 = vld [vmem:[%s6767_s3 + $0x1d8] sm:$0xff] }
  0x4b   : > { %658 = vmatprep.mubr.f32.mxu0 %v3935_v0  ;;  %946 = vmatprep.mubr.f32.mxu1 %v3935_v0 }
  0x4d   : > { %1292 = vperm.xlu1 %3878, %v525_v35   ;;  %1287 = vperm.xlu0 %3877, %v524_v38   ;;  %v397_v35 = vld [vmem:[%s6765_s1 + $0xf8] sm:$0xff]  ;;  %v400_v38 = vld [vmem:[%s6765_s1 + $0x110] sm:$0xff] }
  0x4e   : > { %659 = vmatmul.mubr.f32.gmra.mrb[12].mxu0 %v372_v24  ;;  %947 = vmatmul.mubr.f32.gmra.mrb[12].mxu1 %v420_v25  ;;  %v555_v24 = vld [vmem:[%s6767_s3 + $0x1e8] sm:$0xff]  ;;  %v390_v25 = vld [vmem:[%s6765_s1 + $0xc0] sm:$0xff] }
  0x4f   : > { %664 = vmatprep.mubr.f32.mxu0 %v3935_v0  ;;  %952 = vmatprep.mubr.f32.mxu1 %v3935_v0 }
  0x51   : > { %1302 = vperm.xlu1 %3878, %v527_v39   ;;  %1297 = vperm.xlu0 %3877, %v526_v42   ;;  %v401_v39 = vld [vmem:[%s6765_s1 + $0x118] sm:$0xff]  ;;  %v404_v42 = vld [vmem:[%s6765_s1 + $0x130] sm:$0xff] }
  0x52   : > { %665 = vmatmul.mubr.f32.gmra.mrb[14].mxu0 %v373_v28  ;;  %953 = vmatmul.mubr.f32.gmra.mrb[14].mxu1 %v421_v29  ;;  %v391_v28 = vld [vmem:[%s6765_s1 + $0xc8] sm:$0xff]  ;;  %v556_v29 = vld [vmem:[%s6767_s3 + $0x1f0] sm:$0xff] }
  0x53   : > { %670 = vmatprep.mubr.f32.mxu0 %v3935_v0  ;;  %958 = vmatprep.mubr.f32.mxu1 %v3935_v0 }
  0x55   : > { %1312 = vperm.xlu1 %3878, %v529_v43   ;;  %1307 = vperm.xlu0 %3877, %v528_v46   ;;  %v405_v43 = vld [vmem:[%s6765_s1 + $0x138] sm:$0xff]  ;;  %v408_v46 = vld [vmem:[%s6765_s1 + $0x150] sm:$0xff] }
  0x56   : > { %671 = vmatmul.mubr.f32.gmra.mrb[16].mxu0 %v374_v32  ;;  %959 = vmatmul.mubr.f32.gmra.mrb[16].mxu1 %v422_v33  ;;  %v394_v32 = vld [vmem:[%s6765_s1 + $0xe0] sm:$0xff]  ;;  %v395_v33 = vld [vmem:[%s6765_s1 + $0xe8] sm:$0xff] }
  0x57   : > { %676 = vmatprep.mubr.f32.mxu0 %v3935_v0  ;;  %964 = vmatprep.mubr.f32.mxu1 %v3935_v0 }
  0x59   : > { %1322 = vperm.xlu1 %3878, %v531_v47   ;;  %1317 = vperm.xlu0 %3877, %v530_v50   ;;  %v409_v47 = vld [vmem:[%s6765_s1 + $0x158] sm:$0xff] }
  0x5a   : > { %677 = vmatmul.mubr.f32.gmra.mrb[18].mxu0 %v375_v36  ;;  %965 = vmatmul.mubr.f32.gmra.mrb[18].mxu1 %v423_v37  ;;  %v398_v36 = vld [vmem:[%s6765_s1 + $0x100] sm:$0xff]  ;;  %v399_v37 = vld [vmem:[%s6765_s1 + $0x108] sm:$0xff] }
  0x5b   : > { %682 = vmatprep.mubr.f32.mxu0 %v3935_v0  ;;  %970 = vmatprep.mubr.f32.mxu1 %v3935_v0 }
  0x5d   : > { %1332 = vperm.xlu1 %3878, %v533_v51   ;;  %1327 = vperm.xlu0 %3877, %v532_v54  }
  0x5e   : > { %683 = vmatmul.mubr.f32.gmra.mrb[20].mxu0 %v376_v40  ;;  %971 = vmatmul.mubr.f32.gmra.mrb[20].mxu1 %v424_v41  ;;  %v402_v40 = vld [vmem:[%s6765_s1 + $0x120] sm:$0xff]  ;;  %v403_v41 = vld [vmem:[%s6765_s1 + $0x128] sm:$0xff] }
  0x5f   : > { %688 = vmatprep.mubr.f32.mxu0 %v3935_v0  ;;  %976 = vmatprep.mubr.f32.mxu1 %v3935_v0 }
  0x61   : > { %1342 = vperm.xlu1 %3878, %v535_v55   ;;  %1337 = vperm.xlu0 %3877, %v534_v58   ;;  %v413_v55 = vld [vmem:[%s6765_s1 + $0x178] sm:$0xff] }
  0x62   : > { %689 = vmatmul.mubr.f32.gmra.mrb[22].mxu0 %v377_v44  ;;  %977 = vmatmul.mubr.f32.gmra.mrb[22].mxu1 %v425_v45  ;;  %v406_v44 = vld [vmem:[%s6765_s1 + $0x140] sm:$0xff]  ;;  %v407_v45 = vld [vmem:[%s6765_s1 + $0x148] sm:$0xff] }
  0x63   : > { %694 = vmatprep.mubr.f32.mxu0 %v3935_v0  ;;  %982 = vmatprep.mubr.f32.mxu1 %v3935_v0 }
  0x65   : > { %1352 = vperm.xlu1 %3878, %v537_v59   ;;  %1347 = vperm.xlu0 %3877, %v536_v62  }
  0x66   : > { %695 = vmatmul.mubr.f32.gmra.mrb[24].mxu0 %v378_v48  ;;  %983 = vmatmul.mubr.f32.gmra.mrb[24].mxu1 %v426_v49  ;;  %v410_v48 = vld [vmem:[%s6765_s1 + $0x160] sm:$0xff]  ;;  %v411_v49 = vld [vmem:[%s6765_s1 + $0x168] sm:$0xff] }
  0x67   : > { %700 = vmatprep.mubr.f32.mxu0 %v3935_v0  ;;  %988 = vmatprep.mubr.f32.mxu1 %v3935_v0 }
  0x69   : > { %1362 = vperm.xlu1 %3878, %v539_v63   ;;  %1357 = vperm.xlu0 %3877, %v538_v2  }
  0x6a   : > { %701 = vmatmul.mubr.f32.gmra.mrb[26].mxu0 %v379_v52  ;;  %989 = vmatmul.mubr.f32.gmra.mrb[26].mxu1 %v427_v53  ;;  %v412_v52 = vld [vmem:[%s6765_s1 + $0x170] sm:$0xff] }
  0x6b   : > { %706 = vmatprep.mubr.f32.mxu0 %v3935_v0  ;;  %994 = vmatprep.mubr.f32.mxu1 %v3935_v0 }
  0x6d   : > { %1372 = vperm.xlu1 %3878, %v541_v3   ;;  %1367 = vperm.xlu0 %3877, %v540_v5  }
  0x6e   : > { %707 = vmatmul.mubr.f32.gmra.mrb[28].mxu0 %v380_v56  ;;  %995 = vmatmul.mubr.f32.gmra.mrb[28].mxu1 %v428_v57 }
  0x6f   : > { %712 = vmatprep.mubr.f32.mxu0 %v3935_v0  ;;  %1000 = vmatprep.mubr.f32.mxu1 %v3935_v0 }
  0x71   : > { %1382 = vperm.xlu1 %3878, %v543_v6   ;;  %1377 = vperm.xlu0 %3877, %v542_v8  }
  0x72   : > { %713 = vmatmul.mubr.f32.gmra.mrb[30].mxu0 %v381_v60  ;;  %1001 = vmatmul.mubr.f32.gmra.mrb[30].mxu1 %v429_v61 }
  0x73   : > { %718 = vmatprep.mubr.f32.mxu0 %v3935_v0 }
  0x75   : > { %1392 = vperm.xlu1 %3878, %v545_v9   ;;  %1387 = vperm.xlu0 %3877, %v544_v11  }
  0x76   : > { %719 = vmatmul.mubr.f32.gmra.mrb[32].mxu0 %v382_v1 }
  0x77   : > { %724 = vmatprep.mubr.f32.mxu0 %v3935_v0 }
  0x79   : > { %1402 = vperm.xlu1 %3878, %v547_v12   ;;  %1397 = vperm.xlu0 %3877, %v546_v14  }
  0x7a   : > { %725 = vmatmul.mubr.f32.gmra.mrb[34].mxu0 %v383_v4 }
  0x7b   : > { %730 = vmatprep.mubr.f32.mxu0 %v3935_v0 }
  0x7d   : > { %1412 = vperm.xlu1 %3878, %v549_v15   ;;  %1407 = vperm.xlu0 %3877, %v548_v17  }
  0x7e   : > { %731 = vmatmul.mubr.f32.gmra.mrb[36].mxu0 %v384_v7 }
  0x7f   : > { %736 = vmatprep.mubr.f32.mxu0 %v3935_v0 }
  0x81   : > { %1422 = vperm.xlu1 %3878, %v551_v18   ;;  %1417 = vperm.xlu0 %3877, %v550_v20  }
  0x82   : > { %737 = vmatmul.mubr.f32.gmra.mrb[38].mxu0 %v385_v10 }
  0x83   : > { %742 = vmatprep.mubr.f32.mxu0 %v3935_v0 }
  0x85   : > { %1432 = vperm.xlu1 %3878, %v553_v21   ;;  %1427 = vperm.xlu0 %3877, %v552_v23  }
  0x86   : > { %743 = vmatmul.mubr.f32.gmra.mrb[40].mxu0 %v386_v13 }
  0x87   : > { %748 = vmatprep.mubr.f32.mxu0 %v3935_v0 }
  0x89   : > { %1442 = vperm.xlu1 %3878, %v555_v24   ;;  %1437 = vperm.xlu0 %3877, %v554_v26  }
  0x8a   : > { %749 = vmatmul.mubr.f32.gmra.mrb[42].mxu0 %v387_v16 }
  0x8b   : > { %754 = vmatprep.mubr.f32.mxu0 %v3935_v0 }
  0x8d   : > { %1452 = vperm.xlu1 %3878, %v557_v27   ;;  %1447 = vperm.xlu0 %3877, %v556_v29  }
  0x8e   : > { %755 = vmatmul.mubr.f32.gmra.mrb[44].mxu0 %v388_v19 }
  0x8f   : > { %760 = vmatprep.mubr.f32.mxu0 %v3935_v0 }
  0x90   : > { %v1148_v50 = vpop.permute.xlu1 %1147  ;;  %v1138_v51 = vpop.permute.xlu0 %1137 }
  0x92   : > { %761 = vmatmul.mubr.f32.gmra.mrb[46].mxu0 %v389_v22 }
  0x93   : > { %766 = vmatprep.mubr.f32.mxu0 %v3935_v0 }
  0x94   : > { %v1153_v53 = vpop.permute.xlu1 %1152  ;;  %v1143_v54 = vpop.permute.xlu0 %1142 }
  0x96   : > { %767 = vmatmul.mubr.f32.gmra.mrb[48].mxu0 %v390_v25 }
  0x97   : > { %772 = vmatprep.mubr.f32.mxu0 %v3935_v0 }
  0x98   : > { %v4482_v56 = vpop.permute.xlu1 %1162  ;;  %v1158_v57 = vpop.permute.xlu0 %1157 }
  0x9a   : > { %773 = vmatmul.mubr.f32.gmra.mrb[50].mxu0 %v391_v28 }
  0x9b   : > { %778 = vmatprep.mubr.f32.mxu0 %v3935_v0 }
  0x9c   : > { %v4484_v58 = vpop.permute.xlu1 %1172  ;;  %v4486_v59 = vpop.permute.xlu0 %1167 }
  0x9e   : > { %779 = vmatmul.mubr.f32.gmra.mrb[52].mxu0 %v392_v30 }
  0x9f   : > { %784 = vmatprep.mubr.f32.mxu0 %v3935_v0 }
  0xa0   : > { %v4488_v60 = vpop.permute.xlu1 %1182  ;;  %v4490_v61 = vpop.permute.xlu0 %1177 }
  0xa2   : > { %785 = vmatmul.mubr.f32.gmra.mrb[54].mxu0 %v393_v31 }
  0xa3   : > { %790 = vmatprep.mubr.f32.mxu0 %v3935_v0 }
  0xa4   : > { %v4492_v62 = vpop.permute.xlu1 %1192  ;;  %v4494_v63 = vpop.permute.xlu0 %1187 }
  0xa6   : > { %791 = vmatmul.mubr.f32.gmra.mrb[56].mxu0 %v394_v32 }
  0xa7   : > { %796 = vmatprep.mubr.f32.mxu0 %v3935_v0 }
  0xa8   : > { %v4500_v4 = vpop.permute.xlu1 %1202  ;;  %v4502_v5 = vpop.permute.xlu0 %1197 }
  0xaa   : > { %797 = vmatmul.mubr.f32.gmra.mrb[58].mxu0 %v395_v33 }
  0xab   : > { %802 = vmatprep.mubr.f32.mxu0 %v3935_v0 }
  0xac   : > { %v4512_v18 = vpop.permute.xlu1 %1212  ;;  %v4514_v19 = vpop.permute.xlu0 %1207 }
  0xae   : > { %803 = vmatmul.mubr.f32.gmra.mrb[60].mxu0 %v396_v34 }
  0xaf   : > { %808 = vmatprep.mubr.f32.mxu0 %v3935_v0 }
  0xb2   : > { %809 = vmatmul.mubr.f32.gmra.mrb[62].mxu0 %v397_v35 }
  0xb3   : > { %814 = vmatprep.mubr.f32.mxu0 %v3935_v0 }
  0xb6   : > { %815 = vmatmul.mubr.f32.gmra.mrb[64].mxu0 %v398_v36 }
  0xb7   : > { %820 = vmatprep.mubr.f32.mxu0 %v3935_v0 }
  0xba   : > { %821 = vmatmul.mubr.f32.gmra.mrb[66].mxu0 %v399_v37 }
  0xbb   : > { %826 = vmatprep.mubr.f32.mxu0 %v3935_v0 }
  0xbe   : > { %827 = vmatmul.mubr.f32.gmra.mrb[68].mxu0 %v400_v38 }
  0xbf   : > { %832 = vmatprep.mubr.f32.mxu0 %v3935_v0 }
  0xc2   : > { %833 = vmatmul.mubr.f32.gmra.mrb[70].mxu0 %v401_v39 }
  0xc3   : > { %838 = vmatprep.mubr.f32.mxu0 %v3935_v0 }
  0xc6   : > { %839 = vmatmul.mubr.f32.gmra.mrb[72].mxu0 %v402_v40 }
  0xc7   : > { %844 = vmatprep.mubr.f32.mxu0 %v3935_v0 }
  0xca   : > { %845 = vmatmul.mubr.f32.gmra.mrb[74].mxu0 %v403_v41 }
  0xcb   : > { %850 = vmatprep.mubr.f32.mxu0 %v3935_v0 }
  0xce   : > { %851 = vmatmul.mubr.f32.gmra.mrb[76].mxu0 %v404_v42 }
  0xcf   : > { %856 = vmatprep.mubr.f32.mxu0 %v3935_v0 }
  0xd2   : > { %857 = vmatmul.mubr.f32.gmra.mrb[78].mxu0 %v405_v43 }
  0xd3   : > { %862 = vmatprep.mubr.f32.mxu0 %v3935_v0 }
  0xd6   : > { %863 = vmatmul.mubr.f32.gmra.mrb[80].mxu0 %v406_v44 }
  0xd7   : > { %868 = vmatprep.mubr.f32.mxu0 %v3935_v0 }
  0xda   : > { %869 = vmatmul.mubr.f32.gmra.mrb[82].mxu0 %v407_v45 }
  0xdb   : > { %874 = vmatprep.mubr.f32.mxu0 %v3935_v0 }
  0xde   : > { %875 = vmatmul.mubr.f32.gmra.mrb[84].mxu0 %v408_v46  ;;  %v4548_v46 = vpop.permute.xlu1 %1222 }
  0xdf   : > { %880 = vmatprep.mubr.f32.mxu0 %v3935_v0 }
  0xe2   : > { %881 = vmatmul.mubr.f32.gmra.mrb[86].mxu0 %v409_v47  ;;  %v4550_v47 = vpop.permute.xlu0 %1217 }
  0xe3   : > { %886 = vmatprep.mubr.f32.mxu0 %v3935_v0 }
  0xe6   : > { %887 = vmatmul.mubr.f32.gmra.mrb[88].mxu0 %v410_v48 }
  0xe7   : > { %892 = vmatprep.mubr.f32.mxu0 %v3935_v0 }
  0xea   : > { %893 = vmatmul.mubr.f32.gmra.mrb[90].mxu0 %v411_v49 }
  0xeb   : > { %898 = vmatprep.mubr.f32.mxu0 %v3935_v0 }
  0xee   : > { %899 = vmatmul.mubr.f32.gmra.mrb[92].mxu0 %v412_v52 }
  0xef   : > { %904 = vmatprep.mubr.f32.mxu0 %v3935_v0 }
  0xf2   : > { %905 = vmatmul.mubr.f32.gmra.mrb[94].mxu0 %v413_v55 }
 0x109   : > { %v624_v0 = vpop.f32.mrb[0].mxu0  ;;  %v4496_v1 = vpop.f32.mrb[0].mxu1 }
 0x10a   : > { %v626_v2 = vpop.f32.mrb[1].mxu0  ;;  %v4498_v3 = vpop.f32.mrb[1].mxu1  ;;  %v1007_v10 = vmul.f32 2.0, %v624_v0 }
 0x10b   : > { %v1008_v11 = vmul.f32 2.0, %v626_v2 }
 0x10c   : > { %v4516_v20 = vsub.f32 %v1138_v51, %v1007_v10 }
 0x10d   : > { %v630_v6 = vpop.f32.mrb[2].mxu0  ;;  %v4504_v7 = vpop.f32.mrb[2].mxu1  ;;  %v4520_v23 = vsub.f32 %v1138_v51, %v1008_v11 }
 0x10e   : > { %v632_v8 = vpop.f32.mrb[3].mxu0  ;;  %v4506_v9 = vpop.f32.mrb[3].mxu1  ;;  %7080 = vst [vmem:[#allocation2_spill] sm:$0xff] %v4516_v20  ;;  %v1009_v21 = vmul.f32 2.0, %v630_v6 }
 0x10f   : > { %7082 = vst [vmem:[#allocation4_spill] sm:$0xff] %v4520_v23  ;;  %v1010_v24 = vmul.f32 2.0, %v632_v8 }
 0x110   : > { %v4532_v34 = vsub.f32 %v1143_v54, %v1009_v21 }
 0x111   : > { %v636_v12 = vpop.f32.mrb[4].mxu0  ;;  %v4508_v13 = vpop.f32.mrb[4].mxu1  ;;  %v4536_v36 = vsub.f32 %v1143_v54, %v1010_v24 }
 0x112   : > { %v1011_v14 = vmul.f32 2.0, %v636_v12  ;;  %v638_v15 = vpop.f32.mrb[5].mxu0  ;;  %v4510_v16 = vpop.f32.mrb[5].mxu1  ;;  %7084 = vst [vmem:[#allocation6_spill] sm:$0xff] %v4532_v34 }
 0x113   : > { %v1012_v17 = vmul.f32 2.0, %v638_v15  ;;  %7086 = vst [vmem:[#allocation8_spill] sm:$0xff] %v4536_v36  ;;  %v4574_v24 = vpop.permute.xlu1 %1232 }
 0x114   : > { %v4518_v22 = vsub.f32 %v1148_v50, %v1011_v14 }
 0x115   : > { %v4522_v25 = vsub.f32 %v1148_v50, %v1012_v17  ;;  %v642_v26 = vpop.f32.mrb[6].mxu0  ;;  %v4524_v27 = vpop.f32.mrb[6].mxu1 }
 0x116   : > { %7081 = vst [vmem:[#allocation3_spill] sm:$0xff] %v4518_v22  ;;  %v1583_v28 = vmin.f32 %v4516_v20, %v4518_v22  ;;  %v1013_v29 = vmul.f32 2.0, %v642_v26  ;;  %v644_v30 = vpop.f32.mrb[7].mxu0  ;;  %v4528_v31 = vpop.f32.mrb[7].mxu1 }
 0x117   : > { %7083 = vst [vmem:[#allocation5_spill] sm:$0xff] %v4522_v25  ;;  %v1652_v32 = vmin.f32 %v4520_v23, %v4522_v25  ;;  %v1014_v33 = vmul.f32 2.0, %v644_v30  ;;  %v4576_v26 = vpop.permute.xlu0 %1227 }
 0x118   : > { %v4534_v35 = vsub.f32 %v1153_v53, %v1013_v29 }
 0x119   : > { %v4538_v37 = vsub.f32 %v1153_v53, %v1014_v33  ;;  %v648_v38 = vpop.f32.mrb[8].mxu0  ;;  %v4540_v39 = vpop.f32.mrb[8].mxu1 }
 0x11a   : > { %7085 = vst [vmem:[#allocation7_spill] sm:$0xff] %v4534_v35  ;;  %v1584_v40 = vmin.f32 %v4532_v34, %v4534_v35  ;;  %v1015_v41 = vmul.f32 2.0, %v648_v38  ;;  %v650_v42 = vpop.f32.mrb[9].mxu0  ;;  %v4544_v43 = vpop.f32.mrb[9].mxu1 }
 0x11b   : > { %7087 = vst [vmem:[#allocation9_spill] sm:$0xff] %v4538_v37  ;;  %v1653_v44 = vmin.f32 %v4536_v36, %v4538_v37  ;;  %v1016_v45 = vmul.f32 2.0, %v650_v42 }
 0x11c   : > { %v4552_v48 = vsub.f32 %v1158_v57, %v1015_v41 }
 0x11d   : > { %v4554_v49 = vsub.f32 %v1158_v57, %v1016_v45  ;;  %v654_v50 = vpop.f32.mrb[10].mxu0  ;;  %v4556_v51 = vpop.f32.mrb[10].mxu1 }
 0x11e   : > { %7088 = vst [vmem:[#allocation10_spill] sm:$0xff] %v4552_v48  ;;  %v1585_v52 = vmin.f32 %v1583_v28, %v4552_v48  ;;  %v1017_v53 = vmul.f32 2.0, %v654_v50  ;;  %v656_v54 = vpop.f32.mrb[11].mxu0  ;;  %v4559_v55 = vpop.f32.mrb[11].mxu1 }
 0x11f   : > { %7089 = vst [vmem:[#allocation11_spill] sm:$0xff] %v4554_v49  ;;  %v1654_v0 = vmin.f32 %v1652_v32, %v4554_v49  ;;  %v1018_v2 = vmul.f32 2.0, %v656_v54 }
 0x120   : > { %v4563_v6 = vsub.f32 %v4482_v56, %v1017_v53 }
 0x121   : > { %v4566_v8 = vsub.f32 %v4482_v56, %v1018_v2  ;;  %v660_v57 = vpop.f32.mrb[12].mxu0  ;;  %v4568_v10 = vpop.f32.mrb[12].mxu1 }
 0x122   : > { %7090 = vst [vmem:[#allocation12_spill] sm:$0xff] %v4563_v6  ;;  %v1586_v11 = vmin.f32 %v1584_v40, %v4563_v6  ;;  %v1019_v12 = vmul.f32 2.0, %v660_v57  ;;  %v662_v14 = vpop.f32.mrb[13].mxu0  ;;  %v4571_v15 = vpop.f32.mrb[13].mxu1 }
 0x123   : > { %7091 = vst [vmem:[#allocation13_spill] sm:$0xff] %v4566_v8  ;;  %v1655_v17 = vmin.f32 %v1653_v44, %v4566_v8  ;;  %v1020_v21 = vmul.f32 2.0, %v662_v14  ;;  %v4604_v14 = vpop.permute.xlu0 %1237 }
 0x124   : > { %v4579_v28 = vsub.f32 %v4486_v59, %v1019_v12 }
 0x125   : > { %v4582_v56 = vsub.f32 %v4486_v59, %v1020_v21  ;;  %v666_v29 = vpop.f32.mrb[14].mxu0  ;;  %v4584_v30 = vpop.f32.mrb[14].mxu1 }
 0x126   : > { %7092 = vst [vmem:[#allocation14_spill] sm:$0xff] %v4579_v28  ;;  %v1587_v32 = vmin.f32 %v1585_v52, %v4579_v28  ;;  %v1021_v33 = vmul.f32 2.0, %v666_v29  ;;  %v668_v38 = vpop.f32.mrb[15].mxu0  ;;  %v4587_v40 = vpop.f32.mrb[15].mxu1 }
 0x127   : > { %7093 = vst [vmem:[#allocation15_spill] sm:$0xff] %v4582_v56  ;;  %v1656_v41 = vmin.f32 %v1654_v0, %v4582_v56  ;;  %v1022_v42 = vmul.f32 2.0, %v668_v38  ;;  %v4602_v0 = vpop.permute.xlu1 %1242 }
 0x128   : > { %v4591_v44 = vsub.f32 %v4484_v58, %v1021_v33 }
 0x129   : > { %v4594_v45 = vsub.f32 %v4484_v58, %v1022_v42  ;;  %v672_v59 = vpop.f32.mrb[16].mxu0  ;;  %v4596_v50 = vpop.f32.mrb[16].mxu1 }
 0x12a   : > { %7094 = vst [vmem:[#allocation16_spill] sm:$0xff] %v4591_v44  ;;  %v1588_v53 = vmin.f32 %v1586_v11, %v4591_v44  ;;  %v1023_v54 = vmul.f32 2.0, %v672_v59  ;;  %v674_v52 = vpop.f32.mrb[17].mxu0  ;;  %v4599_v2 = vpop.f32.mrb[17].mxu1 }
 0x12b   : > { %7095 = vst [vmem:[#allocation17_spill] sm:$0xff] %v4594_v45  ;;  %v1657_v57 = vmin.f32 %v1655_v17, %v4594_v45  ;;  %v1024_v12 = vmul.f32 2.0, %v674_v52 }
 0x12c   : > { %v4607_v21 = vsub.f32 %v4490_v61, %v1023_v54 }
 0x12d   : > { %v4610_v58 = vsub.f32 %v4490_v61, %v1024_v12  ;;  %v678_v29 = vpop.f32.mrb[18].mxu0  ;;  %v4612_v33 = vpop.f32.mrb[18].mxu1 }
 0x12e   : > { %7096 = vst [vmem:[#allocation18_spill] sm:$0xff] %v4607_v21  ;;  %v1589_v11 = vmin.f32 %v1587_v32, %v4607_v21  ;;  %v1025_v38 = vmul.f32 2.0, %v678_v29  ;;  %v680_v42 = vpop.f32.mrb[19].mxu0  ;;  %v4615_v59 = vpop.f32.mrb[19].mxu1 }
 0x12f   : > { %7097 = vst [vmem:[#allocation19_spill] sm:$0xff] %v4610_v58  ;;  %v1658_v17 = vmin.f32 %v1656_v41, %v4610_v58  ;;  %v1026_v52 = vmul.f32 2.0, %v680_v42  ;;  %v4630_v41 = vpop.permute.xlu1 %1252  ;;  %v4632_v42 = vpop.permute.xlu0 %1247 }
 0x130   : > { %v4619_v45 = vsub.f32 %v4488_v60, %v1025_v38 }
 0x131   : > { %v4622_v54 = vsub.f32 %v4488_v60, %v1026_v52  ;;  %v684_v61 = vpop.f32.mrb[20].mxu0  ;;  %v4624_v12 = vpop.f32.mrb[20].mxu1 }
 0x132   : > { %7098 = vst [vmem:[#allocation20_spill] sm:$0xff] %v4619_v45  ;;  %v1590_v56 = vmin.f32 %v1588_v53, %v4619_v45  ;;  %v1027_v8 = vmul.f32 2.0, %v684_v61  ;;  %v686_v32 = vpop.f32.mrb[21].mxu0  ;;  %v4627_v29 = vpop.f32.mrb[21].mxu1 }
 0x133   : > { %7099 = vst [vmem:[#allocation21_spill] sm:$0xff] %v4622_v54  ;;  %v1659_v49 = vmin.f32 %v1657_v57, %v4622_v54  ;;  %v1028_v21 = vmul.f32 2.0, %v686_v32 }
 0x134   : > { %v4635_v38 = vsub.f32 %v4494_v63, %v1027_v8 }
 0x135   : > { %v4638_v60 = vsub.f32 %v4494_v63, %v1028_v21  ;;  %v690_v52 = vpop.f32.mrb[22].mxu0  ;;  %v4640_v58 = vpop.f32.mrb[22].mxu1 }
 0x136   : > { %7100 = vst [vmem:[#allocation22_spill] sm:$0xff] %v4635_v38  ;;  %v1591_v53 = vmin.f32 %v1589_v11, %v4635_v38  ;;  %v1029_v61 = vmul.f32 2.0, %v690_v52  ;;  %v692_v45 = vpop.f32.mrb[23].mxu0  ;;  %v4643_v44 = vpop.f32.mrb[23].mxu1 }
 0x137   : > { %7101 = vst [vmem:[#allocation23_spill] sm:$0xff] %v4638_v60  ;;  %v1660_v57 = vmin.f32 %v1658_v17, %v4638_v60  ;;  %v1030_v32 = vmul.f32 2.0, %v692_v45  ;;  %v4658_v17 = vpop.permute.xlu1 %1262  ;;  %v4660_v45 = vpop.permute.xlu0 %1257 }
 0x138   : > { %v4647_v54 = vsub.f32 %v4492_v62, %v1029_v61 }
 0x139   : > { %v4650_v8 = vsub.f32 %v4492_v62, %v1030_v32  ;;  %v696_v63 = vpop.f32.mrb[24].mxu0  ;;  %v4652_v21 = vpop.f32.mrb[24].mxu1 }
 0x13a   : > { %7102 = vst [vmem:[#allocation24_spill] sm:$0xff] %v4647_v54  ;;  %v1592_v28 = vmin.f32 %v1590_v56, %v4647_v54  ;;  %v1031_v6 = vmul.f32 2.0, %v696_v63  ;;  %v698_v11 = vpop.f32.mrb[25].mxu0  ;;  %v4655_v52 = vpop.f32.mrb[25].mxu1 }
 0x13b   : > { %7103 = vst [vmem:[#allocation25_spill] sm:$0xff] %v4650_v8  ;;  %v1661_v38 = vmin.f32 %v1659_v49, %v4650_v8  ;;  %v1032_v48 = vmul.f32 2.0, %v698_v11 }
 0x13c   : > { %v4663_v61 = vsub.f32 %v4502_v5, %v1031_v6 }
 0x13d   : > { %v4666_v62 = vsub.f32 %v4502_v5, %v1032_v48  ;;  %v702_v32 = vpop.f32.mrb[26].mxu0  ;;  %v4668_v60 = vpop.f32.mrb[26].mxu1 }
 0x13e   : > { %7104 = vst [vmem:[#allocation26_spill] sm:$0xff] %v4663_v61  ;;  %v1593_v56 = vmin.f32 %v1591_v53, %v4663_v61  ;;  %v1033_v63 = vmul.f32 2.0, %v702_v32  ;;  %v704_v54 = vpop.f32.mrb[27].mxu0  ;;  %v4671_v35 = vpop.f32.mrb[27].mxu1 }
 0x13f   : > { %7105 = vst [vmem:[#allocation27_spill] sm:$0xff] %v4666_v62  ;;  %v1662_v49 = vmin.f32 %v1660_v57, %v4666_v62  ;;  %v1034_v11 = vmul.f32 2.0, %v704_v54  ;;  %v4686_v57 = vpop.permute.xlu1 %1272  ;;  %v4688_v54 = vpop.permute.xlu0 %1267 }
 0x140   : > { %v4675_v8 = vsub.f32 %v4500_v4, %v1033_v63 }
 0x141   : > { %v4678_v6 = vsub.f32 %v4500_v4, %v1034_v11  ;;  %v708_v5 = vpop.f32.mrb[28].mxu0  ;;  %v4680_v48 = vpop.f32.mrb[28].mxu1 }
 0x142   : > { %7106 = vst [vmem:[#allocation28_spill] sm:$0xff] %v4675_v8  ;;  %7108 = vst [vmem:[#allocation30_spill] sm:$0xff] %v4680_v48  ;;  %v1594_v22 = vmin.f32 %v1592_v28, %v4675_v8  ;;  %v1035_v34 = vmul.f32 2.0, %v708_v5  ;;  %v710_v53 = vpop.f32.mrb[29].mxu0  ;;  %v4683_v32 = vpop.f32.mrb[29].mxu1 }
 0x143   : > { %7107 = vst [vmem:[#allocation29_spill] sm:$0xff] %v4678_v6  ;;  %7109 = vst [vmem:[#allocation31_spill] sm:$0xff] %v4683_v32  ;;  %v1663_v61 = vmin.f32 %v1661_v38, %v4678_v6  ;;  %v1036_v20 = vmul.f32 2.0, %v710_v53  ;;  %v4712_v23 = vpop.permute.xlu0 %1277 }
 0x144   : > { %v4691_v63 = vsub.f32 %v4514_v19, %v1035_v34 }
 0x145   : > { %v4694_v4 = vsub.f32 %v4514_v19, %v1036_v20  ;;  %v714_v11 = vpop.f32.mrb[30].mxu0  ;;  %v4696_v62 = vpop.f32.mrb[30].mxu1 }
 0x146   : > { %7110 = vst [vmem:[#allocation32_spill] sm:$0xff] %v4691_v63  ;;  %7112 = vst [vmem:[#allocation34_spill] sm:$0xff] %v4696_v62  ;;  %v1595_v28 = vmin.f32 %v1593_v56, %v4691_v63  ;;  %v1037_v5 = vmul.f32 2.0, %v714_v11  ;;  %v716_v8 = vpop.f32.mrb[31].mxu0  ;;  %v4699_v37 = vpop.f32.mrb[31].mxu1 }
 0x147   : > { %7111 = vst [vmem:[#allocation33_spill] sm:$0xff] %v4694_v4  ;;  %7113 = vst [vmem:[#allocation35_spill] sm:$0xff] %v4699_v37  ;;  %v1664_v38 = vmin.f32 %v1662_v49, %v4694_v4  ;;  %v1038_v53 = vmul.f32 2.0, %v716_v8  ;;  %v4708_v20 = vpop.permute.xlu1 %1282 }
 0x148   : > { %v4703_v6 = vsub.f32 %v4512_v18, %v1037_v5 }
 0x149   : > { %v4706_v34 = vsub.f32 %v4512_v18, %v1038_v53  ;;  %v720_v19 = vpop.f32.mrb[32].mxu0 }
 0x14a   : > { %7114 = vst [vmem:[#allocation36_spill] sm:$0xff] %v4703_v6  ;;  %v1596_v25 = vmin.f32 %v1594_v22, %v4703_v6  ;;  %v1039_v36 = vmul.f32 2.0, %v720_v19  ;;  %v722_v56 = vpop.f32.mrb[33].mxu0 }
 0x14b   : > { %7115 = vst [vmem:[#allocation37_spill] sm:$0xff] %v4706_v34  ;;  %v1665_v11 = vmin.f32 %v1663_v61, %v4706_v34  ;;  %v1040_v63 = vmul.f32 2.0, %v722_v56  ;;  %v4722_v6 = vpop.permute.xlu1 %1292  ;;  %v4730_v34 = vpop.permute.xlu0 %1287 }
 0x14c   : > { %v4715_v8 = vsub.f32 %v4550_v47, %v1039_v36 }
 0x14d   : > { %v4718_v49 = vsub.f32 %v4550_v47, %v1040_v63  ;;  %v726_v18 = vpop.f32.mrb[34].mxu0 }
 0x14e   : > { %7116 = vst [vmem:[#allocation38_spill] sm:$0xff] %v4715_v8  ;;  %v1597_v5 = vmin.f32 %v1595_v28, %v4715_v8  ;;  %v1041_v53 = vmul.f32 2.0, %v726_v18  ;;  %v728_v4 = vpop.f32.mrb[35].mxu0 }
 0x14f   : > { %7117 = vst [vmem:[#allocation39_spill] sm:$0xff] %v4718_v49  ;;  %v1666_v22 = vmin.f32 %v1664_v38, %v4718_v49  ;;  %v1042_v19 = vmul.f32 2.0, %v728_v4  ;;  %v4740_v49 = vpop.permute.xlu1 %1302 }
 0x150   : > { %v4725_v61 = vsub.f32 %v4548_v46, %v1041_v53 }
 0x151   : > { %v4728_v56 = vsub.f32 %v4548_v46, %v1042_v19  ;;  %v732_v36 = vpop.f32.mrb[36].mxu0 }
 0x152   : > { %7118 = vst [vmem:[#allocation40_spill] sm:$0xff] %v4725_v61  ;;  %v1598_v47 = vmin.f32 %v1596_v25, %v4725_v61  ;;  %v1043_v63 = vmul.f32 2.0, %v732_v36  ;;  %v734_v28 = vpop.f32.mrb[37].mxu0  ;;  %v4744_v61 = vpop.permute.xlu0 %1297 }
 0x153   : > { %7119 = vst [vmem:[#allocation41_spill] sm:$0xff] %v4728_v56  ;;  %v1667_v18 = vmin.f32 %v1665_v11, %v4728_v56  ;;  %v1044_v8 = vmul.f32 2.0, %v734_v28 }
 0x154   : > { %v4735_v4 = vsub.f32 %v4576_v26, %v1043_v63 }
 0x155   : > { %v4738_v38 = vsub.f32 %v4576_v26, %v1044_v8  ;;  %v738_v53 = vpop.f32.mrb[38].mxu0 }
 0x156   : > { %7120 = vst [vmem:[#allocation42_spill] sm:$0xff] %v4735_v4  ;;  %v1599_v46 = vmin.f32 %v1597_v5, %v4735_v4  ;;  %v1045_v19 = vmul.f32 2.0, %v738_v53  ;;  %v740_v48 = vpop.f32.mrb[39].mxu0  ;;  %v4754_v4 = vpop.permute.xlu1 %1312 }
 0x157   : > { %7121 = vst [vmem:[#allocation43_spill] sm:$0xff] %v4738_v38  ;;  %v1668_v25 = vmin.f32 %v1666_v22, %v4738_v38  ;;  %v1046_v36 = vmul.f32 2.0, %v740_v48  ;;  %v4762_v38 = vpop.permute.xlu0 %1307 }
 0x158   : > { %v4747_v11 = vsub.f32 %v4574_v24, %v1045_v19 }
 0x159   : > { %v4750_v63 = vsub.f32 %v4574_v24, %v1046_v36  ;;  %v744_v26 = vpop.f32.mrb[40].mxu0 }
 0x15a   : > { %7122 = vst [vmem:[#allocation44_spill] sm:$0xff] %v4747_v11  ;;  %v1600_v8 = vmin.f32 %v1598_v47, %v4747_v11  ;;  %v1047_v28 = vmul.f32 2.0, %v744_v26  ;;  %v746_v56 = vpop.f32.mrb[41].mxu0 }
 0x15b   : > { %7123 = vst [vmem:[#allocation45_spill] sm:$0xff] %v4750_v63  ;;  %v1669_v5 = vmin.f32 %v1667_v18, %v4750_v63  ;;  %v1048_v53 = vmul.f32 2.0, %v746_v56  ;;  %v4772_v63 = vpop.permute.xlu1 %1322 }
 0x15c   : > { %v4757_v48 = vsub.f32 %v4604_v14, %v1047_v28 }
 0x15d   : > { %v4760_v22 = vsub.f32 %v4604_v14, %v1048_v53  ;;  %v750_v19 = vpop.f32.mrb[42].mxu0 }
 0x15e   : > { %7124 = vst [vmem:[#allocation46_spill] sm:$0xff] %v4757_v48  ;;  %v1601_v24 = vmin.f32 %v1599_v46, %v4757_v48  ;;  %v1049_v36 = vmul.f32 2.0, %v750_v19  ;;  %v752_v47 = vpop.f32.mrb[43].mxu0  ;;  %v4776_v48 = vpop.permute.xlu0 %1317 }
 0x15f   : > { %7125 = vst [vmem:[#allocation47_spill] sm:$0xff] %v4760_v22  ;;  %v1670_v26 = vmin.f32 %v1668_v25, %v4760_v22  ;;  %v1050_v11 = vmul.f32 2.0, %v752_v47 }
 0x160   : > { %v4767_v56 = vsub.f32 %v4602_v0, %v1049_v36 }
 0x161   : > { %v4770_v18 = vsub.f32 %v4602_v0, %v1050_v11  ;;  %v756_v28 = vpop.f32.mrb[44].mxu0 }
 0x162   : > { %7126 = vst [vmem:[#allocation48_spill] sm:$0xff] %v4767_v56  ;;  %v1602_v14 = vmin.f32 %v1600_v8, %v4767_v56  ;;  %v1051_v53 = vmul.f32 2.0, %v756_v28  ;;  %v758_v32 = vpop.f32.mrb[45].mxu0  ;;  %v4786_v56 = vpop.permute.xlu1 %1332 }
 0x163   : > { %7127 = vst [vmem:[#allocation49_spill] sm:$0xff] %v4770_v18  ;;  %v1671_v46 = vmin.f32 %v1669_v5, %v4770_v18  ;;  %v1052_v19 = vmul.f32 2.0, %v758_v32  ;;  %v4794_v18 = vpop.permute.xlu0 %1327 }
 0x164   : > { %v4779_v25 = vsub.f32 %v4632_v42, %v1051_v53 }
 0x165   : > { %v4782_v36 = vsub.f32 %v4632_v42, %v1052_v19  ;;  %v762_v0 = vpop.f32.mrb[46].mxu0 }
 0x166   : > { %7128 = vst [vmem:[#allocation50_spill] sm:$0xff] %v4779_v25  ;;  %v1603_v11 = vmin.f32 %v1601_v24, %v4779_v25  ;;  %v1053_v47 = vmul.f32 2.0, %v762_v0  ;;  %v764_v22 = vpop.f32.mrb[47].mxu0 }
 0x167   : > { %7129 = vst [vmem:[#allocation51_spill] sm:$0xff] %v4782_v36  ;;  %v1672_v8 = vmin.f32 %v1670_v26, %v4782_v36  ;;  %v1054_v28 = vmul.f32 2.0, %v764_v22  ;;  %v4804_v36 = vpop.permute.xlu1 %1342 }
 0x168   : > { %v4789_v32 = vsub.f32 %v4630_v41, %v1053_v47 }
 0x169   : > { %v4792_v5 = vsub.f32 %v4630_v41, %v1054_v28  ;;  %v768_v53 = vpop.f32.mrb[48].mxu0 }
 0x16a   : > { %7130 = vst [vmem:[#allocation52_spill] sm:$0xff] %v4789_v32  ;;  %v1604_v42 = vmin.f32 %v1602_v14, %v4789_v32  ;;  %v1055_v19 = vmul.f32 2.0, %v768_v53  ;;  %v770_v24 = vpop.f32.mrb[49].mxu0  ;;  %v4808_v32 = vpop.permute.xlu0 %1337 }
 0x16b   : > { %7131 = vst [vmem:[#allocation53_spill] sm:$0xff] %v4792_v5  ;;  %v1673_v0 = vmin.f32 %v1671_v46, %v4792_v5  ;;  %v1056_v25 = vmul.f32 2.0, %v770_v24 }
 0x16c   : > { %v4799_v22 = vsub.f32 %v4660_v45, %v1055_v19 }
 0x16d   : > { %v4802_v26 = vsub.f32 %v4660_v45, %v1056_v25  ;;  %v774_v47 = vpop.f32.mrb[50].mxu0 }
 0x16e   : > { %7132 = vst [vmem:[#allocation54_spill] sm:$0xff] %v4799_v22  ;;  %v1605_v41 = vmin.f32 %v1603_v11, %v4799_v22  ;;  %v1057_v28 = vmul.f32 2.0, %v774_v47  ;;  %v776_v62 = vpop.f32.mrb[51].mxu0  ;;  %v4818_v22 = vpop.permute.xlu1 %1352 }
 0x16f   : > { %7133 = vst [vmem:[#allocation55_spill] sm:$0xff] %v4802_v26  ;;  %v1674_v14 = vmin.f32 %v1672_v8, %v4802_v26  ;;  %v1058_v53 = vmul.f32 2.0, %v776_v62  ;;  %v4826_v26 = vpop.permute.xlu0 %1347 }
 0x170   : > { %v4811_v46 = vsub.f32 %v4658_v17, %v1057_v28 }
 0x171   : > { %v4814_v19 = vsub.f32 %v4658_v17, %v1058_v53  ;;  %v780_v45 = vpop.f32.mrb[52].mxu0 }
 0x172   : > { %7134 = vst [vmem:[#allocation56_spill] sm:$0xff] %v4811_v46  ;;  %v1606_v25 = vmin.f32 %v1604_v42, %v4811_v46  ;;  %v1059_v24 = vmul.f32 2.0, %v780_v45  ;;  %v782_v5 = vpop.f32.mrb[53].mxu0 }
 0x173   : > { %7135 = vst [vmem:[#allocation57_spill] sm:$0xff] %v4814_v19  ;;  %v1675_v11 = vmin.f32 %v1673_v0, %v4814_v19  ;;  %v1060_v47 = vmul.f32 2.0, %v782_v5  ;;  %v4836_v19 = vpop.permute.xlu1 %1362 }
 0x174   : > { %v4821_v62 = vsub.f32 %v4688_v54, %v1059_v24 }
 0x175   : > { %v4824_v8 = vsub.f32 %v4688_v54, %v1060_v47  ;;  %v786_v28 = vpop.f32.mrb[54].mxu0 }
 0x176   : > { %7136 = vst [vmem:[#allocation58_spill] sm:$0xff] %v4821_v62  ;;  %v1607_v17 = vmin.f32 %v1605_v41, %v4821_v62  ;;  %v1061_v53 = vmul.f32 2.0, %v786_v28  ;;  %v788_v42 = vpop.f32.mrb[55].mxu0  ;;  %v4840_v62 = vpop.permute.xlu0 %1357 }
 0x177   : > { %7137 = vst [vmem:[#allocation59_spill] sm:$0xff] %v4824_v8  ;;  %v1676_v45 = vmin.f32 %v1674_v14, %v4824_v8  ;;  %v1062_v46 = vmul.f32 2.0, %v788_v42 }
 0x178   : > { %v4831_v5 = vsub.f32 %v4686_v57, %v1061_v53 }
 0x179   : > { %v4834_v0 = vsub.f32 %v4686_v57, %v1062_v46  ;;  %v792_v24 = vpop.f32.mrb[56].mxu0 }
 0x17a   : > { %7138 = vst [vmem:[#allocation60_spill] sm:$0xff] %v4831_v5  ;;  %v1608_v54 = vmin.f32 %v1606_v25, %v4831_v5  ;;  %v1063_v47 = vmul.f32 2.0, %v792_v24  ;;  %v794_v37 = vpop.f32.mrb[57].mxu0  ;;  %v4850_v5 = vpop.permute.xlu1 %1372 }
 0x17b   : > { %7139 = vst [vmem:[#allocation61_spill] sm:$0xff] %v4834_v0  ;;  %v1677_v41 = vmin.f32 %v1675_v11, %v4834_v0  ;;  %v1064_v28 = vmul.f32 2.0, %v794_v37  ;;  %7142 = vst [vmem:[#allocation64_spill] sm:$0xff] %v4850_v5  ;;  %v4858_v0 = vpop.permute.xlu0 %1367 }
 0x17c   : > { %v4843_v14 = vsub.f32 %v4712_v23, %v1063_v47 }
 0x17d   : > { %v4846_v53 = vsub.f32 %v4712_v23, %v1064_v28  ;;  %v798_v57 = vpop.f32.mrb[58].mxu0 }
 0x17e   : > { %7140 = vst [vmem:[#allocation62_spill] sm:$0xff] %v4843_v14  ;;  %v1609_v46 = vmin.f32 %v1607_v17, %v4843_v14  ;;  %v1065_v42 = vmul.f32 2.0, %v798_v57  ;;  %v800_v8 = vpop.f32.mrb[59].mxu0 }
 0x17f   : > { %7141 = vst [vmem:[#allocation63_spill] sm:$0xff] %v4846_v53  ;;  %v1678_v25 = vmin.f32 %v1676_v45, %v4846_v53  ;;  %v1066_v24 = vmul.f32 2.0, %v800_v8  ;;  %v1104_v45 = vmul.f32 2.0, %v4498_v3  ;;  %v1383_v53 = vpop.permute.xlu1 %1382 }
 0x180   : > { %v4853_v37 = vsub.f32 %v4708_v20, %v1065_v42  ;;  %v1106_v42 = vmul.f32 2.0, %v4506_v9 }
 0x181   : > { %v4856_v11 = vsub.f32 %v4708_v20, %v1066_v24  ;;  %v804_v47 = vpop.f32.mrb[60].mxu0 }
 0x182   : > { %7143 = vst [vmem:[#allocation65_spill] sm:$0xff] %v4853_v37  ;;  %v1610_v23 = vmin.f32 %v1608_v54, %v4853_v37  ;;  %v1067_v28 = vmul.f32 2.0, %v804_v47  ;;  %v806_v17 = vpop.f32.mrb[61].mxu0  ;;  %v4877_v9 = vsub.f32 %v1383_v53, %v1106_v42 }
 0x183   : > { %7144 = vst [vmem:[#allocation66_spill] sm:$0xff] %v4856_v11  ;;  %v1679_v57 = vmin.f32 %v1677_v41, %v4856_v11  ;;  %v1068_v14 = vmul.f32 2.0, %v806_v17  ;;  %v1103_v17 = vmul.f32 2.0, %v4496_v1  ;;  %v1378_v11 = vpop.permute.xlu0 %1377  ;;  %v1393_v42 = vpop.permute.xlu1 %1392 }
 0x184   : > { %v4863_v8 = vsub.f32 %v4730_v34, %v1067_v28  ;;  %v1105_v28 = vmul.f32 2.0, %v4504_v7  ;;  %7148 = vst [vmem:[#allocation70_spill] sm:$0xff] %v4877_v9 }
 0x185   : > { %v4868_v20 = vsub.f32 %v4730_v34, %v1068_v14  ;;  %v810_v24 = vpop.f32.mrb[62].mxu0  ;;  %v4879_v34 = vsub.f32 %v1378_v11, %v1104_v45  ;;  %v1110_v14 = vmul.f32 2.0, %v4528_v31  ;;  %v1109_v45 = vmul.f32 2.0, %v4524_v27 }
 0x186   : > { %7145 = vst [vmem:[#allocation67_spill] sm:$0xff] %v4863_v8  ;;  %v1611_v5 = vmin.f32 %v1609_v46, %v4863_v8  ;;  %v1069_v54 = vmul.f32 2.0, %v810_v24  ;;  %v812_v47 = vpop.f32.mrb[63].mxu0  ;;  %v4887_v8 = vsub.f32 %v1383_v53, %v1105_v28 }
 0x187   : > { %7146 = vst [vmem:[#allocation68_spill] sm:$0xff] %v4868_v20  ;;  %v1680_v37 = vmin.f32 %v1678_v25, %v4868_v20  ;;  %v1070_v41 = vmul.f32 2.0, %v812_v47  ;;  %7149 = vst [vmem:[#allocation71_spill] sm:$0xff] %v4879_v34 }
 0x188   : > { %v4875_v3 = vsub.f32 %v4722_v6, %v1069_v54  ;;  %7151 = vst [vmem:[#allocation73_spill] sm:$0xff] %v4887_v8  ;;  %v4889_v54 = vsub.f32 %v1378_v11, %v1103_v17 }
 0x189   : > { %v4883_v46 = vsub.f32 %v4722_v6, %v1070_v41  ;;  %v816_v24 = vpop.f32.mrb[64].mxu0  ;;  %v1698_v6 = vmin.f32 %v4877_v9, %v4879_v34  ;;  %v4898_v41 = vsub.f32 %v1393_v42, %v1110_v14  ;;  %v4908_v9 = vsub.f32 %v1393_v42, %v1109_v45 }
 0x18a   : > { %7147 = vst [vmem:[#allocation69_spill] sm:$0xff] %v4875_v3  ;;  %v1612_v25 = vmin.f32 %v1610_v23, %v4875_v3  ;;  %v1071_v47 = vmul.f32 2.0, %v816_v24  ;;  %v818_v1 = vpop.f32.mrb[65].mxu0  ;;  %7152 = vst [vmem:[#allocation74_spill] sm:$0xff] %v4889_v54  ;;  %v1108_v23 = vmul.f32 2.0, %v4510_v16  ;;  %v1388_v16 = vpop.permute.xlu0 %1387 }
 0x18b   : > { %7150 = vst [vmem:[#allocation72_spill] sm:$0xff] %v4883_v46  ;;  %v1681_v7 = vmin.f32 %v1679_v57, %v4883_v46  ;;  %v1072_v20 = vmul.f32 2.0, %v818_v1  ;;  %7154 = vst [vmem:[#allocation76_spill] sm:$0xff] %v4898_v41  ;;  %v1629_v1 = vmin.f32 %v4887_v8, %v4889_v54 }
 0x18c   : > { %v4893_v31 = vsub.f32 %v4744_v61, %v1071_v47  ;;  %v1107_v47 = vmul.f32 2.0, %v4508_v13  ;;  %7156 = vst [vmem:[#allocation78_spill] sm:$0xff] %v4908_v9 }
 0x18d   : > { %v4901_v57 = vsub.f32 %v4744_v61, %v1072_v20  ;;  %v822_v53 = vpop.f32.mrb[66].mxu0  ;;  %v1700_v61 = vmin.f32 %v1698_v6, %v4898_v41  ;;  %v4914_v20 = vsub.f32 %v1388_v16, %v1108_v23  ;;  %v1113_v6 = vmul.f32 2.0, %v4556_v51  ;;  %v1403_v23 = vpop.permute.xlu1 %1402 }
 0x18e   : > { %7153 = vst [vmem:[#allocation75_spill] sm:$0xff] %v4893_v31  ;;  %v1613_v11 = vmin.f32 %v1611_v5, %v4893_v31  ;;  %v1073_v17 = vmul.f32 2.0, %v822_v53  ;;  %v824_v28 = vpop.f32.mrb[67].mxu0  ;;  %v1114_v5 = vmul.f32 2.0, %v4559_v55  ;;  %v4923_v8 = vsub.f32 %v1388_v16, %v1107_v47 }
 0x18f   : > { %7155 = vst [vmem:[#allocation77_spill] sm:$0xff] %v4901_v57  ;;  %v1682_v27 = vmin.f32 %v1680_v37, %v4901_v57  ;;  %v1074_v24 = vmul.f32 2.0, %v824_v28  ;;  %7158 = vst [vmem:[#allocation80_spill] sm:$0xff] %v4914_v20 }
 0x190   : > { %v4911_v14 = vsub.f32 %v4740_v49, %v1073_v17  ;;  %v1631_v17 = vmin.f32 %v1629_v1, %v4908_v9  ;;  %7160 = vst [vmem:[#allocation82_spill] sm:$0xff] %v4923_v8  ;;  %v7246_v9 = vld [vmem:[#allocation54_spill] sm:$0xff] }
 0x191   : > { %v4918_v37 = vsub.f32 %v4740_v49, %v1074_v24  ;;  %v828_v53 = vpop.f32.mrb[68].mxu0  ;;  %v1702_v49 = vmin.f32 %v1700_v61, %v4914_v20  ;;  %v1112_v24 = vmul.f32 2.0, %v4544_v43  ;;  %v4940_v61 = vsub.f32 %v1403_v23, %v1113_v6  ;;  %v1398_v43 = vpop.permute.xlu0 %1397 }
 0x192   : > { %7157 = vst [vmem:[#allocation79_spill] sm:$0xff] %v4911_v14  ;;  %v1614_v13 = vmin.f32 %v1612_v25, %v4911_v14  ;;  %v1075_v28 = vmul.f32 2.0, %v828_v53  ;;  %v830_v34 = vpop.f32.mrb[69].mxu0  ;;  %v4931_v25 = vsub.f32 %v1403_v23, %v1114_v5  ;;  %v1633_v41 = vmin.f32 %v1631_v17, %v4923_v8  ;;  %v7247_v8 = vld [vmem:[#allocation56_spill] sm:$0xff] }
 0x193   : > { %7159 = vst [vmem:[#allocation81_spill] sm:$0xff] %v4918_v37  ;;  %v1683_v45 = vmin.f32 %v1681_v7, %v4918_v37  ;;  %v1076_v42 = vmul.f32 2.0, %v830_v34  ;;  %7164 = vst [vmem:[#allocation86_spill] sm:$0xff] %v4940_v61  ;;  %v7356_v37 = vld [vmem:[#allocation69_spill] sm:$0xff] }
 0x194   : > { %v4927_v55 = vsub.f32 %v4762_v38, %v1075_v28  ;;  %7162 = vst [vmem:[#allocation84_spill] sm:$0xff] %v4931_v25  ;;  %v1111_v28 = vmul.f32 2.0, %v4540_v39 }
 0x195   : > { %v4934_v53 = vsub.f32 %v4762_v38, %v1076_v42  ;;  %v834_v34 = vpop.f32.mrb[70].mxu0  ;;  %v1704_v38 = vmin.f32 %v1702_v49, %v4931_v25  ;;  %v4946_v42 = vsub.f32 %v1398_v43, %v1112_v24  ;;  %v1117_v49 = vmul.f32 2.0, %v4584_v30  ;;  %v1413_v24 = vpop.permute.xlu1 %1412  ;;  %v7360_v57 = vld [vmem:[#allocation75_spill] sm:$0xff] }
 0x196   : > { %7161 = vst [vmem:[#allocation83_spill] sm:$0xff] %v4927_v55  ;;  %v1615_v7 = vmin.f32 %v1613_v11, %v4927_v55  ;;  %v1077_v47 = vmul.f32 2.0, %v834_v34  ;;  %v836_v1 = vpop.f32.mrb[71].mxu0  ;;  %v1118_v11 = vmul.f32 2.0, %v4587_v40  ;;  %v4955_v20 = vsub.f32 %v1398_v43, %v1111_v28 }
 0x197   : > { %7163 = vst [vmem:[#allocation85_spill] sm:$0xff] %v4934_v53  ;;  %v1684_v51 = vmin.f32 %v1682_v27, %v4934_v53  ;;  %v1078_v16 = vmul.f32 2.0, %v836_v1  ;;  %7166 = vst [vmem:[#allocation88_spill] sm:$0xff] %v4946_v42  ;;  %v7354_v53 = vld [vmem:[#allocation67_spill] sm:$0xff] }
 0x198   : > { %v4943_v5 = vsub.f32 %v4754_v4, %v1077_v47  ;;  %v1635_v47 = vmin.f32 %v1633_v41, %v4940_v61  ;;  %7168 = vst [vmem:[#allocation90_spill] sm:$0xff] %v4955_v20  ;;  %v7244_v61 = vld [vmem:[#allocation50_spill] sm:$0xff] }
 0x199   : > { %v4950_v34 = vsub.f32 %v4754_v4, %v1078_v16  ;;  %v840_v27 = vpop.f32.mrb[72].mxu0  ;;  %v1706_v4 = vmin.f32 %v1704_v38, %v4946_v42  ;;  %v1116_v16 = vmul.f32 2.0, %v4571_v15  ;;  %v4972_v38 = vsub.f32 %v1413_v24, %v1117_v49  ;;  %v1408_v15 = vpop.permute.xlu0 %1407  ;;  %v7362_v46 = vld [vmem:[#allocation79_spill] sm:$0xff] }
 0x19a   : > { %7165 = vst [vmem:[#allocation87_spill] sm:$0xff] %v4943_v5  ;;  %v1616_v39 = vmin.f32 %v1614_v13, %v4943_v5  ;;  %v1079_v1 = vmul.f32 2.0, %v840_v27  ;;  %v842_v17 = vpop.f32.mrb[73].mxu0  ;;  %v4963_v13 = vsub.f32 %v1413_v24, %v1118_v11  ;;  %v1637_v25 = vmin.f32 %v1635_v47, %v4955_v20  ;;  %v7245_v20 = vld [vmem:[#allocation52_spill] sm:$0xff] }
 0x19b   : > { %7167 = vst [vmem:[#allocation89_spill] sm:$0xff] %v4950_v34  ;;  %v1685_v6 = vmin.f32 %v1683_v45, %v4950_v34  ;;  %v1080_v23 = vmul.f32 2.0, %v842_v17  ;;  %7172 = vst [vmem:[#allocation94_spill] sm:$0xff] %v4972_v38 }
 0x19c   : > { %v4959_v40 = vsub.f32 %v4776_v48, %v1079_v1  ;;  %7170 = vst [vmem:[#allocation92_spill] sm:$0xff] %v4963_v13  ;;  %v1115_v1 = vmul.f32 2.0, %v4568_v10 }
 0x19d   : > { %v4966_v27 = vsub.f32 %v4776_v48, %v1080_v23  ;;  %v846_v45 = vpop.f32.mrb[74].mxu0  ;;  %v1708_v48 = vmin.f32 %v1706_v4, %v4963_v13  ;;  %v4978_v23 = vsub.f32 %v1408_v15, %v1116_v16  ;;  %v1121_v4 = vmul.f32 2.0, %v4612_v33  ;;  %v1423_v16 = vpop.permute.xlu1 %1422 }
 0x19e   : > { %7169 = vst [vmem:[#allocation91_spill] sm:$0xff] %v4959_v40  ;;  %v1617_v41 = vmin.f32 %v1615_v7, %v4959_v40  ;;  %v1081_v28 = vmul.f32 2.0, %v846_v45  ;;  %v848_v43 = vpop.f32.mrb[75].mxu0  ;;  %v1122_v7 = vmul.f32 2.0, %v4615_v59  ;;  %v4987_v42 = vsub.f32 %v1408_v15, %v1115_v1 }
 0x19f   : > { %7171 = vst [vmem:[#allocation93_spill] sm:$0xff] %v4966_v27  ;;  %v1686_v30 = vmin.f32 %v1684_v51, %v4966_v27  ;;  %v1082_v17 = vmul.f32 2.0, %v848_v43  ;;  %7174 = vst [vmem:[#allocation96_spill] sm:$0xff] %v4978_v23 }
 0x1a0   : > { %v4975_v11 = vsub.f32 %v4772_v63, %v1081_v28  ;;  %v1639_v28 = vmin.f32 %v1637_v25, %v4972_v38  ;;  %7176 = vst [vmem:[#allocation98_spill] sm:$0xff] %v4987_v42  ;;  %v7242_v38 = vld [vmem:[#allocation46_spill] sm:$0xff] }
 0x1a1   : > { %v4982_v45 = vsub.f32 %v4772_v63, %v1082_v17  ;;  %v852_v51 = vpop.f32.mrb[76].mxu0  ;;  %v1710_v63 = vmin.f32 %v1708_v48, %v4978_v23  ;;  %v1120_v17 = vmul.f32 2.0, %v4599_v2  ;;  %v5004_v48 = vsub.f32 %v1423_v16, %v1121_v4  ;;  %v1418_v2 = vpop.permute.xlu0 %1417 }
 0x1a2   : > { %7173 = vst [vmem:[#allocation95_spill] sm:$0xff] %v4975_v11  ;;  %v1618_v10 = vmin.f32 %v1616_v39, %v4975_v11  ;;  %v1083_v43 = vmul.f32 2.0, %v852_v51  ;;  %v854_v47 = vpop.f32.mrb[77].mxu0  ;;  %v4995_v39 = vsub.f32 %v1423_v16, %v1122_v7  ;;  %v1641_v13 = vmin.f32 %v1639_v28, %v4987_v42  ;;  %v7243_v42 = vld [vmem:[#allocation48_spill] sm:$0xff] }
 0x1a3   : > { %7175 = vst [vmem:[#allocation97_spill] sm:$0xff] %v4982_v45  ;;  %v1687_v49 = vmin.f32 %v1685_v6, %v4982_v45  ;;  %v1084_v24 = vmul.f32 2.0, %v854_v47  ;;  %7180 = vst [vmem:[#allocation102_spill] sm:$0xff] %v5004_v48 }
 0x1a4   : > { %v4991_v59 = vsub.f32 %v4794_v18, %v1083_v43  ;;  %7178 = vst [vmem:[#allocation100_spill] sm:$0xff] %v4995_v39  ;;  %v1119_v43 = vmul.f32 2.0, %v4596_v50 }
 0x1a5   : > { %v4998_v51 = vsub.f32 %v4794_v18, %v1084_v24  ;;  %v858_v6 = vpop.f32.mrb[78].mxu0  ;;  %v1712_v18 = vmin.f32 %v1710_v63, %v4995_v39  ;;  %v5010_v24 = vsub.f32 %v1418_v2, %v1120_v17  ;;  %v1125_v63 = vmul.f32 2.0, %v4640_v58  ;;  %v1433_v17 = vpop.permute.xlu1 %1432 }
 0x1a6   : > { %7177 = vst [vmem:[#allocation99_spill] sm:$0xff] %v4991_v59  ;;  %v1619_v25 = vmin.f32 %v1617_v41, %v4991_v59  ;;  %v1085_v1 = vmul.f32 2.0, %v858_v6  ;;  %v860_v15 = vpop.f32.mrb[79].mxu0  ;;  %v1126_v41 = vmul.f32 2.0, %v4643_v44  ;;  %v5019_v23 = vsub.f32 %v1418_v2, %v1119_v43 }
 0x1a7   : > { %7179 = vst [vmem:[#allocation101_spill] sm:$0xff] %v4998_v51  ;;  %v1688_v33 = vmin.f32 %v1686_v30, %v4998_v51  ;;  %v1086_v47 = vmul.f32 2.0, %v860_v15  ;;  %7182 = vst [vmem:[#allocation104_spill] sm:$0xff] %v5010_v24 }
 0x1a8   : > { %v5007_v7 = vsub.f32 %v4786_v56, %v1085_v1  ;;  %v1643_v1 = vmin.f32 %v1641_v13, %v5004_v48  ;;  %7184 = vst [vmem:[#allocation106_spill] sm:$0xff] %v5019_v23 }
 0x1a9   : > { %v5014_v6 = vsub.f32 %v4786_v56, %v1086_v47  ;;  %v864_v30 = vpop.f32.mrb[80].mxu0  ;;  %v1697_v56 = vmin.f32 %v5010_v24, %v1712_v18  ;;  %v1124_v47 = vmul.f32 2.0, %v4627_v29  ;;  %v5036_v18 = vsub.f32 %v1433_v17, %v1125_v63  ;;  %v1428_v29 = vpop.permute.xlu0 %1427 }
 0x1aa   : > { %7181 = vst [vmem:[#allocation103_spill] sm:$0xff] %v5007_v7  ;;  %v1620_v50 = vmin.f32 %v1618_v10, %v5007_v7  ;;  %v1087_v15 = vmul.f32 2.0, %v864_v30  ;;  %v866_v28 = vpop.f32.mrb[81].mxu0  ;;  %v5027_v10 = vsub.f32 %v1433_v17, %v1126_v41  ;;  %v1630_v39 = vmin.f32 %v5019_v23, %v1643_v1  ;;  %v7241_v23 = vld [vmem:[#allocation44_spill] sm:$0xff] }
 0x1ab   : > { %7183 = vst [vmem:[#allocation105_spill] sm:$0xff] %v5014_v6  ;;  %v1689_v4 = vmin.f32 %v1687_v49, %v5014_v6  ;;  %v1088_v16 = vmul.f32 2.0, %v866_v28  ;;  %7188 = vst [vmem:[#allocation110_spill] sm:$0xff] %v5036_v18 }
 0x1ac   : > { %v5023_v44 = vsub.f32 %v4808_v32, %v1087_v15  ;;  %7186 = vst [vmem:[#allocation108_spill] sm:$0xff] %v5027_v10  ;;  %v1123_v15 = vmul.f32 2.0, %v4624_v12 }
 0x1ad   : > { %v5030_v30 = vsub.f32 %v4808_v32, %v1088_v16  ;;  %v870_v49 = vpop.f32.mrb[82].mxu0  ;;  %v1699_v32 = vmin.f32 %v1697_v56, %v5027_v10  ;;  %v5042_v16 = vsub.f32 %v1428_v29, %v1124_v47  ;;  %v1129_v56 = vmul.f32 2.0, %v4668_v60  ;;  %v1443_v47 = vpop.permute.xlu1 %1442 }
 0x1ae   : > { %7185 = vst [vmem:[#allocation107_spill] sm:$0xff] %v5023_v44  ;;  %v1621_v13 = vmin.f32 %v1619_v25, %v5023_v44  ;;  %v1089_v43 = vmul.f32 2.0, %v870_v49  ;;  %v872_v2 = vpop.f32.mrb[83].mxu0  ;;  %v1130_v25 = vmul.f32 2.0, %v4671_v35  ;;  %v5051_v24 = vsub.f32 %v1428_v29, %v1123_v15 }
 0x1af   : > { %7187 = vst [vmem:[#allocation109_spill] sm:$0xff] %v5030_v30  ;;  %v1690_v58 = vmin.f32 %v1688_v33, %v5030_v30  ;;  %v1090_v28 = vmul.f32 2.0, %v872_v2  ;;  %7190 = vst [vmem:[#allocation112_spill] sm:$0xff] %v5042_v16 }
 0x1b0   : > { %v5039_v41 = vsub.f32 %v4804_v36, %v1089_v43  ;;  %v1632_v43 = vmin.f32 %v1630_v39, %v5036_v18  ;;  %7192 = vst [vmem:[#allocation114_spill] sm:$0xff] %v5051_v24 }
 0x1b1   : > { %v5046_v49 = vsub.f32 %v4804_v36, %v1090_v28  ;;  %v876_v33 = vpop.f32.mrb[84].mxu0  ;;  %v1701_v36 = vmin.f32 %v1699_v32, %v5042_v16  ;;  %v1128_v28 = vmul.f32 2.0, %v4655_v52  ;;  %v5068_v32 = vsub.f32 %v1443_v47, %v1129_v56  ;;  %v1438_v52 = vpop.permute.xlu0 %1437 }
 0x1b2   : > { %7189 = vst [vmem:[#allocation111_spill] sm:$0xff] %v5039_v41  ;;  %v1622_v12 = vmin.f32 %v1620_v50, %v5039_v41  ;;  %v1091_v2 = vmul.f32 2.0, %v876_v33  ;;  %v878_v1 = vpop.f32.mrb[85].mxu0  ;;  %v5059_v50 = vsub.f32 %v1443_v47, %v1130_v25  ;;  %v1634_v10 = vmin.f32 %v1632_v43, %v5051_v24 }
 0x1b3   : > { %7191 = vst [vmem:[#allocation113_spill] sm:$0xff] %v5046_v49  ;;  %v1691_v63 = vmin.f32 %v1689_v4, %v5046_v49  ;;  %v1092_v17 = vmul.f32 2.0, %v878_v1  ;;  %7196 = vst [vmem:[#allocation118_spill] sm:$0xff] %v5068_v32 }
 0x1b4   : > { %v5055_v35 = vsub.f32 %v4826_v26, %v1091_v2  ;;  %7194 = vst [vmem:[#allocation116_spill] sm:$0xff] %v5059_v50  ;;  %v1127_v2 = vmul.f32 2.0, %v4652_v21 }
 0x1b5   : > { %v5062_v33 = vsub.f32 %v4826_v26, %v1092_v17  ;;  %v882_v4 = vpop.f32.mrb[86].mxu0  ;;  %v1703_v26 = vmin.f32 %v1701_v36, %v5059_v50  ;;  %v5074_v17 = vsub.f32 %v1438_v52, %v1128_v28  ;;  %v7202_v36 = vld [vmem:[#allocation34_spill] sm:$0xff]  ;;  %v1453_v50 = vpop.permute.xlu1 %1452 }
 0x1b6   : > { %7193 = vst [vmem:[#allocation115_spill] sm:$0xff] %v5055_v35  ;;  %v1623_v39 = vmin.f32 %v1621_v13, %v5055_v35  ;;  %v1093_v15 = vmul.f32 2.0, %v882_v4  ;;  %v884_v29 = vpop.f32.mrb[87].mxu0  ;;  %v7199_v13 = vld [vmem:[#allocation35_spill] sm:$0xff]  ;;  %v5083_v18 = vsub.f32 %v1438_v52, %v1127_v2  ;;  %v1133_v28 = vmul.f32 2.0, %v7202_v36 }
 0x1b7   : > { %7195 = vst [vmem:[#allocation117_spill] sm:$0xff] %v5062_v33  ;;  %v1692_v60 = vmin.f32 %v1690_v58, %v5062_v33  ;;  %v1094_v1 = vmul.f32 2.0, %v884_v29  ;;  %7198 = vst [vmem:[#allocation120_spill] sm:$0xff] %v5074_v17  ;;  %v1134_v4 = vmul.f32 2.0, %v7199_v13  ;;  %v7206_v2 = vld [vmem:[#allocation31_spill] sm:$0xff] }
 0x1b8   : > { %v5071_v25 = vsub.f32 %v4818_v22, %v1093_v15  ;;  %v1636_v15 = vmin.f32 %v1634_v10, %v5068_v32  ;;  %7201 = vst [vmem:[#allocation121_spill] sm:$0xff] %v5083_v18  ;;  %v1132_v52 = vmul.f32 2.0, %v7206_v2  ;;  %v5099_v24 = vsub.f32 %v1453_v50, %v1133_v28 }
 0x1b9   : > { %v5078_v16 = vsub.f32 %v4818_v22, %v1094_v1  ;;  %v888_v58 = vpop.f32.mrb[88].mxu0  ;;  %v1705_v22 = vmin.f32 %v1703_v26, %v5074_v17  ;;  %v5090_v1 = vsub.f32 %v1453_v50, %v1134_v4  ;;  %v1448_v26 = vpop.permute.xlu0 %1447 }
 0x1ba   : > { %7197 = vst [vmem:[#allocation119_spill] sm:$0xff] %v5071_v25  ;;  %v1624_v21 = vmin.f32 %v1622_v12, %v5071_v25  ;;  %v1095_v29 = vmul.f32 2.0, %v888_v58  ;;  %v890_v43 = vpop.f32.mrb[89].mxu0  ;;  %7207 = vst [vmem:[#allocation31_spill] sm:$0xff] %v5099_v24  ;;  %v5110_v48 = vsub.f32 %v1448_v26, %v1132_v52 }
 0x1bb   : > { %7200 = vst [vmem:[#allocation35_spill] sm:$0xff] %v5078_v16  ;;  %v1693_v56 = vmin.f32 %v1691_v63, %v5078_v16  ;;  %v1096_v47 = vmul.f32 2.0, %v890_v43  ;;  %7204 = vst [vmem:[#allocation122_spill] sm:$0xff] %v5090_v1 }
 0x1bc   : > { %v5087_v13 = vsub.f32 %v4840_v62, %v1095_v29  ;;  %v1638_v29 = vmin.f32 %v1636_v15, %v5083_v18 }
 0x1bd   : > { %v5093_v12 = vsub.f32 %v4840_v62, %v1096_v47  ;;  %v894_v58 = vpop.f32.mrb[90].mxu0  ;;  %v1707_v62 = vmin.f32 %v1705_v22, %v5090_v1 }
 0x1be   : > { %7203 = vst [vmem:[#allocation34_spill] sm:$0xff] %v5087_v13  ;;  %v1625_v63 = vmin.f32 %v1623_v39, %v5087_v13  ;;  %v1097_v43 = vmul.f32 2.0, %v894_v58  ;;  %v896_v10 = vpop.f32.mrb[91].mxu0  ;;  %v7210_v58 = vld [vmem:[#allocation30_spill] sm:$0xff]  ;;  %v1640_v28 = vmin.f32 %v1638_v29, %v5099_v24 }
 0x1bf   : > { %7205 = vst [vmem:[#allocation123_spill] sm:$0xff] %v5093_v12  ;;  %v1694_v36 = vmin.f32 %v1692_v60, %v5093_v12  ;;  %v1098_v32 = vmul.f32 2.0, %v896_v10  ;;  %v1131_v17 = vmul.f32 2.0, %v7210_v58  ;;  %7211 = vst [vmem:[#allocation30_spill] sm:$0xff] %v5110_v48 }
 0x1c0   : > { %v5102_v4 = vsub.f32 %v4836_v19, %v1097_v43 }
 0x1c1   : > { %v5106_v47 = vsub.f32 %v4836_v19, %v1098_v32  ;;  %v900_v39 = vpop.f32.mrb[92].mxu0  ;;  %v1709_v19 = vmin.f32 %v1707_v62, %v5110_v48  ;;  %v5121_v58 = vsub.f32 %v1448_v26, %v1131_v17 }
 0x1c2   : > { %7208 = vst [vmem:[#allocation124_spill] sm:$0xff] %v5102_v4  ;;  %v1626_v2 = vmin.f32 %v1624_v21, %v5102_v4  ;;  %v1099_v60 = vmul.f32 2.0, %v900_v39  ;;  %v902_v10 = vpop.f32.mrb[93].mxu0 }
 0x1c3   : > { %7209 = vst [vmem:[#allocation125_spill] sm:$0xff] %v5106_v47  ;;  %v1695_v50 = vmin.f32 %v1693_v56, %v5106_v47  ;;  %v1100_v15 = vmul.f32 2.0, %v902_v10  ;;  %7214 = vst [vmem:[#allocation128_spill] sm:$0xff] %v5121_v58  ;;  %v1642_v29 = vmin.f32 %v1640_v28, %v5121_v58  ;;  %v6940_v58 = vlaneseq }
 0x1c4   : > { %v5115_v43 = vsub.f32 %v4858_v0, %v1099_v60  ;;  %v7215_v60 = vld [vmem:[#allocation64_spill] sm:$0xff] }
 0x1c5   : > { %v5119_v32 = vsub.f32 %v4858_v0, %v1100_v15  ;;  %v906_v22 = vpop.f32.mrb[94].mxu0  ;;  %v1711_v1 = vmin.f32 %v1709_v19, %v1695_v50 }
 0x1c6   : > { %7212 = vst [vmem:[#allocation126_spill] sm:$0xff] %v5115_v43  ;;  %v1627_v21 = vmin.f32 %v1625_v63, %v5115_v43  ;;  %v1101_v52 = vmul.f32 2.0, %v906_v22  ;;  %v908_v39 = vpop.f32.mrb[95].mxu0 }
 0x1c7   : > { %7213 = vst [vmem:[#allocation127_spill] sm:$0xff] %v5119_v32  ;;  %v1696_v56 = vmin.f32 %v1694_v36, %v5119_v32  ;;  %v1102_v10 = vmul.f32 2.0, %v908_v39 }
 0x1c8   : > { %v5127_v24 = vsub.f32 %v7215_v60, %v1101_v52  ;;  %v1644_v15 = vmin.f32 %v1642_v29, %v1627_v21  ;;  %v5137_v21 = vshrl.u32 %v6940_v58, 7  ;;  %v7236_v58 = vld [vmem:[#allocation32_spill] sm:$0xff] }
 0x1c9   : > { %v1713_v62 = vmin.f32 %v1711_v1, %v1696_v56  ;;  %v5130_v0 = vsub.f32 %v7215_v60, %v1102_v10  ;;  %v7238_v60 = vld [vmem:[#allocation38_spill] sm:$0xff]  ;;  %v7239_v29 = vld [vmem:[#allocation40_spill] sm:$0xff] }
 0x1ca   : > { %7216 = vst [vmem:[#allocation64_spill] sm:$0xff] %v5127_v24  ;;  %v1628_v17 = vmin.f32 %v1626_v2, %v5127_v24  ;;  %v7240_v10 = vld [vmem:[#allocation42_spill] sm:$0xff]  ;;  %v5264_v24 = vadd.s32 56, %v5137_v21  ;;  %v5267_v44 = vadd.s32 64, %v5137_v21  ;;  %v5270_v7 = vadd.s32 72, %v5137_v21 }
 0x1cb   : > { %7217 = vst [vmem:[#allocation129_spill] sm:$0xff] %v5130_v0  ;;  %v1714_v63 = vmin.f32 %v5130_v0, %v1713_v62  ;;  %v7223_v62 = vld [vmem:[#allocation6_spill] sm:$0xff]  ;;  %v5273_v59 = vadd.s32 80, %v5137_v21  ;;  %v5276_v11 = vadd.s32 88, %v5137_v21  ;;  %v5279_v40 = vadd.s32 96, %v5137_v21 }
 0x1cc   : > { %v1645_v26 = vmin.f32 %v1628_v17, %v1644_v15  ;;  %v7224_v15 = vld [vmem:[#allocation3_spill] sm:$0xff]  ;;  %v5282_v5 = vadd.s32 104, %v5137_v21  ;;  %v5285_v55 = vadd.s32 392, %v5137_v21  ;;  %v5288_v14 = vadd.s32 384, %v5137_v21 }
 0x1cd   : > { %v1715_v22 = vrot.slane %v1714_v63, 4  ;;  %v7225_v17 = vld [vmem:[#allocation7_spill] sm:$0xff]  ;;  %v5291_v31 = vadd.s32 112, %v5137_v21  ;;  %v5294_v3 = vadd.s32 408, %v5137_v21  ;;  %v5297_v12 = vadd.s32 400, %v5137_v21 }
 0x1ce   : > { %v1646_v50 = vrot.slane %v1645_v26, 4  ;;  %7254 = vst [vmem:[#allocation6_spill] sm:$0xff] %v5288_v14  ;;  %v5300_v47 = vadd.s32 120, %v5137_v21  ;;  %v5303_v32 = vadd.s32 424, %v5137_v21  ;;  %v5309_v14 = vadd.s32 128, %v5137_v21 }
 0x1cf   : > { %v1716_v19 = vmin.f32 %v1714_v63, %v1715_v22  ;;  %v7226_v63 = vld [vmem:[#allocation10_spill] sm:$0xff]  ;;  %7255 = vst [vmem:[#allocation3_spill] sm:$0xff] %v5294_v3  ;;  %7256 = vst [vmem:[#allocation7_spill] sm:$0xff] %v5297_v12  ;;  %v5312_v0 = vadd.s32 440, %v5137_v21  ;;  %v5315_v3 = vadd.s32 432, %v5137_v21  ;;  %v5318_v12 = vadd.s32 136, %v5137_v21 }
 0x1d0   : > { %v1647_v36 = vmin.f32 %v1645_v26, %v1646_v50  ;;  %v7227_v26 = vld [vmem:[#allocation12_spill] sm:$0xff]  ;;  %v7228_v22 = vld [vmem:[#allocation14_spill] sm:$0xff]  ;;  %7257 = vst [vmem:[#allocation10_spill] sm:$0xff] %v5300_v47  ;;  %v5321_v54 = vadd.s32 456, %v5137_v21  ;;  %v5330_v16 = vadd.s32 472, %v5137_v21  ;;  %v5339_v33 = vadd.s32 488, %v5137_v21 }
 0x1d1   : > { %v1717_v39 = vrot.slane %v1716_v19, 2  ;;  %v7229_v50 = vld [vmem:[#allocation16_spill] sm:$0xff]  ;;  %7258 = vst [vmem:[#allocation12_spill] sm:$0xff] %v5303_v32  ;;  %v5324_v32 = vadd.s32 448, %v5137_v21  ;;  %v5348_v49 = vadd.s32 504, %v5137_v21  ;;  %v5357_v30 = vadd.s32 176, %v5137_v21 }
 0x1d2   : > { %v1648_v48 = vrot.slane %v1647_v36, 2  ;;  %7260 = vst [vmem:[#allocation16_spill] sm:$0xff] %v5309_v14  ;;  %7267 = vst [vmem:[#allocation32_spill] sm:$0xff] %v5330_v16  ;;  %v5351_v16 = vadd.s32 496, %v5137_v21  ;;  %v5366_v6 = vadd.s32 200, %v5137_v21  ;;  %v5375_v51 = vadd.s32 224, %v5137_v21 }
 0x1d3   : > { %v1718_v28 = vmin.f32 %v1716_v19, %v1717_v39  ;;  %v7230_v19 = vld [vmem:[#allocation18_spill] sm:$0xff]  ;;  %7270 = vst [vmem:[#allocation40_spill] sm:$0xff] %v5339_v33  ;;  %7273 = vst [vmem:[#allocation46_spill] sm:$0xff] %v5348_v49  ;;  %v5360_v33 = vadd.s32 184, %v5137_v21  ;;  %v5369_v49 = vadd.s32 208, %v5137_v21  ;;  %v5378_v45 = vadd.s32 232, %v5137_v21 }
 0x1d4   : > { %v1649_v52 = vmin.f32 %v1647_v36, %v1648_v48  ;;  %v7231_v36 = vld [vmem:[#allocation20_spill] sm:$0xff]  ;;  %v7232_v39 = vld [vmem:[#allocation22_spill] sm:$0xff]  ;;  %7261 = vst [vmem:[#allocation18_spill] sm:$0xff] %v5312_v0  ;;  %v5333_v0 = vadd.s32 464, %v5137_v21  ;;  %7274 = vst [vmem:[#allocation48_spill] sm:$0xff] %v5351_v16  ;;  %v5372_v16 = vadd.s32 216, %v5137_v21 }
 0x1d5   : > { %v1719_v18 = vrot.slane %v1718_v28, 1  ;;  %v7237_v48 = vld [vmem:[#allocation36_spill] sm:$0xff]  ;;  %7262 = vst [vmem:[#allocation20_spill] sm:$0xff] %v5315_v3  ;;  %7263 = vst [vmem:[#allocation22_spill] sm:$0xff] %v5318_v12  ;;  %v5336_v3 = vadd.s32 152, %v5137_v21 }
 0x1d6   : > { %v1650_v1 = vrot.slane %v1649_v52, 1  ;;  %7268 = vst [vmem:[#allocation36_spill] sm:$0xff] %v5333_v0  ;;  %v5354_v0 = vadd.s32 168, %v5137_v21  ;;  %7276 = vst [vmem:[#allocation52_spill] sm:$0xff] %v5357_v30 }
 0x1d7   : > { %v5134_v56 = vmin.f32 %v1718_v28, %v1719_v18  ;;  %v7222_v18 = vld [vmem:[#allocation2_spill] sm:$0xff]  ;;  %v7233_v28 = vld [vmem:[#allocation24_spill] sm:$0xff]  ;;  %7269 = vst [vmem:[#allocation38_spill] sm:$0xff] %v5336_v3  ;;  %7277 = vst [vmem:[#allocation54_spill] sm:$0xff] %v5360_v33 }
 0x1d8   : > { %v5139_v2 = vmin.f32 %v1649_v52, %v1650_v1  ;;  %v7234_v52 = vld [vmem:[#allocation26_spill] sm:$0xff]  ;;  %v7235_v1 = vld [vmem:[#allocation28_spill] sm:$0xff]  ;;  %7253 = vst [vmem:[#allocation2_spill] sm:$0xff] %v5285_v55  ;;  %v5306_v55 = vadd.s32 416, %v5137_v21  ;;  %7264 = vst [vmem:[#allocation24_spill] sm:$0xff] %v5321_v54  ;;  %v5342_v54 = vadd.s32 480, %v5137_v21 }
 0x1d9   : > { %7265 = vst [vmem:[#allocation26_spill] sm:$0xff] %v5324_v32  ;;  %v5345_v32 = vadd.s32 160, %v5137_v21  ;;  %7275 = vst [vmem:[#allocation50_spill] sm:$0xff] %v5354_v0 }
 0x1da   : > { %vm1786_vm4 = vcmp.eq.f32.partialorder %v7222_v18, %v5139_v2  ;;  %vm1788_vm5 = vcmp.eq.f32.partialorder %v7223_v62, %v5139_v2  ;;  %vm1790_vm6 = vcmp.eq.f32.partialorder %v7224_v15, %v5139_v2  ;;  %vm1792_vm7 = vcmp.eq.f32.partialorder %v7225_v17, %v5139_v2  ;;  %7259 = vst [vmem:[#allocation14_spill] sm:$0xff] %v5306_v55 }
 0x1db   : > { %vm1794_vm8 = vcmp.eq.f32.partialorder %v7226_v63, %v5139_v2  ;;  %vm1796_vm9 = vcmp.eq.f32.partialorder %v7227_v26, %v5139_v2  ;;  %vm1798_vm10 = vcmp.eq.f32.partialorder %v7228_v22, %v5139_v2  ;;  %vm1800_vm11 = vcmp.eq.f32.partialorder %v7229_v50, %v5139_v2  ;;  %7271 = vst [vmem:[#allocation42_spill] sm:$0xff] %v5342_v54 }
 0x1dc   : > { %vm1802_vm12 = vcmp.eq.f32.partialorder %v7230_v19, %v5139_v2  ;;  %vm1868_vm2 = vcmp.eq.f32.partialorder %v5039_v41, %v5139_v2  ;;  %vm1870_vm1 = vcmp.eq.f32.partialorder %v5055_v35, %v5139_v2  ;;  %vm1872_vm0 = vcmp.eq.f32.partialorder %v5071_v25, %v5139_v2  ;;  %7272 = vst [vmem:[#allocation44_spill] sm:$0xff] %v5345_v32 }
 0x1dd   : > { %vm1874_vm13 = vcmp.eq.f32.partialorder %v5087_v13, %v5139_v2  ;;  %vm1876_vm14 = vcmp.eq.f32.partialorder %v5102_v4, %v5139_v2  ;;  %vm1878_vm15 = vcmp.eq.f32.partialorder %v5115_v43, %v5139_v2  ;;  %v5246_v41 = vadd.s32 8, %v5137_v21  ;;  %7279 = vst [vmem:[#allocation130_spill] sm:$0xff] %v5366_v6  ;;  %7280 = vst [vmem:[#allocation131_spill] sm:$0xff] %v5372_v16 }
 0x1de   : > { %v5249_v35 = vadd.s32 16, %v5137_v21  ;;  %v5252_v25 = vadd.s32 24, %v5137_v21  ;;  %v5255_v13 = vadd.s32 32, %v5137_v21  ;;  %v5258_v4 = vadd.s32 40, %v5137_v21  ;;  %7281 = vst [vmem:[#allocation132_spill] sm:$0xff] %v5378_v45 }
 0x1df   : > { %v5261_v43 = vadd.s32 48, %v5137_v21  ;;  %v5327_v55 = vadd.s32 144, %v5137_v21  ;;  %v5363_v54 = vadd.s32 192, %v5137_v21  ;;  %v1914_v27 = vsel %vm1786_vm4, %v5137_v21, 512 }
 0x1e0   : > { %v1916_v34 = vsel %vm1788_vm5, %v5246_v41, 512  ;;  %v1918_v16 = vsel %vm1790_vm6, %v5249_v35, 512  ;;  %v1920_v45 = vsel %vm1792_vm7, %v5252_v25, 512  ;;  %v1922_v18 = vsel %vm1794_vm8, %v5255_v13, 512 }
 0x1e1   : > { %7266 = vst [vmem:[#allocation28_spill] sm:$0xff] %v5327_v55  ;;  %7278 = vst [vmem:[#allocation56_spill] sm:$0xff] %v5363_v54  ;;  %v1924_v62 = vsel %vm1796_vm9, %v5258_v4, 512  ;;  %v1926_v15 = vsel %vm1798_vm10, %v5261_v43, 512  ;;  %v1928_v17 = vsel %vm1800_vm11, %v5264_v24, 512  ;;  %v1930_v63 = vsel %vm1802_vm12, %v5267_v44, 512 }
 0x1e2   : > { %vm7282_vm4 = vcmp.eq.f32.partialorder %v7231_v36, %v5139_v2  ;;  %vm7283_vm5 = vcmp.eq.f32.partialorder %v7232_v39, %v5139_v2  ;;  %vm7284_vm6 = vcmp.eq.f32.partialorder %v7233_v28, %v5139_v2  ;;  %vm7285_vm7 = vcmp.eq.f32.partialorder %v7234_v52, %v5139_v2 }
 0x1e3   : > { %v1932_v26 = vsel %vm7282_vm4, %v5270_v7, 512  ;;  %v1934_v22 = vsel %vm7283_vm5, %v5273_v59, 512  ;;  %v1936_v50 = vsel %vm7284_vm6, %v5276_v11, 512  ;;  %v1938_v19 = vsel %vm7285_vm7, %v5279_v40, 512 }
 0x1e4   : > { %vm7286_vm8 = vcmp.eq.f32.partialorder %v7235_v1, %v5139_v2  ;;  %vm7287_vm9 = vcmp.eq.f32.partialorder %v7236_v58, %v5139_v2  ;;  %vm7288_vm10 = vcmp.eq.f32.partialorder %v7237_v48, %v5139_v2  ;;  %vm7289_vm11 = vcmp.eq.f32.partialorder %v7238_v60, %v5139_v2 }
 0x1e5   : > { %v1940_v36 = vsel %vm7286_vm8, %v5282_v5, 512  ;;  %v5440_v39 = vsel %vm7287_vm9, %v5291_v31, 512  ;;  %v5446_v28 = vsel %vm7288_vm10, %v5300_v47, 512  ;;  %v5452_v52 = vsel %vm7289_vm11, %v5309_v14, 512  ;;  %v7313_v47 = vld [vmem:[#allocation43_spill] sm:$0xff] }
 0x1e6   : > { %vm7290_vm12 = vcmp.eq.f32.partialorder %v7239_v29, %v5139_v2  ;;  %vm7291_vm4 = vcmp.eq.f32.partialorder %v7240_v10, %v5139_v2  ;;  %vm7292_vm5 = vcmp.eq.f32.partialorder %v7241_v23, %v5139_v2  ;;  %vm7293_vm6 = vcmp.eq.f32.partialorder %v7242_v38, %v5139_v2 }
 0x1e7   : > { %v5458_v1 = vsel %vm7290_vm12, %v5318_v12, 512  ;;  %v5464_v58 = vsel %vm7291_vm4, %v5327_v55, 512  ;;  %v5470_v48 = vsel %vm7292_vm5, %v5336_v3, 512  ;;  %v5476_v60 = vsel %vm7293_vm6, %v5345_v32, 512  ;;  %v7305_v3 = vld [vmem:[#allocation23_spill] sm:$0xff]  ;;  %v7309_v12 = vld [vmem:[#allocation33_spill] sm:$0xff] }
 0x1e8   : > { %vm7294_vm7 = vcmp.eq.f32.partialorder %v7243_v42, %v5139_v2  ;;  %vm7295_vm8 = vcmp.eq.f32.partialorder %v7244_v61, %v5139_v2  ;;  %vm7296_vm9 = vcmp.eq.f32.partialorder %v7245_v20, %v5139_v2  ;;  %vm7297_vm10 = vcmp.eq.f32.partialorder %v7246_v9, %v5139_v2  ;;  %v7299_v61 = vld [vmem:[#allocation11_spill] sm:$0xff]  ;;  %v7300_v20 = vld [vmem:[#allocation13_spill] sm:$0xff] }
 0x1e9   : > { %v5482_v29 = vsel %vm7294_vm7, %v5354_v0, 512  ;;  %v5488_v10 = vsel %vm7295_vm8, %v5357_v30, 512  ;;  %v5494_v23 = vsel %vm7296_vm9, %v5360_v33, 512  ;;  %v5500_v38 = vsel %vm7297_vm10, %v5363_v54, 512  ;;  %v7301_v9 = vld [vmem:[#allocation15_spill] sm:$0xff]  ;;  %v7302_v54 = vld [vmem:[#allocation17_spill] sm:$0xff] }
 0x1ea   : > { %vm7298_vm11 = vcmp.eq.f32.partialorder %v7247_v8, %v5139_v2  ;;  %vm2042_vm12 = vcmp.lt.s32.totalorder %v1914_v27, %v1918_v16  ;;  %vm2044_vm4 = vcmp.lt.s32.totalorder %v1916_v34, %v1920_v45  ;;  %v7303_v8 = vld [vmem:[#allocation19_spill] sm:$0xff] }
 0x1eb   : > { %v5506_v42 = vsel %vm7298_vm11, %v5366_v6, 512  ;;  %v2043_v33 = vsel %vm2042_vm12, %v1914_v27, %v1918_v16  ;;  %v2045_v30 = vsel %vm2044_vm4, %v1916_v34, %v1920_v45  ;;  %v7304_v6 = vld [vmem:[#allocation21_spill] sm:$0xff]  ;;  %v7307_v27 = vld [vmem:[#allocation27_spill] sm:$0xff] }
 0x1ec   : > { %vm2046_vm9 = vcmp.lt.s32.totalorder %v2043_v33, %v1922_v18  ;;  %vm2048_vm10 = vcmp.lt.s32.totalorder %v2045_v30, %v1924_v62  ;;  %v7306_v34 = vld [vmem:[#allocation25_spill] sm:$0xff] }
 0x1ed   : > { %v2047_v0 = vsel %vm2046_vm9, %v2043_v33, %v1922_v18  ;;  %v2049_v32 = vsel %vm2048_vm10, %v2045_v30, %v1924_v62  ;;  %v7308_v45 = vld [vmem:[#allocation29_spill] sm:$0xff]  ;;  %v7317_v18 = vld [vmem:[#allocation51_spill] sm:$0xff] }
 0x1ee   : > { %vm2050_vm7 = vcmp.lt.s32.totalorder %v2047_v0, %v1926_v15  ;;  %vm2052_vm6 = vcmp.lt.s32.totalorder %v2049_v32, %v1928_v17  ;;  %v7310_v30 = vld [vmem:[#allocation37_spill] sm:$0xff] }
 0x1ef   : > { %v2051_v16 = vsel %vm2050_vm7, %v2047_v0, %v1926_v15  ;;  %v2053_v55 = vsel %vm2052_vm6, %v2049_v32, %v1928_v17  ;;  %v7314_v32 = vld [vmem:[#allocation45_spill] sm:$0xff]  ;;  %v7315_v0 = vld [vmem:[#allocation47_spill] sm:$0xff] }
 0x1f0   : > { %vm2054_vm12 = vcmp.lt.s32.totalorder %v2051_v16, %v1930_v63  ;;  %vm2056_vm3 = vcmp.lt.s32.totalorder %v2053_v55, %v1932_v26  ;;  %vm1827_vm10 = vcmp.eq.f32.partialorder %v7315_v0, %v5134_v56  ;;  %v7321_v15 = vld [vmem:[#allocation59_spill] sm:$0xff] }
 0x1f1   : > { %v2055_v62 = vsel %vm2054_vm12, %v2051_v16, %v1930_v63  ;;  %v2057_v14 = vsel %vm2056_vm3, %v2053_v55, %v1932_v26  ;;  %v7318_v55 = vld [vmem:[#allocation53_spill] sm:$0xff]  ;;  %v7319_v63 = vld [vmem:[#allocation55_spill] sm:$0xff] }
 0x1f2   : > { %vm2058_vm9 = vcmp.lt.s32.totalorder %v2055_v62, %v1934_v22  ;;  %vm2060_vm5 = vcmp.lt.s32.totalorder %v2057_v14, %v1936_v50  ;;  %v7320_v26 = vld [vmem:[#allocation57_spill] sm:$0xff] }
 0x1f3   : > { %v2059_v17 = vsel %vm2058_vm9, %v2055_v62, %v1934_v22  ;;  %v2061_v33 = vsel %vm2060_vm5, %v2057_v14, %v1936_v50  ;;  %vm1837_vm4 = vcmp.eq.f32.partialorder %v7320_v26, %v5134_v56  ;;  %v7322_v14 = vld [vmem:[#allocation61_spill] sm:$0xff]  ;;  %v7323_v22 = vld [vmem:[#allocation63_spill] sm:$0xff]  ;;  %v7324_v50 = vld [vmem:[#allocation66_spill] sm:$0xff] }
 0x1f4   : > { %vm2062_vm7 = vcmp.lt.s32.totalorder %v2059_v17, %v1938_v19  ;;  %vm2064_vm11 = vcmp.lt.s32.totalorder %v2061_v33, %v1940_v36 }
 0x1f5   : > { %v2063_v16 = vsel %vm2062_vm7, %v2059_v17, %v1938_v19  ;;  %v2065_v0 = vsel %vm2064_vm11, %v2061_v33, %v1940_v36  ;;  %v7349_v17 = vld [vmem:[#allocation132_spill] sm:$0xff]  ;;  %v5652_v33 = vadd.s32 280, %v5137_v21 }
 0x1f6   : > { %vm2066_vm12 = vcmp.lt.s32.totalorder %v2063_v16, %v5440_v39  ;;  %vm2068_vm3 = vcmp.lt.s32.totalorder %v2065_v0, %v5446_v28 }
 0x1f7   : > { %v2067_v62 = vsel %vm2066_vm12, %v2063_v16, %v5440_v39  ;;  %v2069_v19 = vsel %vm2068_vm3, %v2065_v0, %v5446_v28  ;;  %v5638_v0 = vadd.s32 264, %v5137_v21  ;;  %7353 = vst [vmem:[#allocation19_spill] sm:$0xff] %v5652_v33 }
 0x1f8   : > { %vm2070_vm5 = vcmp.lt.s32.totalorder %v2067_v62, %v5452_v52  ;;  %vm2072_vm9 = vcmp.lt.s32.totalorder %v2069_v19, %v5458_v1 }
 0x1f9   : > { %v2071_v39 = vsel %vm2070_vm5, %v2067_v62, %v5452_v52  ;;  %v2073_v28 = vsel %vm2072_vm9, %v2069_v19, %v5458_v1  ;;  %v5635_v62 = vadd.s32 256, %v5137_v21  ;;  %7346 = vst [vmem:[#allocation15_spill] sm:$0xff] %v5638_v0 }
 0x1fa   : > { %vm2074_vm7 = vcmp.lt.s32.totalorder %v2071_v39, %v5464_v58  ;;  %vm2076_vm11 = vcmp.lt.s32.totalorder %v2073_v28, %v5470_v48 }
 0x1fb   : > { %v2075_v52 = vsel %vm2074_vm7, %v2071_v39, %v5464_v58  ;;  %v2077_v1 = vsel %vm2076_vm11, %v2073_v28, %v5470_v48  ;;  %v7333_v39 = vld [vmem:[#allocation117_spill] sm:$0xff]  ;;  %v5617_v28 = vadd.s32 240, %v5137_v21  ;;  %7345 = vst [vmem:[#allocation13_spill] sm:$0xff] %v5635_v62  ;;  %vm7355_vm7 = vcmp.eq.f32.partialorder %v7354_v53, %v5139_v2 }
 0x1fc   : > { %vm2078_vm3 = vcmp.lt.s32.totalorder %v2075_v52, %v5476_v60  ;;  %vm2080_vm12 = vcmp.lt.s32.totalorder %v2077_v1, %v5482_v29  ;;  %vm1871_vm11 = vcmp.eq.f32.partialorder %v7333_v39, %v5134_v56  ;;  %v5620_v39 = vadd.s32 248, %v5137_v21 }
 0x1fd   : > { %v2079_v58 = vsel %vm2078_vm3, %v2075_v52, %v5476_v60  ;;  %v2081_v48 = vsel %vm2080_vm12, %v2077_v1, %v5482_v29 }
 0x1fe   : > { %vm2082_vm5 = vcmp.lt.s32.totalorder %v2079_v58, %v5488_v10  ;;  %vm2084_vm9 = vcmp.lt.s32.totalorder %v2081_v48, %v5494_v23  ;;  %7339 = vst [vmem:[#allocation11_spill] sm:$0xff] %v5620_v39 }
 0x1ff   : > { %v2083_v60 = vsel %vm2082_vm5, %v2079_v58, %v5488_v10  ;;  %v2085_v29 = vsel %vm2084_vm9, %v2081_v48, %v5494_v23  ;;  %v7340_v10 = vld [vmem:[#allocation58_spill] sm:$0xff]  ;;  %v7342_v58 = vld [vmem:[#allocation131_spill] sm:$0xff]  ;;  %v7343_v48 = vld [vmem:[#allocation60_spill] sm:$0xff] }
 0x200   : > { %vm2086_vm8 = vcmp.lt.s32.totalorder %v2083_v60, %v5500_v38  ;;  %vm2088_vm6 = vcmp.lt.s32.totalorder %v2085_v29, %v5506_v42  ;;  %vm7341_vm9 = vcmp.eq.f32.partialorder %v7340_v10, %v5139_v2  ;;  %vm7344_vm5 = vcmp.eq.f32.partialorder %v7343_v48, %v5139_v2  ;;  %v7347_v10 = vld [vmem:[#allocation62_spill] sm:$0xff]  ;;  %v7350_v48 = vld [vmem:[#allocation65_spill] sm:$0xff] }
 0x201   : > { %v1966_v23 = vsel %vm7341_vm9, %v5369_v49, 512  ;;  %v1968_v1 = vsel %vm7344_vm5, %v7342_v58, 512  ;;  %v2087_v52 = vsel %vm2086_vm8, %v2083_v60, %v5500_v38  ;;  %v2089_v19 = vsel %vm2088_vm6, %v2085_v29, %v5506_v42 }
 0x202   : > { %vm2090_vm3 = vcmp.lt.s32.totalorder %v2087_v52, %v1966_v23  ;;  %vm2092_vm12 = vcmp.lt.s32.totalorder %v2089_v19, %v1968_v1  ;;  %vm7348_vm9 = vcmp.eq.f32.partialorder %v7347_v10, %v5139_v2  ;;  %vm7351_vm5 = vcmp.eq.f32.partialorder %v7350_v48, %v5139_v2 }
 0x203   : > { %v1970_v16 = vsel %vm7348_vm9, %v5375_v51, 512  ;;  %v1972_v38 = vsel %vm7351_vm5, %v7349_v17, 512  ;;  %v2091_v60 = vsel %vm2090_vm3, %v2087_v52, %v1966_v23  ;;  %v2093_v42 = vsel %vm2092_vm12, %v2089_v19, %v1968_v1 }
 0x204   : > { %v5649_v29 = vadd.s32 272, %v5137_v21  ;;  %vm2094_vm8 = vcmp.lt.s32.totalorder %v2091_v60, %v1970_v16  ;;  %vm2096_vm6 = vcmp.lt.s32.totalorder %v2093_v42, %v1972_v38  ;;  %v1974_v10 = vsel %vm7355_vm7, %v5617_v28, 512 }
 0x205   : > { %vm7357_vm9 = vcmp.eq.f32.partialorder %v7356_v37, %v5139_v2  ;;  %v2095_v52 = vsel %vm2094_vm8, %v2091_v60, %v1970_v16  ;;  %v2097_v19 = vsel %vm2096_vm6, %v2093_v42, %v1972_v38  ;;  %v5663_v1 = vadd.s32 288, %v5137_v21 }
 0x206   : > { %7352 = vst [vmem:[#allocation17_spill] sm:$0xff] %v5649_v29  ;;  %v1976_v48 = vsel %vm7357_vm9, %v5620_v39, 512  ;;  %v5666_v23 = vadd.s32 296, %v5137_v21  ;;  %vm2098_vm12 = vcmp.lt.s32.totalorder %v2095_v52, %v1974_v10  ;;  %vm7361_vm5 = vcmp.eq.f32.partialorder %v7360_v57, %v5139_v2  ;;  %v7366_v39 = vld [vmem:[#allocation83_spill] sm:$0xff] }
 0x207   : > { %7358 = vst [vmem:[#allocation21_spill] sm:$0xff] %v5663_v1  ;;  %vm2100_vm3 = vcmp.lt.s32.totalorder %v2097_v19, %v1976_v48  ;;  %v1978_v53 = vsel %vm7361_vm5, %v5635_v62, 512  ;;  %vm7363_vm7 = vcmp.eq.f32.partialorder %v7362_v46, %v5139_v2  ;;  %v2099_v16 = vsel %vm2098_vm12, %v2095_v52, %v1974_v10  ;;  %v7368_v62 = vld [vmem:[#allocation87_spill] sm:$0xff] }
 0x208   : > { %7359 = vst [vmem:[#allocation23_spill] sm:$0xff] %v5666_v23  ;;  %v1980_v37 = vsel %vm7363_vm7, %v5638_v0, 512  ;;  %v2101_v38 = vsel %vm2100_vm3, %v2097_v19, %v1976_v48  ;;  %v5677_v60 = vadd.s32 304, %v5137_v21  ;;  %v5680_v42 = vadd.s32 312, %v5137_v21  ;;  %v7372_v0 = vld [vmem:[#allocation91_spill] sm:$0xff] }
 0x209   : > { %vm2102_vm8 = vcmp.lt.s32.totalorder %v2099_v16, %v1978_v53  ;;  %vm2104_vm6 = vcmp.lt.s32.totalorder %v2101_v38, %v1980_v37  ;;  %vm7367_vm9 = vcmp.eq.f32.partialorder %v7366_v39, %v5139_v2  ;;  %vm7369_vm5 = vcmp.eq.f32.partialorder %v7368_v62, %v5139_v2 }
 0x20a   : > { %7364 = vst [vmem:[#allocation25_spill] sm:$0xff] %v5677_v60  ;;  %7365 = vst [vmem:[#allocation27_spill] sm:$0xff] %v5680_v42  ;;  %v1982_v57 = vsel %vm7367_vm9, %v5649_v29, 512  ;;  %v1984_v46 = vsel %vm7369_vm5, %v5652_v33, 512  ;;  %v2103_v10 = vsel %vm2102_vm8, %v2099_v16, %v1978_v53  ;;  %v2105_v48 = vsel %vm2104_vm6, %v2101_v38, %v1980_v37  ;;  %v7374_v29 = vld [vmem:[#allocation95_spill] sm:$0xff] }
 0x20b   : > { %v5691_v52 = vadd.s32 320, %v5137_v21  ;;  %v5694_v19 = vadd.s32 328, %v5137_v21  ;;  %vm2106_vm12 = vcmp.lt.s32.totalorder %v2103_v10, %v1982_v57  ;;  %vm2108_vm3 = vcmp.lt.s32.totalorder %v2105_v48, %v1984_v46  ;;  %v7378_v33 = vld [vmem:[#allocation99_spill] sm:$0xff] }
 0x20c   : > { %vm7373_vm7 = vcmp.eq.f32.partialorder %v7372_v0, %v5139_v2  ;;  %vm7375_vm9 = vcmp.eq.f32.partialorder %v7374_v29, %v5139_v2  ;;  %v2107_v53 = vsel %vm2106_vm12, %v2103_v10, %v1982_v57  ;;  %v2109_v37 = vsel %vm2108_vm3, %v2105_v48, %v1984_v46 }
 0x20d   : > { %7370 = vst [vmem:[#allocation29_spill] sm:$0xff] %v5691_v52  ;;  %7371 = vst [vmem:[#allocation33_spill] sm:$0xff] %v5694_v19  ;;  %v1986_v39 = vsel %vm7373_vm7, %v5663_v1, 512  ;;  %v1988_v62 = vsel %vm7375_vm9, %v5666_v23, 512  ;;  %v5705_v16 = vadd.s32 336, %v5137_v21  ;;  %v5708_v38 = vadd.s32 344, %v5137_v21 }
 0x20e   : > { %vm2110_vm8 = vcmp.lt.s32.totalorder %v2107_v53, %v1986_v39  ;;  %vm2112_vm6 = vcmp.lt.s32.totalorder %v2109_v37, %v1988_v62  ;;  %vm7379_vm5 = vcmp.eq.f32.partialorder %v7378_v33, %v5139_v2  ;;  %v7380_v1 = vld [vmem:[#allocation103_spill] sm:$0xff]  ;;  %v5719_v10 = vadd.s32 352, %v5137_v21 }
 0x20f   : > { %7376 = vst [vmem:[#allocation37_spill] sm:$0xff] %v5705_v16  ;;  %7377 = vst [vmem:[#allocation43_spill] sm:$0xff] %v5708_v38  ;;  %v1990_v0 = vsel %vm7379_vm5, %v5677_v60, 512  ;;  %vm7381_vm7 = vcmp.eq.f32.partialorder %v7380_v1, %v5139_v2  ;;  %v2111_v57 = vsel %vm2110_vm8, %v2107_v53, %v1986_v39  ;;  %v2113_v46 = vsel %vm2112_vm6, %v2109_v37, %v1988_v62  ;;  %v7384_v23 = vld [vmem:[#allocation107_spill] sm:$0xff] }
 0x210   : > { %v1992_v29 = vsel %vm7381_vm7, %v5680_v42, 512  ;;  %7382 = vst [vmem:[#allocation45_spill] sm:$0xff] %v5719_v10  ;;  %v5722_v48 = vadd.s32 360, %v5137_v21  ;;  %vm2114_vm12 = vcmp.lt.s32.totalorder %v2111_v57, %v1990_v0  ;;  %vm7385_vm9 = vcmp.eq.f32.partialorder %v7384_v23, %v5139_v2 }
 0x211   : > { %vm2116_vm3 = vcmp.lt.s32.totalorder %v2113_v46, %v1992_v29  ;;  %v1994_v33 = vsel %vm7385_vm9, %v5691_v52, 512  ;;  %v1996_v1 = vsel %vm1868_vm2, %v5694_v19, 512  ;;  %v2115_v39 = vsel %vm2114_vm12, %v2111_v57, %v1990_v0  ;;  %v7391_v57 = vld [vmem:[#allocation74_spill] sm:$0xff] }
 0x212   : > { %7383 = vst [vmem:[#allocation51_spill] sm:$0xff] %v5722_v48  ;;  %v2117_v62 = vsel %vm2116_vm3, %v2113_v46, %v1992_v29  ;;  %v5733_v53 = vadd.s32 368, %v5137_v21  ;;  %v5736_v37 = vadd.s32 376, %v5137_v21  ;;  %vm2118_vm8 = vcmp.lt.s32.totalorder %v2115_v39, %v1994_v33  ;;  %v7392_v46 = vld [vmem:[#allocation73_spill] sm:$0xff] }
 0x213   : > { %vm2120_vm6 = vcmp.lt.s32.totalorder %v2117_v62, %v1996_v1  ;;  %v1998_v23 = vsel %vm1870_vm1, %v5705_v16, 512  ;;  %v2000_v60 = vsel %vm1872_vm0, %v5708_v38, 512  ;;  %v2119_v0 = vsel %vm2118_vm8, %v2115_v39, %v1994_v33  ;;  %v7395_v39 = vld [vmem:[#allocation82_spill] sm:$0xff] }
 0x214   : > { %7387 = vst [vmem:[#allocation53_spill] sm:$0xff] %v5733_v53  ;;  %7388 = vst [vmem:[#allocation55_spill] sm:$0xff] %v5736_v37  ;;  %v2121_v29 = vsel %vm2120_vm6, %v2117_v62, %v1996_v1  ;;  %vm1882_vm2 = vcmp.eq.f32.partialorder %v7391_v57, %v5139_v2  ;;  %vm1884_vm5 = vcmp.eq.f32.partialorder %v7392_v46, %v5139_v2  ;;  %v2002_v42 = vsel %vm1874_vm13, %v5719_v10, 512  ;;  %v7396_v62 = vld [vmem:[#allocation78_spill] sm:$0xff]  ;;  %v7398_v10 = vld [vmem:[#allocation64_spill] sm:$0xff] }
 0x215   : > { %vm2122_vm7 = vcmp.lt.s32.totalorder %v2119_v0, %v1998_v23  ;;  %vm2124_vm12 = vcmp.lt.s32.totalorder %v2121_v29, %v2000_v60  ;;  %v2004_v52 = vsel %vm1876_vm14, %v5722_v48, 512  ;;  %vm1886_vm0 = vcmp.eq.f32.partialorder %v7395_v39, %v5139_v2  ;;  %v7402_v48 = vld [vmem:[#allocation6_spill] sm:$0xff] }
 0x216   : > { %v2123_v33 = vsel %vm2122_vm7, %v2119_v0, %v1998_v23  ;;  %v2125_v1 = vsel %vm2124_vm12, %v2121_v29, %v2000_v60  ;;  %vm1888_vm1 = vcmp.eq.f32.partialorder %v7396_v62, %v5139_v2  ;;  %v2006_v19 = vsel %vm1878_vm15, %v5733_v53, 512  ;;  %v7400_v0 = vld [vmem:[#allocation90_spill] sm:$0xff] }
 0x217   : > { %vm2126_vm3 = vcmp.lt.s32.totalorder %v2123_v33, %v2002_v42  ;;  %vm2128_vm9 = vcmp.lt.s32.totalorder %v2125_v1, %v2004_v52  ;;  %vm7399_vm13 = vcmp.eq.f32.partialorder %v7398_v10, %v5139_v2  ;;  %vm1890_vm14 = vcmp.eq.f32.partialorder %v7400_v0, %v5139_v2  ;;  %v7401_v29 = vld [vmem:[#allocation86_spill] sm:$0xff] }
 0x218   : > { %v2008_v16 = vsel %vm7399_vm13, %v5736_v37, 512  ;;  %v2127_v23 = vsel %vm2126_vm3, %v2123_v33, %v2002_v42  ;;  %v2129_v60 = vsel %vm2128_vm9, %v2125_v1, %v2004_v52  ;;  %vm1892_vm8 = vcmp.eq.f32.partialorder %v7401_v29, %v5139_v2  ;;  %v7403_v53 = vld [vmem:[#allocation2_spill] sm:$0xff]  ;;  %v7406_v37 = vld [vmem:[#allocation7_spill] sm:$0xff] }
 0x219   : > { %vm2130_vm6 = vcmp.lt.s32.totalorder %v2127_v23, %v2006_v19  ;;  %vm2132_vm7 = vcmp.lt.s32.totalorder %v2129_v60, %v2008_v16  ;;  %v2010_v38 = vsel %vm1882_vm2, %v7402_v48, 512  ;;  %v2012_v10 = vsel %vm1884_vm5, %v7403_v53, 512  ;;  %v7404_v33 = vld [vmem:[#allocation98_spill] sm:$0xff]  ;;  %v7407_v48 = vld [vmem:[#allocation3_spill] sm:$0xff] }
 0x21a   : > { %v2131_v42 = vsel %vm2130_vm6, %v2127_v23, %v2006_v19  ;;  %v2133_v52 = vsel %vm2132_vm7, %v2129_v60, %v2008_v16  ;;  %vm1894_vm15 = vcmp.eq.f32.partialorder %v7404_v33, %v5139_v2  ;;  %v7405_v1 = vld [vmem:[#allocation94_spill] sm:$0xff]  ;;  %v2014_v57 = vsel %vm1886_vm0, %v7406_v37, 512  ;;  %v7411_v37 = vld [vmem:[#allocation12_spill] sm:$0xff] }
 0x21b   : > { %vm1896_vm12 = vcmp.eq.f32.partialorder %v7405_v1, %v5139_v2  ;;  %vm2134_vm3 = vcmp.lt.s32.totalorder %v2131_v42, %v2010_v38  ;;  %vm2136_vm9 = vcmp.lt.s32.totalorder %v2133_v52, %v2012_v10  ;;  %v2016_v46 = vsel %vm1888_vm1, %v7407_v48, 512  ;;  %v7408_v23 = vld [vmem:[#allocation106_spill] sm:$0xff]  ;;  %v7414_v48 = vld [vmem:[#allocation20_spill] sm:$0xff] }
 0x21c   : > { %v2135_v19 = vsel %vm2134_vm3, %v2131_v42, %v2010_v38  ;;  %v2137_v16 = vsel %vm2136_vm9, %v2133_v52, %v2012_v10  ;;  %vm1898_vm2 = vcmp.eq.f32.partialorder %v7408_v23, %v5139_v2  ;;  %v7409_v60 = vld [vmem:[#allocation102_spill] sm:$0xff]  ;;  %v2020_v62 = vsel %vm1892_vm8, %v7411_v37, 512 }
 0x21d   : > { %vm1900_vm5 = vcmp.eq.f32.partialorder %v7409_v60, %v5139_v2  ;;  %vm2138_vm13 = vcmp.lt.s32.totalorder %v2135_v19, %v2014_v57  ;;  %vm2140_vm6 = vcmp.lt.s32.totalorder %v2137_v16, %v2016_v46  ;;  %v7410_v53 = vld [vmem:[#allocation14_spill] sm:$0xff]  ;;  %v2022_v0 = vsel %vm1894_vm15, %v7414_v48, 512  ;;  %v7419_v48 = vld [vmem:[#allocation24_spill] sm:$0xff] }
 0x21e   : > { %v2018_v39 = vsel %vm1890_vm14, %v7410_v53, 512  ;;  %v2139_v38 = vsel %vm2138_vm13, %v2135_v19, %v2014_v57  ;;  %v2141_v10 = vsel %vm2140_vm6, %v2137_v16, %v2016_v46  ;;  %v7412_v42 = vld [vmem:[#allocation114_spill] sm:$0xff]  ;;  %v7416_v19 = vld [vmem:[#allocation121_spill] sm:$0xff]  ;;  %v2028_v1 = vsel %vm1900_vm5, %v7419_v48, 512 }
 0x21f   : > { %vm1902_vm0 = vcmp.eq.f32.partialorder %v7412_v42, %v5139_v2  ;;  %v7413_v52 = vld [vmem:[#allocation110_spill] sm:$0xff]  ;;  %vm2142_vm7 = vcmp.lt.s32.totalorder %v2139_v38, %v2018_v39  ;;  %vm2144_vm3 = vcmp.lt.s32.totalorder %v2141_v10, %v2020_v62  ;;  %vm1906_vm14 = vcmp.eq.f32.partialorder %v7416_v19, %v5139_v2  ;;  %v7426_v42 = vld [vmem:[#allocation48_spill] sm:$0xff] }
 0x220   : > { %vm1904_vm1 = vcmp.eq.f32.partialorder %v7413_v52, %v5139_v2  ;;  %v7415_v53 = vld [vmem:[#allocation18_spill] sm:$0xff]  ;;  %v2143_v57 = vsel %vm2142_vm7, %v2139_v38, %v2018_v39  ;;  %v2145_v46 = vsel %vm2144_vm3, %v2141_v10, %v2020_v62  ;;  %v7420_v38 = vld [vmem:[#allocation128_spill] sm:$0xff]  ;;  %v7421_v10 = vld [vmem:[#allocation31_spill] sm:$0xff] }
 0x221   : > { %v2024_v29 = vsel %vm1896_vm12, %v7415_v53, 512  ;;  %v7417_v16 = vld [vmem:[#allocation118_spill] sm:$0xff]  ;;  %vm2146_vm9 = vcmp.lt.s32.totalorder %v2143_v57, %v2022_v0  ;;  %vm1910_vm15 = vcmp.eq.f32.partialorder %v7420_v38, %v5139_v2  ;;  %vm1912_vm12 = vcmp.eq.f32.partialorder %v7421_v10, %v5139_v2  ;;  %v7422_v53 = vld [vmem:[#allocation36_spill] sm:$0xff] }
 0x222   : > { %vm1908_vm8 = vcmp.eq.f32.partialorder %v7417_v16, %v5139_v2  ;;  %vm2148_vm13 = vcmp.lt.s32.totalorder %v2145_v46, %v2024_v29  ;;  %v7418_v37 = vld [vmem:[#allocation26_spill] sm:$0xff]  ;;  %v2147_v39 = vsel %vm2146_vm9, %v2143_v57, %v2022_v0  ;;  %v2030_v23 = vsel %vm1902_vm0, %v7422_v53, 512  ;;  %v7425_v38 = vld [vmem:[#allocation40_spill] sm:$0xff] }
 0x223   : > { %v2026_v33 = vsel %vm1898_vm2, %v7418_v37, 512  ;;  %v2149_v62 = vsel %vm2148_vm13, %v2145_v46, %v2024_v29  ;;  %v7423_v37 = vld [vmem:[#allocation32_spill] sm:$0xff]  ;;  %v7424_v57 = vld [vmem:[#allocation42_spill] sm:$0xff]  ;;  %v2036_v10 = vsel %vm1908_vm8, %v7425_v38, 512  ;;  %v2038_v53 = vsel %vm1910_vm15, %v7426_v42, 512 }
 0x224   : > { %vm2150_vm6 = vcmp.lt.s32.totalorder %v2147_v39, %v2026_v33  ;;  %vm2152_vm7 = vcmp.lt.s32.totalorder %v2149_v62, %v2028_v1  ;;  %v2032_v60 = vsel %vm1904_vm1, %v7423_v37, 512  ;;  %v2034_v46 = vsel %vm1906_vm14, %v7424_v57, 512  ;;  %v7427_v48 = vld [vmem:[#allocation46_spill] sm:$0xff] }
 0x225   : > { %v2151_v0 = vsel %vm2150_vm6, %v2147_v39, %v2026_v33  ;;  %v2153_v29 = vsel %vm2152_vm7, %v2149_v62, %v2028_v1  ;;  %v2040_v36 = vsel %vm1912_vm12, %v7427_v48, 512  ;;  %v7428_v33 = vld [vmem:[#allocation4_spill] sm:$0xff]  ;;  %v7432_v62 = vld [vmem:[#allocation5_spill] sm:$0xff]  ;;  %vm7436_vm6 = vcmp.eq.f32.partialorder %v7299_v61, %v5134_v56 }
 0x226   : > { %vm2154_vm2 = vcmp.lt.s32.totalorder %v2151_v0, %v2030_v23  ;;  %vm2156_vm5 = vcmp.lt.s32.totalorder %v2153_v29, %v2032_v60  ;;  %vm7429_vm3 = vcmp.eq.f32.partialorder %v7428_v33, %v5134_v56  ;;  %v7430_v1 = vld [vmem:[#allocation8_spill] sm:$0xff]  ;;  %vm7433_vm8 = vcmp.eq.f32.partialorder %v7432_v62, %v5134_v56 }
 0x227   : > { %v2155_v52 = vsel %vm2154_vm2, %v2151_v0, %v2030_v23  ;;  %v2157_v37 = vsel %vm2156_vm5, %v2153_v29, %v2032_v60  ;;  %v1915_v19 = vsel %vm7429_vm3, %v5137_v21, 512  ;;  %vm7431_vm14 = vcmp.eq.f32.partialorder %v7430_v1, %v5134_v56  ;;  %v7434_v60 = vld [vmem:[#allocation9_spill] sm:$0xff] }
 0x228   : > { %vm2158_vm0 = vcmp.lt.s32.totalorder %v2155_v52, %v2034_v46  ;;  %vm2160_vm1 = vcmp.lt.s32.totalorder %v2157_v37, %v2036_v10  ;;  %v1917_v2 = vsel %vm7431_vm14, %v5246_v41, 512  ;;  %v1919_v23 = vsel %vm7433_vm8, %v5249_v35, 512 }
 0x229   : > { %v2159_v16 = vsel %vm2158_vm0, %v2155_v52, %v2034_v46  ;;  %v2161_v39 = vsel %vm2160_vm1, %v2157_v37, %v2036_v10  ;;  %vm7435_vm9 = vcmp.eq.f32.partialorder %v7434_v60, %v5134_v56  ;;  %v1923_v37 = vsel %vm7436_vm6, %v5255_v13, 512 }
 0x22a   : > { %v1921_v0 = vsel %vm7435_vm9, %v5252_v25, 512  ;;  %vm2162_vm13 = vcmp.lt.s32.totalorder %v2159_v16, %v2038_v53  ;;  %vm2164_vm15 = vcmp.lt.s32.totalorder %v2161_v39, %v2040_v36  ;;  %vm2177_vm7 = vcmp.lt.s32.totalorder %v1915_v19, %v1919_v23 }
 0x22b   : > { %v2163_v29 = vsel %vm2162_vm13, %v2159_v16, %v2038_v53  ;;  %v2165_v33 = vsel %vm2164_vm15, %v2161_v39, %v2040_v36  ;;  %vm2179_vm2 = vcmp.lt.s32.totalorder %v1917_v2, %v1921_v0  ;;  %vm7437_vm5 = vcmp.eq.f32.partialorder %v7300_v20, %v5134_v56 }
 0x22c   : > { %vm2166_vm12 = vcmp.lt.s32.totalorder %v2163_v29, %v2165_v33  ;;  %v1925_v10 = vsel %vm7437_vm5, %v5258_v4, 512  ;;  %v2178_v52 = vsel %vm2177_vm7, %v1915_v19, %v1919_v23  ;;  %v2180_v1 = vsel %vm2179_vm2, %v1917_v2, %v1921_v0  ;;  %v7447_v0 = vld [vmem:[#allocation10_spill] sm:$0xff] }
 0x22d   : > { %v5872_v46 = vsel %vm2166_vm12, %v2163_v29, %v2165_v33  ;;  %vm2181_vm0 = vcmp.lt.s32.totalorder %v2178_v52, %v1923_v37  ;;  %vm2183_vm1 = vcmp.lt.s32.totalorder %v2180_v1, %v1925_v10  ;;  %vm7438_vm3 = vcmp.eq.f32.partialorder %v7301_v9, %v5134_v56 }
 0x22e   : > { %v1927_v36 = vsel %vm7438_vm3, %v5261_v43, 512  ;;  %vm7439_vm14 = vcmp.eq.f32.partialorder %v7302_v54, %v5134_v56  ;;  %v2182_v53 = vsel %vm2181_vm0, %v2178_v52, %v1923_v37  ;;  %v2184_v16 = vsel %vm2183_vm1, %v2180_v1, %v1925_v10  ;;  %v7449_v37 = vld [vmem:[#allocation16_spill] sm:$0xff]  ;;  %v7450_v10 = vld [vmem:[#allocation39_spill] sm:$0xff]  ;;  %v7453_v1 = vld [vmem:[#allocation41_spill] sm:$0xff] }
 0x22f   : > { %v1929_v61 = vsel %vm7439_vm14, %v5264_v24, 512  ;;  %vm2185_vm8 = vcmp.lt.s32.totalorder %v2182_v53, %v1927_v36  ;;  %vm7440_vm13 = vcmp.eq.f32.partialorder %v7303_v8, %v5134_v56  ;;  %vm7441_vm15 = vcmp.eq.f32.partialorder %v7304_v6, %v5134_v56 }
 0x230   : > { %vm2187_vm9 = vcmp.lt.s32.totalorder %v2184_v16, %v1929_v61  ;;  %v1931_v20 = vsel %vm7440_vm13, %v5267_v44, 512  ;;  %v1933_v9 = vsel %vm7441_vm15, %v5270_v7, 512  ;;  %v2186_v19 = vsel %vm2185_vm8, %v2182_v53, %v1927_v36  ;;  %v7455_v53 = vld [vmem:[#allocation28_spill] sm:$0xff] }
 0x231   : > { %v2188_v2 = vsel %vm2187_vm9, %v2184_v16, %v1929_v61  ;;  %vm2189_vm12 = vcmp.lt.s32.totalorder %v2186_v19, %v1931_v20  ;;  %vm7442_vm7 = vcmp.eq.f32.partialorder %v7305_v3, %v5134_v56  ;;  %vm7443_vm2 = vcmp.eq.f32.partialorder %v7306_v34, %v5134_v56 }
 0x232   : > { %vm2191_vm6 = vcmp.lt.s32.totalorder %v2188_v2, %v1933_v9  ;;  %v1935_v54 = vsel %vm7442_vm7, %v5273_v59, 512  ;;  %v1937_v8 = vsel %vm7443_vm2, %v5276_v11, 512  ;;  %v2190_v39 = vsel %vm2189_vm12, %v2186_v19, %v1931_v20  ;;  %v7457_v20 = vld [vmem:[#allocation38_spill] sm:$0xff] }
 0x233   : > { %v2192_v62 = vsel %vm2191_vm6, %v2188_v2, %v1933_v9  ;;  %vm2193_vm5 = vcmp.lt.s32.totalorder %v2190_v39, %v1935_v54  ;;  %vm7444_vm1 = vcmp.eq.f32.partialorder %v7307_v27, %v5134_v56  ;;  %vm7445_vm3 = vcmp.eq.f32.partialorder %v7308_v45, %v5134_v56  ;;  %v431_v45 = vld [vmem:[%s6766_s2 + $0x8] sm:$0xff] }
 0x234   : > { %vm2195_vm0 = vcmp.lt.s32.totalorder %v2192_v62, %v1937_v8  ;;  %v1939_v6 = vsel %vm7444_vm1, %v5279_v40, 512  ;;  %v1941_v3 = vsel %vm7445_vm3, %v5282_v5, 512  ;;  %v2194_v23 = vsel %vm2193_vm5, %v2190_v39, %v1935_v54  ;;  %2760 = vmatprep.mubr.f32.mxu1 %v431_v45  ;;  %v7459_v54 = vld [vmem:[#allocation44_spill] sm:$0xff] }
 0x235   : > { %v2196_v60 = vsel %vm2195_vm0, %v2192_v62, %v1937_v8  ;;  %vm2197_vm14 = vcmp.lt.s32.totalorder %v2194_v23, %v1939_v6  ;;  %vm7446_vm9 = vcmp.eq.f32.partialorder %v7309_v12, %v5134_v56  ;;  %vm7448_vm13 = vcmp.eq.f32.partialorder %v7310_v30, %v5134_v56  ;;  %v7452_v12 = vld [vmem:[#allocation22_spill] sm:$0xff]  ;;  %v7468_v45 = vld [vmem:[#allocation56_spill] sm:$0xff] }
 0x236   : > { %vm2199_vm8 = vcmp.lt.s32.totalorder %v2196_v60, %v1941_v3  ;;  %v1943_v34 = vsel %vm7446_vm9, %v5291_v31, 512  ;;  %v1945_v27 = vsel %vm7448_vm13, %v7447_v0, 512  ;;  %v2198_v29 = vsel %vm2197_vm14, %v2194_v23, %v1939_v6  ;;  %v7461_v62 = vld [vmem:[#allocation50_spill] sm:$0xff]  ;;  %v7462_v6 = vld [vmem:[#allocation49_spill] sm:$0xff]  ;;  %v7478_v8 = vld [vmem:[#allocation72_spill] sm:$0xff] }
 0x237   : > { %v2200_v33 = vsel %vm2199_vm8, %v2196_v60, %v1941_v3  ;;  %vm2201_vm15 = vcmp.lt.s32.totalorder %v2198_v29, %v1943_v34  ;;  %vm7451_vm6 = vcmp.eq.f32.partialorder %v7450_v10, %v5134_v56  ;;  %vm7454_vm7 = vcmp.eq.f32.partialorder %v7453_v1, %v5134_v56 }
 0x238   : > { %vm2203_vm12 = vcmp.lt.s32.totalorder %v2200_v33, %v1945_v27  ;;  %v1947_v52 = vsel %vm7451_vm6, %v7449_v37, 512  ;;  %v1949_v36 = vsel %vm7454_vm7, %v7452_v12, 512  ;;  %v2202_v30 = vsel %vm2201_vm15, %v2198_v29, %v1943_v34  ;;  %v7466_v34 = vld [vmem:[#allocation54_spill] sm:$0xff] }
 0x239   : > { %v2204_v61 = vsel %vm2203_vm12, %v2200_v33, %v1945_v27  ;;  %vm2205_vm2 = vcmp.lt.s32.totalorder %v2202_v30, %v1947_v52  ;;  %vm7456_vm0 = vcmp.eq.f32.partialorder %v7313_v47, %v5134_v56  ;;  %vm7458_vm1 = vcmp.eq.f32.partialorder %v7314_v32, %v5134_v56  ;;  %v7464_v32 = vld [vmem:[#allocation52_spill] sm:$0xff] }
 0x23a   : > { %vm2207_vm5 = vcmp.lt.s32.totalorder %v2204_v61, %v1949_v36  ;;  %v1951_v16 = vsel %vm7456_vm0, %v7455_v53, 512  ;;  %v1953_v9 = vsel %vm7458_vm1, %v7457_v20, 512  ;;  %v2206_v19 = vsel %vm2205_vm2, %v2202_v30, %v1947_v52  ;;  %v7470_v52 = vld [vmem:[#allocation130_spill] sm:$0xff] }
 0x23b   : > { %v2208_v2 = vsel %vm2207_vm5, %v2204_v61, %v1949_v36  ;;  %vm2209_vm3 = vcmp.lt.s32.totalorder %v2206_v19, %v1951_v16  ;;  %v1955_v39 = vsel %vm1827_vm10, %v7459_v54, 512  ;;  %vm7463_vm8 = vcmp.eq.f32.partialorder %v7462_v6, %v5134_v56 }
 0x23c   : > { %vm2211_vm14 = vcmp.lt.s32.totalorder %v2208_v2, %v1953_v9  ;;  %v1957_v47 = vsel %vm7463_vm8, %v7461_v62, 512  ;;  %v2210_v3 = vsel %vm2209_vm3, %v2206_v19, %v1951_v16  ;;  %vm7465_vm15 = vcmp.eq.f32.partialorder %v7317_v18, %v5134_v56 }
 0x23d   : > { %v2212_v23 = vsel %vm2211_vm14, %v2208_v2, %v1953_v9  ;;  %vm2213_vm9 = vcmp.lt.s32.totalorder %v2210_v3, %v1955_v39  ;;  %v1959_v60 = vsel %vm7465_vm15, %v7464_v32, 512  ;;  %vm7467_vm12 = vcmp.eq.f32.partialorder %v7318_v55, %v5134_v56  ;;  %v7477_v2 = vld [vmem:[#allocation11_spill] sm:$0xff] }
 0x23e   : > { %vm2215_vm13 = vcmp.lt.s32.totalorder %v2212_v23, %v1957_v47  ;;  %v1961_v27 = vsel %vm7467_vm12, %v7466_v34, 512  ;;  %v2214_v29 = vsel %vm2213_vm9, %v2210_v3, %v1955_v39  ;;  %vm7469_vm7 = vcmp.eq.f32.partialorder %v7319_v63, %v5134_v56 }
 0x23f   : > { %v2216_v33 = vsel %vm2215_vm13, %v2212_v23, %v1957_v47  ;;  %vm2217_vm10 = vcmp.lt.s32.totalorder %v2214_v29, %v1959_v60  ;;  %v1963_v10 = vsel %vm7469_vm7, %v7468_v45, 512  ;;  %v1965_v18 = vsel %vm1837_vm4, %v7470_v52, 512  ;;  %v7481_v47 = vld [vmem:[#allocation77_spill] sm:$0xff]  ;;  %v7483_v23 = vld [vmem:[#allocation15_spill] sm:$0xff] }
 0x240   : > { %vm2219_vm6 = vcmp.lt.s32.totalorder %v2216_v33, %v1961_v27  ;;  %v2218_v1 = vsel %vm2217_vm10, %v2214_v29, %v1959_v60  ;;  %vm7471_vm0 = vcmp.eq.f32.partialorder %v7321_v15, %v5134_v56  ;;  %vm7472_vm1 = vcmp.eq.f32.partialorder %v7322_v14, %v5134_v56  ;;  %v7475_v14 = vld [vmem:[#allocation68_spill] sm:$0xff]  ;;  %v7484_v60 = vld [vmem:[#allocation81_spill] sm:$0xff] }
 0x241   : > { %v2220_v36 = vsel %vm2219_vm6, %v2216_v33, %v1961_v27  ;;  %vm2221_vm2 = vcmp.lt.s32.totalorder %v2218_v1, %v1963_v10  ;;  %v1967_v55 = vsel %vm7471_vm0, %v5369_v49, 512  ;;  %v1969_v63 = vsel %vm7472_vm1, %v7342_v58, 512 }
 0x242   : > { %vm2223_vm5 = vcmp.lt.s32.totalorder %v2220_v36, %v1965_v18  ;;  %v2222_v30 = vsel %vm2221_vm2, %v2218_v1, %v1963_v10  ;;  %vm7473_vm4 = vcmp.eq.f32.partialorder %v7323_v22, %v5134_v56  ;;  %vm7474_vm8 = vcmp.eq.f32.partialorder %v7324_v50, %v5134_v56  ;;  %v7480_v50 = vld [vmem:[#allocation13_spill] sm:$0xff] }
 0x243   : > { %v2224_v61 = vsel %vm2223_vm5, %v2220_v36, %v1965_v18  ;;  %vm2225_vm3 = vcmp.lt.s32.totalorder %v2222_v30, %v1967_v55  ;;  %v1971_v26 = vsel %vm7473_vm4, %v5375_v51, 512  ;;  %v1973_v15 = vsel %vm7474_vm8, %v7349_v17, 512  ;;  %v7486_v10 = vld [vmem:[#allocation17_spill] sm:$0xff]  ;;  %v7489_v36 = vld [vmem:[#allocation19_spill] sm:$0xff] }
 0x244   : > { %vm2227_vm14 = vcmp.lt.s32.totalorder %v2224_v61, %v1969_v63  ;;  %v2226_v16 = vsel %vm2225_vm3, %v2222_v30, %v1967_v55  ;;  %vm7476_vm15 = vcmp.eq.f32.partialorder %v7475_v14, %v5134_v56  ;;  %vm7479_vm12 = vcmp.eq.f32.partialorder %v7478_v8, %v5134_v56  ;;  %v7487_v18 = vld [vmem:[#allocation85_spill] sm:$0xff] }
 0x245   : > { %v2228_v9 = vsel %vm2227_vm14, %v2224_v61, %v1969_v63  ;;  %vm2229_vm9 = vcmp.lt.s32.totalorder %v2226_v16, %v1971_v26  ;;  %v1975_v19 = vsel %vm7476_vm15, %v5617_v28, 512  ;;  %v1977_v22 = vsel %vm7479_vm12, %v7477_v2, 512  ;;  %v7490_v55 = vld [vmem:[#allocation89_spill] sm:$0xff] }
 0x246   : > { %vm2231_vm13 = vcmp.lt.s32.totalorder %v2228_v9, %v1973_v15  ;;  %v2230_v39 = vsel %vm2229_vm9, %v2226_v16, %v1971_v26  ;;  %vm7482_vm7 = vcmp.eq.f32.partialorder %v7481_v47, %v5134_v56  ;;  %vm7485_vm2 = vcmp.eq.f32.partialorder %v7484_v60, %v5134_v56  ;;  %v7492_v26 = vld [vmem:[#allocation21_spill] sm:$0xff] }
 0x247   : > { %v2232_v6 = vsel %vm2231_vm13, %v2228_v9, %v1973_v15  ;;  %vm2233_vm10 = vcmp.lt.s32.totalorder %v2230_v39, %v1975_v19  ;;  %v1979_v3 = vsel %vm7482_vm7, %v7480_v50, 512  ;;  %v1981_v27 = vsel %vm7485_vm2, %v7483_v23, 512  ;;  %v7493_v15 = vld [vmem:[#allocation93_spill] sm:$0xff]  ;;  %v7495_v9 = vld [vmem:[#allocation23_spill] sm:$0xff] }
 0x248   : > { %vm2235_vm6 = vcmp.lt.s32.totalorder %v2232_v6, %v1977_v22  ;;  %v2234_v29 = vsel %vm2233_vm10, %v2230_v39, %v1975_v19  ;;  %vm7488_vm1 = vcmp.eq.f32.partialorder %v7487_v18, %v5134_v56  ;;  %vm7491_vm3 = vcmp.eq.f32.partialorder %v7490_v55, %v5134_v56  ;;  %v7496_v14 = vld [vmem:[#allocation97_spill] sm:$0xff]  ;;  %v7504_v18 = vld [vmem:[#allocation71_spill] sm:$0xff] }
 0x249   : > { %v2236_v33 = vsel %vm2235_vm6, %v2232_v6, %v1977_v22  ;;  %vm2237_vm5 = vcmp.lt.s32.totalorder %v2234_v29, %v1979_v3  ;;  %v1983_v1 = vsel %vm7488_vm1, %v7486_v10, 512  ;;  %v1985_v63 = vsel %vm7491_vm3, %v7489_v36, 512  ;;  %v7498_v39 = vld [vmem:[#allocation25_spill] sm:$0xff] }
 0x24a   : > { %vm2239_vm0 = vcmp.lt.s32.totalorder %v2236_v33, %v1981_v27  ;;  %v2238_v30 = vsel %vm2237_vm5, %v2234_v29, %v1979_v3  ;;  %vm7494_vm8 = vcmp.eq.f32.partialorder %v7493_v15, %v5134_v56  ;;  %vm7497_vm9 = vcmp.eq.f32.partialorder %v7496_v14, %v5134_v56  ;;  %v7499_v6 = vld [vmem:[#allocation101_spill] sm:$0xff]  ;;  %v7501_v3 = vld [vmem:[#allocation27_spill] sm:$0xff] }
 0x24b   : > { %v2240_v61 = vsel %vm2239_vm0, %v2236_v33, %v1981_v27  ;;  %vm2241_vm14 = vcmp.lt.s32.totalorder %v2238_v30, %v1983_v1  ;;  %v1987_v16 = vsel %vm7494_vm8, %v7492_v26, 512  ;;  %v1989_v19 = vsel %vm7497_vm9, %v7495_v9, 512  ;;  %v7502_v60 = vld [vmem:[#allocation105_spill] sm:$0xff] }
 0x24c   : > { %vm2243_vm4 = vcmp.lt.s32.totalorder %v2240_v61, %v1985_v63  ;;  %v2242_v8 = vsel %vm2241_vm14, %v2238_v30, %v1983_v1  ;;  %vm7500_vm12 = vcmp.eq.f32.partialorder %v7499_v6, %v5134_v56  ;;  %vm7503_vm10 = vcmp.eq.f32.partialorder %v7502_v60, %v5134_v56  ;;  %v7505_v1 = vld [vmem:[#allocation29_spill] sm:$0xff] }
 0x24d   : > { %v2244_v22 = vsel %vm2243_vm4, %v2240_v61, %v1985_v63  ;;  %vm2245_vm13 = vcmp.lt.s32.totalorder %v2242_v8, %v1987_v16  ;;  %v1991_v47 = vsel %vm7500_vm12, %v7498_v39, 512  ;;  %v1993_v27 = vsel %vm7503_vm10, %v7501_v3, 512  ;;  %v7506_v55 = vld [vmem:[#allocation109_spill] sm:$0xff]  ;;  %v7521_v3 = vld [vmem:[#allocation123_spill] sm:$0xff] }
 0x24e   : > { %vm2247_vm15 = vcmp.lt.s32.totalorder %v2244_v22, %v1989_v19  ;;  %v2246_v29 = vsel %vm2245_vm13, %v2242_v8, %v1987_v16  ;;  %vm1883_vm6 = vcmp.eq.f32.partialorder %v7504_v18, %v5134_v56  ;;  %vm7507_vm5 = vcmp.eq.f32.partialorder %v7506_v55, %v5134_v56  ;;  %v7508_v30 = vld [vmem:[#allocation33_spill] sm:$0xff]  ;;  %v7511_v16 = vld [vmem:[#allocation70_spill] sm:$0xff]  ;;  %v7515_v55 = vld [vmem:[#allocation43_spill] sm:$0xff] }
 0x24f   : > { %v2248_v33 = vsel %vm2247_vm15, %v2244_v22, %v1989_v19  ;;  %vm2249_vm7 = vcmp.lt.s32.totalorder %v2246_v29, %v1991_v47  ;;  %v1995_v63 = vsel %vm7507_vm5, %v7505_v1, 512  ;;  %v7509_v61 = vld [vmem:[#allocation113_spill] sm:$0xff]  ;;  %vm1885_vm1 = vcmp.eq.f32.partialorder %v7511_v16, %v5134_v56  ;;  %v7512_v19 = vld [vmem:[#allocation80_spill] sm:$0xff]  ;;  %v7516_v1 = vld [vmem:[#allocation35_spill] sm:$0xff] }
 0x250   : > { %vm2251_vm2 = vcmp.lt.s32.totalorder %v2248_v33, %v1993_v27  ;;  %vm7510_vm0 = vcmp.eq.f32.partialorder %v7509_v61, %v5134_v56  ;;  %v2250_v14 = vsel %vm2249_vm7, %v2246_v29, %v1991_v47  ;;  %vm1887_vm3 = vcmp.eq.f32.partialorder %v7512_v19, %v5134_v56  ;;  %v7513_v8 = vld [vmem:[#allocation37_spill] sm:$0xff]  ;;  %v7518_v29 = vld [vmem:[#allocation76_spill] sm:$0xff]  ;;  %v7539_v18 = vld [vmem:[#allocation3_spill] sm:$0xff] }
 0x251   : > { %v1997_v15 = vsel %vm7510_vm0, %v7508_v30, 512  ;;  %v2252_v6 = vsel %vm2251_vm2, %v2248_v33, %v1993_v27  ;;  %vm2253_vm14 = vcmp.lt.s32.totalorder %v2250_v14, %v1995_v63  ;;  %v1999_v60 = vsel %vm1871_vm11, %v7513_v8, 512  ;;  %v7519_v33 = vld [vmem:[#allocation88_spill] sm:$0xff]  ;;  %v7520_v30 = vld [vmem:[#allocation45_spill] sm:$0xff]  ;;  %v7523_v8 = vld [vmem:[#allocation51_spill] sm:$0xff] }
 0x252   : > { %vm2255_vm4 = vcmp.lt.s32.totalorder %v2252_v6, %v1997_v15  ;;  %vm7517_vm8 = vcmp.eq.f32.partialorder %v7516_v1, %v5134_v56  ;;  %v2254_v47 = vsel %vm2253_vm14, %v2250_v14, %v1995_v63  ;;  %vm1889_vm9 = vcmp.eq.f32.partialorder %v7518_v29, %v5134_v56  ;;  %v7524_v39 = vld [vmem:[#allocation125_spill] sm:$0xff]  ;;  %v7526_v14 = vld [vmem:[#allocation84_spill] sm:$0xff]  ;;  %v7542_v19 = vld [vmem:[#allocation14_spill] sm:$0xff] }
 0x253   : > { %v2001_v61 = vsel %vm7517_vm8, %v7515_v55, 512  ;;  %v2256_v27 = vsel %vm2255_vm4, %v2252_v6, %v1997_v15  ;;  %vm1891_vm13 = vcmp.eq.f32.partialorder %v7519_v33, %v5134_v56  ;;  %vm2257_vm15 = vcmp.lt.s32.totalorder %v2254_v47, %v1999_v60  ;;  %v7527_v6 = vld [vmem:[#allocation53_spill] sm:$0xff]  ;;  %v7528_v55 = vld [vmem:[#allocation127_spill] sm:$0xff] }
 0x254   : > { %vm2259_vm12 = vcmp.lt.s32.totalorder %v2256_v27, %v2001_v61  ;;  %vm7522_vm10 = vcmp.eq.f32.partialorder %v7521_v3, %v5134_v56  ;;  %vm7525_vm11 = vcmp.eq.f32.partialorder %v7524_v39, %v5134_v56  ;;  %v2258_v63 = vsel %vm2257_vm15, %v2254_v47, %v1999_v60  ;;  %v7531_v26 = vld [vmem:[#allocation129_spill] sm:$0xff]  ;;  %v7534_v47 = vld [vmem:[#allocation92_spill] sm:$0xff] }
 0x255   : > { %v2003_v22 = vsel %vm7522_vm10, %v7520_v30, 512  ;;  %v2005_v1 = vsel %vm7525_vm11, %v7523_v8, 512  ;;  %v2260_v15 = vsel %vm2259_vm12, %v2256_v27, %v2001_v61  ;;  %vm1893_vm7 = vcmp.eq.f32.partialorder %v7526_v14, %v5134_v56  ;;  %v7530_v30 = vld [vmem:[#allocation55_spill] sm:$0xff]  ;;  %v7533_v61 = vld [vmem:[#allocation96_spill] sm:$0xff] }
 0x256   : > { %vm7529_vm2 = vcmp.eq.f32.partialorder %v7528_v55, %v5134_v56  ;;  %vm2261_vm5 = vcmp.lt.s32.totalorder %v2258_v63, %v2003_v22  ;;  %vm2263_vm0 = vcmp.lt.s32.totalorder %v2260_v15, %v2005_v1  ;;  %v2168_v3 = vrot.slane %v5872_v46, 4  ;;  %v7535_v55 = vld [vmem:[#allocation6_spill] sm:$0xff] }
 0x257   : > { %v2007_v9 = vsel %vm7529_vm2, %v7527_v6, 512  ;;  %vm7532_vm14 = vcmp.eq.f32.partialorder %v7531_v26, %v5134_v56  ;;  %v2262_v8 = vsel %vm2261_vm5, %v2258_v63, %v2003_v22  ;;  %v2264_v60 = vsel %vm2263_vm0, %v2260_v15, %v2005_v1  ;;  %v7536_v6 = vld [vmem:[#allocation2_spill] sm:$0xff]  ;;  %v7537_v63 = vld [vmem:[#allocation104_spill] sm:$0xff]  ;;  %v7538_v15 = vld [vmem:[#allocation7_spill] sm:$0xff] }
 0x258   : > { %v2009_v39 = vsel %vm7532_vm14, %v7530_v30, 512  ;;  %vm1895_vm4 = vcmp.eq.f32.partialorder %v7533_v61, %v5134_v56  ;;  %vm1897_vm8 = vcmp.eq.f32.partialorder %v7534_v47, %v5134_v56  ;;  %vm2265_vm15 = vcmp.lt.s32.totalorder %v2262_v8, %v2007_v9  ;;  %v7549_v61 = vld [vmem:[#allocation24_spill] sm:$0xff] }
 0x259   : > { %vm2267_vm12 = vcmp.lt.s32.totalorder %v2264_v60, %v2009_v39  ;;  %v2011_v27 = vsel %vm1883_vm6, %v7535_v55, 512  ;;  %v2013_v26 = vsel %vm1885_vm1, %v7536_v6, 512  ;;  %v2266_v22 = vsel %vm2265_vm15, %v2262_v8, %v2007_v9  ;;  %v7540_v8 = vld [vmem:[#allocation100_spill] sm:$0xff] }
 0x25a   : > { %v2268_v1 = vsel %vm2267_vm12, %v2264_v60, %v2009_v39  ;;  %vm1899_vm10 = vcmp.eq.f32.partialorder %v7537_v63, %v5134_v56  ;;  %v2015_v30 = vsel %vm1887_vm3, %v7538_v15, 512  ;;  %vm2269_vm11 = vcmp.lt.s32.totalorder %v2266_v22, %v2011_v27  ;;  %v7541_v39 = vld [vmem:[#allocation112_spill] sm:$0xff] }
 0x25b   : > { %vm2271_vm2 = vcmp.lt.s32.totalorder %v2268_v1, %v2013_v26  ;;  %vm2169_vm5 = vcmp.lt.s32.totalorder %v5872_v46, %v2168_v3  ;;  %v2017_v16 = vsel %vm1889_vm9, %v7539_v18, 512  ;;  %v2270_v6 = vsel %vm2269_vm11, %v2266_v22, %v2011_v27  ;;  %v7543_v15 = vld [vmem:[#allocation12_spill] sm:$0xff] }
 0x25c   : > { %v2272_v9 = vsel %vm2271_vm2, %v2268_v1, %v2013_v26  ;;  %vm1901_vm6 = vcmp.eq.f32.partialorder %v7540_v8, %v5134_v56  ;;  %vm1903_vm1 = vcmp.eq.f32.partialorder %v7541_v39, %v5134_v56  ;;  %vm2273_vm0 = vcmp.lt.s32.totalorder %v2270_v6, %v2015_v30  ;;  %v7544_v1 = vld [vmem:[#allocation108_spill] sm:$0xff] }
 0x25d   : > { %vm2275_vm14 = vcmp.lt.s32.totalorder %v2272_v9, %v2017_v16  ;;  %v2019_v60 = vsel %vm1891_vm13, %v7542_v19, 512  ;;  %v2021_v29 = vsel %vm1893_vm7, %v7543_v15, 512  ;;  %v2274_v27 = vsel %vm2273_vm0, %v2270_v6, %v2015_v30  ;;  %v7545_v18 = vld [vmem:[#allocation20_spill] sm:$0xff]  ;;  %v7546_v19 = vld [vmem:[#allocation18_spill] sm:$0xff] }
 0x25e   : > { %v2276_v26 = vsel %vm2275_vm14, %v2272_v9, %v2017_v16  ;;  %v2170_v22 = vsel %vm2169_vm5, %v5872_v46, %v2168_v3  ;;  %vm1905_vm3 = vcmp.eq.f32.partialorder %v7544_v1, %v5134_v56  ;;  %vm2277_vm9 = vcmp.lt.s32.totalorder %v2274_v27, %v2019_v60  ;;  %v7547_v6 = vld [vmem:[#allocation120_spill] sm:$0xff]  ;;  %v7548_v46 = vld [vmem:[#allocation26_spill] sm:$0xff] }
 0x25f   : > { %vm2279_vm15 = vcmp.lt.s32.totalorder %v2276_v26, %v2021_v29  ;;  %v2023_v33 = vsel %vm1895_vm4, %v7545_v18, 512  ;;  %v2025_v14 = vsel %vm1897_vm8, %v7546_v19, 512  ;;  %v2278_v15 = vsel %vm2277_vm9, %v2274_v27, %v2019_v60  ;;  %v7550_v60 = vld [vmem:[#allocation116_spill] sm:$0xff] }
 0x260   : > { %v2280_v30 = vsel %vm2279_vm15, %v2276_v26, %v2021_v29  ;;  %vm1907_vm13 = vcmp.eq.f32.partialorder %v7547_v6, %v5134_v56  ;;  %v2027_v3 = vsel %vm1899_vm10, %v7548_v46, 512  ;;  %vm2281_vm7 = vcmp.lt.s32.totalorder %v2278_v15, %v2023_v33  ;;  %v7551_v29 = vld [vmem:[#allocation30_spill] sm:$0xff]  ;;  %v7552_v63 = vld [vmem:[#allocation36_spill] sm:$0xff] }
 0x261   : > { %vm2283_vm12 = vcmp.lt.s32.totalorder %v2280_v30, %v2025_v14  ;;  %v2171_v16 = vrot.slane %v2170_v22, 2  ;;  %v2029_v9 = vsel %vm1901_vm6, %v7549_v61, 512  ;;  %v2282_v47 = vsel %vm2281_vm7, %v2278_v15, %v2023_v33  ;;  %v7553_v26 = vld [vmem:[#allocation32_spill] sm:$0xff] }
 0x262   : > { %v2284_v19 = vsel %vm2283_vm12, %v2280_v30, %v2025_v14  ;;  %vm1909_vm4 = vcmp.eq.f32.partialorder %v7550_v60, %v5134_v56  ;;  %vm1911_vm8 = vcmp.eq.f32.partialorder %v7551_v29, %v5134_v56  ;;  %vm2285_vm11 = vcmp.lt.s32.totalorder %v2282_v47, %v2027_v3  ;;  %v7554_v14 = vld [vmem:[#allocation122_spill] sm:$0xff] }
 0x263   : > { %vm2287_vm2 = vcmp.lt.s32.totalorder %v2284_v19, %v2029_v9  ;;  %v2031_v27 = vsel %vm1903_vm1, %v7552_v63, 512  ;;  %v2033_v8 = vsel %vm1905_vm3, %v7553_v26, 512  ;;  %v2286_v15 = vsel %vm2285_vm11, %v2282_v47, %v2027_v3 }
 0x264   : > { %v2288_v33 = vsel %vm2287_vm2, %v2284_v19, %v2029_v9  ;;  %vm1913_vm10 = vcmp.eq.f32.partialorder %v7554_v14, %v5134_v56  ;;  %v2035_v30 = vsel %vm1907_vm13, %v7424_v57, 512  ;;  %vm2289_vm5 = vcmp.lt.s32.totalorder %v2286_v15, %v2031_v27 }
 0x265   : > { %vm2291_vm6 = vcmp.lt.s32.totalorder %v2288_v33, %v2033_v8  ;;  %vm2172_vm0 = vcmp.lt.s32.totalorder %v2170_v22, %v2171_v16  ;;  %v2037_v39 = vsel %vm1909_vm4, %v7425_v38, 512  ;;  %v2290_v60 = vsel %vm2289_vm5, %v2286_v15, %v2031_v27 }
 0x266   : > { %v2292_v63 = vsel %vm2291_vm6, %v2288_v33, %v2033_v8  ;;  %vm2293_vm1 = vcmp.lt.s32.totalorder %v2290_v60, %v2035_v30  ;;  %v2039_v19 = vsel %vm1911_vm8, %v7426_v42, 512  ;;  %v2041_v1 = vsel %vm1913_vm10, %v7427_v48, 512 }
 0x267   : > { %vm2295_vm14 = vcmp.lt.s32.totalorder %v2292_v63, %v2037_v39  ;;  %v2294_v3 = vsel %vm2293_vm1, %v2290_v60, %v2035_v30  ;;  %v2173_v6 = vsel %vm2172_vm0, %v2170_v22, %v2171_v16  ;;  %v462_v30 = vld [vmem:[%s6766_s2 + $0x100] sm:$0xff]  ;;  %v7572_v60 = vld [vmem:[#allocation3_spill] sm:$0xff] }
 0x268   : > { %v2296_v9 = vsel %vm2295_vm14, %v2292_v63, %v2037_v39  ;;  %vm2297_vm3 = vcmp.lt.s32.totalorder %v2294_v3, %v2039_v19  ;;  %v2174_v38 = vrot.slane %v2173_v6, 1  ;;  %v463_v63 = vld [vmem:[%s6766_s2 + $0x108] sm:$0xff] }
 0x269   : > { %vm2299_vm9 = vcmp.lt.s32.totalorder %v2296_v9, %v2041_v1  ;;  %v2298_v47 = vsel %vm2297_vm3, %v2294_v3, %v2039_v19  ;;  %v7571_v39 = vld [vmem:[#allocation7_spill] sm:$0xff]  ;;  %v7574_v3 = vld [vmem:[#allocation12_spill] sm:$0xff] }
 0x26a   : > { %v2300_v14 = vsel %vm2299_vm9, %v2296_v9, %v2041_v1  ;;  %vm2175_vm7 = vcmp.lt.s32.totalorder %v2173_v6, %v2174_v38  ;;  %v467_v19 = vld [vmem:[%s6766_s2 + $0x128] sm:$0xff]  ;;  %v7573_v1 = vld [vmem:[#allocation14_spill] sm:$0xff] }
 0x26b   : > { %vm2301_vm15 = vcmp.lt.s32.totalorder %v2298_v47, %v2300_v14  ;;  %v6142_v57 = vsel %vm2175_vm7, %v2173_v6, %v2174_v38  ;;  %v3937_v38 = vmov 1.0|1.0   ;;  %v471_v9 = vld [vmem:[%s6766_s2 + $0x148] sm:$0xff]  ;;  %v470_v6 = vld [vmem:[%s6766_s2 + $0x140] sm:$0xff] }
 0x26c   : > { %v2302_v27 = vsel %vm2301_vm15, %v2298_v47, %v2300_v14  ;;  %vm2312_vm4 = vcmp.eq.s32.totalorder %v5137_v21, %v6142_v57  ;;  %vm2314_vm8 = vcmp.eq.s32.totalorder %v5246_v41, %v6142_v57  ;;  %vm2316_vm3 = vcmp.eq.s32.totalorder %v5249_v35, %v6142_v57  ;;  %v7575_v47 = vld [vmem:[#allocation18_spill] sm:$0xff]  ;;  %v475_v14 = vld [vmem:[%s6766_s2 + $0x168] sm:$0xff] }
 0x26d   : > { %v2303_v8 = vrot.slane %v2302_v27, 4  ;;  %vm3675_vm5 = vmpackc.low %vm2314_vm8, %vm2312_vm4  ;;  %vm2318_vm9 = vcmp.eq.s32.totalorder %v5252_v25, %v6142_v57  ;;  %vm2320_vm4 = vcmp.eq.s32.totalorder %v5255_v13, %v6142_v57  ;;  %vm2322_vm8 = vcmp.eq.s32.totalorder %v5258_v4, %v6142_v57 }
 0x26e   : > { %vm3679_vm7 = vmpackc.low %vm2318_vm9, %vm2316_vm3 }
 0x26f   : > { %vm2304_vm13 = vcmp.lt.s32.totalorder %v2302_v27, %v2303_v8 }
 0x270   : > { %v2305_v15 = vsel %vm2304_vm13, %v2302_v27, %v2303_v8  ;;  %v474_v27 = vld [vmem:[%s6766_s2 + $0x160] sm:$0xff]  ;;  %v479_v8 = vld [vmem:[%s6766_s2 + $0x188] sm:$0xff] }
 0x271   : > { %v2306_v33 = vrot.slane %v2305_v15, 2 }
 0x273   : > { %vm2307_vm12 = vcmp.lt.s32.totalorder %v2305_v15, %v2306_v33 }
 0x274   : > { %v2308_v56 = vsel %vm2307_vm12, %v2305_v15, %v2306_v33  ;;  %v7576_v15 = vld [vmem:[#allocation36_spill] sm:$0xff]  ;;  %v483_v33 = vld [vmem:[%s6766_s2 + $0x1a8] sm:$0xff] }
 0x275   : > { %v2309_v29 = vrot.slane %v2308_v56, 1 }
 0x277   : > { %vm2310_vm11 = vcmp.lt.s32.totalorder %v2308_v56, %v2309_v29 }
 0x278   : > { %v6148_v22 = vsel %vm2310_vm11, %v2308_v56, %v2309_v29  ;;  %v7578_v56 = vld [vmem:[#allocation40_spill] sm:$0xff]  ;;  %v487_v29 = vld [vmem:[%s6766_s2 + $0x1c8] sm:$0xff] }
 0x279   : > { %vm2313_vm2 = vcmp.eq.s32.totalorder %v5137_v21, %v6148_v22  ;;  %vm2315_vm10 = vcmp.eq.s32.totalorder %v5246_v41, %v6148_v22  ;;  %vm2317_vm6 = vcmp.eq.s32.totalorder %v5249_v35, %v6148_v22  ;;  %vm2319_vm0 = vcmp.eq.s32.totalorder %v5252_v25, %v6148_v22 }
 0x27a   : > { %vm3673_vm1 = vmpackc.low %vm2315_vm10, %vm2313_vm2  ;;  %vm2321_vm15 = vcmp.eq.s32.totalorder %v5255_v13, %v6148_v22  ;;  %vm2323_vm13 = vcmp.eq.s32.totalorder %v5258_v4, %v6148_v22  ;;  %v3938_v41 = vmov 1966171168   ;;  %vm2325_vm11 = vcmp.eq.s32.totalorder %v5261_v43, %v6148_v22  ;;  %v438_v4 = vld [vmem:[%s6766_s2 + $0x40] sm:$0xff] }
 0x27b   : > { %3674 = vmatprep.subr.msk.bf16.mxu1 %vm3673_vm1, %v3937_v38  ;;  %vm3677_vm14 = vmpackc.low %vm2319_vm0, %vm2317_vm6  ;;  %v3052_v16 = vunpack.c.l.s4 %v3938_v41  ;;  %vm2327_vm2 = vcmp.eq.s32.totalorder %v5264_v24, %v6148_v22  ;;  %vm2324_vm6 = vcmp.eq.s32.totalorder %v5261_v43, %v6142_v57  ;;  %vm2326_vm0 = vcmp.eq.s32.totalorder %v5264_v24, %v6142_v57  ;;  %v7560_v43 = vld [vmem:[#allocation25_spill] sm:$0xff]  ;;  %v491_v41 = vld [vmem:[%s6766_s2 + $0x1e8] sm:$0xff] }
 0x27c   : > { %3676 = vmatpush1.bf16.msk.msra.mxu1 %vm3675_vm5, %v3937_v38  ;;  %vm3681_vm12 = vmpackc.low %vm2323_vm13, %vm2321_vm15  ;;  %vm2329_vm1 = vcmp.eq.s32.totalorder %v5267_v44, %v6148_v22  ;;  %vm2328_vm15 = vcmp.eq.s32.totalorder %v5267_v44, %v6142_v57  ;;  %vm2330_vm13 = vcmp.eq.s32.totalorder %v5270_v7, %v6142_v57  ;;  %v3050_v24 = vcombine.low %v6142_v57, %v6148_v22 }
 0x27d   : > { %3678 = vmatprep.subr.msk.bf16.mxu1 %vm3677_vm14, %v3937_v38  ;;  %vm3683_vm10 = vmpackc.low %vm2322_vm8, %vm2320_vm4  ;;  %v3053_v35 = vunpack.c.0.s8 %v3052_v16  ;;  %vm2331_vm14 = vcmp.eq.s32.totalorder %v5270_v7, %v6148_v22  ;;  %v7555_v7 = vlaneseq  ;;  %v490_v16 = vld [vmem:[%s6766_s2 + $0x1e0] sm:$0xff] }
 0x27e   : > { %vm3685_vm5 = vmpackc.low %vm2327_vm2, %vm2325_vm11  ;;  %vm2332_vm11 = vcmp.eq.s32.totalorder %v5273_v59, %v6142_v57  ;;  %vm2334_vm2 = vcmp.eq.s32.totalorder %v5276_v11, %v6142_v57 }
 0x27f   : > { %vm3687_vm3 = vmpackc.low %vm2326_vm0, %vm2324_vm6  ;;  %v6190_v25 = vsub.s32 %v3053_v35, %v5137_v21  ;;  %vm2339_vm6 = vcmp.eq.s32.totalorder %v5282_v5, %v6148_v22  ;;  %v7561_v21 = vld [vmem:[#allocation27_spill] sm:$0xff]  ;;  %v432_v35 = vld [vmem:[%s6766_s2 + $0x10] sm:$0xff] }
 0x280   : > { %3680 = vmatpush1.bf16.msk.msra.mxu1 %vm3679_vm7, %v3937_v38  ;;  %vm3689_vm9 = vmpackc.low %vm2331_vm14, %vm2329_vm1  ;;  %vm2333_vm7 = vcmp.eq.s32.totalorder %v5273_v59, %v6148_v22  ;;  %vm2336_vm14 = vcmp.eq.s32.totalorder %v5279_v40, %v6142_v57  ;;  %v7558_v59 = vld [vmem:[#allocation21_spill] sm:$0xff] }
 0x281   : > { %3682 = vmatprep.subr.msk.bf16.mxu1 %vm3681_vm12, %v3937_v38  ;;  %vm2335_vm12 = vcmp.eq.s32.totalorder %v5276_v11, %v6148_v22  ;;  %vm3691_vm4 = vmpackc.low %vm2330_vm13, %vm2328_vm15  ;;  %v3057_v13 = vrot.slane %v3050_v24, %v6190_v25  ;;  %vm2343_vm15 = vcmp.eq.s32.totalorder %v7447_v0, %v6148_v22  ;;  %v445_v24 = vld [vmem:[%s6766_s2 + $0x78] sm:$0xff] }
 0x282   : > { %vm3693_vm8 = vmpackc.low %vm2335_vm12, %vm2333_vm7  ;;  %vm2340_vm12 = vcmp.eq.s32.totalorder %v5291_v31, %v6142_v57 }
 0x283   : > { %v3064_v11 = vrot.slane %v3057_v13, %v6190_v25  ;;  %vm3695_vm0 = vmpackc.low %vm2334_vm2, %vm2332_vm11  ;;  %vm2347_vm11 = vcmp.eq.s32.totalorder %v7452_v12, %v6148_v22  ;;  %v444_v13 = vld [vmem:[%s6766_s2 + $0x70] sm:$0xff] }
 0x284   : > { %3684 = vmatpush1.bf16.msk.msra.mxu1 %vm3683_vm10, %v3937_v38  ;;  %vm6217_vm10 = vcmp.lt.s32.totalorder %v7555_v7, 256  ;;  %v449_v7 = vld [vmem:[%s6766_s2 + $0x98] sm:$0xff] }
 0x285   : > { %3686 = vmatprep.subr.msk.bf16.mxu1 %vm3685_vm5, %v3937_v38  ;;  %vm2337_vm5 = vcmp.eq.s32.totalorder %v5279_v40, %v6148_v22  ;;  %3069 = vst.msk [vmem:[%s323_s14] sm:$0x3] %vm6217_vm10, %v3064_v11  ;;  %v434_v40 = vld [vmem:[%s6766_s2 + $0x20] sm:$0xff]  ;;  %v448_v11 = vld [vmem:[%s6766_s2 + $0x90] sm:$0xff] }
 0x286   : > { %vm3697_vm1 = vmpackc.low %vm2339_vm6, %vm2337_vm5  ;;  %vm2344_vm6 = vcmp.eq.s32.totalorder %v7449_v37, %v6142_v57 }
 0x288   : > { %3688 = vmatpush1.bf16.msk.msra.mxu1 %vm3687_vm3, %v3937_v38  ;;  %vm2338_vm3 = vcmp.eq.s32.totalorder %v5282_v5, %v6142_v57  ;;  %v435_v5 = vld [vmem:[%s6766_s2 + $0x28] sm:$0xff] }
 0x289   : > { %3690 = vmatprep.subr.msk.bf16.mxu1 %vm3689_vm9, %v3937_v38  ;;  %vm2341_vm9 = vcmp.eq.s32.totalorder %v5291_v31, %v6148_v22  ;;  %vm3699_vm13 = vmpackc.low %vm2338_vm3, %vm2336_vm14  ;;  %vm2351_vm14 = vcmp.eq.s32.totalorder %v7457_v20, %v6148_v22  ;;  %v430_v31 = vld [vmem:[%s6766_s2] sm:$0xff] }
 0x28a   : > { %vm3701_vm7 = vmpackc.low %vm2343_vm15, %vm2341_vm9  ;;  %vm2348_vm15 = vcmp.eq.s32.totalorder %v7455_v53, %v6142_v57 }
 0x28c   : > { %3692 = vmatpush1.bf16.msk.msra.mxu1 %vm3691_vm4, %v3937_v38  ;;  %vm2342_vm4 = vcmp.eq.s32.totalorder %v7447_v0, %v6142_v57  ;;  %v7563_v0 = vld [vmem:[#allocation33_spill] sm:$0xff] }
 0x28d   : > { %3694 = vmatprep.subr.msk.bf16.mxu1 %vm3693_vm8, %v3937_v38  ;;  %vm2345_vm8 = vcmp.eq.s32.totalorder %v7449_v37, %v6148_v22  ;;  %vm3703_vm2 = vmpackc.low %vm2342_vm4, %vm2340_vm12  ;;  %vm2355_vm12 = vcmp.eq.s32.totalorder %v7461_v62, %v6148_v22  ;;  %v447_v37 = vld [vmem:[%s6766_s2 + $0x88] sm:$0xff] }
 0x28e   : > { %vm3705_vm5 = vmpackc.low %vm2347_vm11, %vm2345_vm8  ;;  %vm2352_vm11 = vcmp.eq.s32.totalorder %v7459_v54, %v6142_v57 }
 0x290   : > { %3696 = vmatpush1.bf16.msk.msra.mxu1 %vm3695_vm0, %v3937_v38  ;;  %vm2346_vm0 = vcmp.eq.s32.totalorder %v7452_v12, %v6142_v57  ;;  %v446_v12 = vld [vmem:[%s6766_s2 + $0x80] sm:$0xff] }
 0x291   : > { %3698 = vmatprep.subr.msk.bf16.mxu1 %vm3697_vm1, %v3937_v38  ;;  %vm2349_vm1 = vcmp.eq.s32.totalorder %v7455_v53, %v6148_v22  ;;  %vm3707_vm3 = vmpackc.low %vm2346_vm0, %vm2344_vm6  ;;  %vm2359_vm6 = vcmp.eq.s32.totalorder %v7466_v34, %v6148_v22  ;;  %v7564_v53 = vld [vmem:[#allocation37_spill] sm:$0xff] }
 0x292   : > { %vm3709_vm9 = vmpackc.low %vm2351_vm14, %vm2349_vm1  ;;  %vm2356_vm14 = vcmp.eq.s32.totalorder %v7464_v32, %v6142_v57 }
 0x294   : > { %3700 = vmatpush1.bf16.msk.msra.mxu1 %vm3699_vm13, %v3937_v38  ;;  %vm2350_vm13 = vcmp.eq.s32.totalorder %v7457_v20, %v6142_v57  ;;  %v7565_v20 = vld [vmem:[#allocation43_spill] sm:$0xff] }
 0x295   : > { %3702 = vmatprep.subr.msk.bf16.mxu1 %vm3701_vm7, %v3937_v38  ;;  %vm2353_vm7 = vcmp.eq.s32.totalorder %v7459_v54, %v6148_v22  ;;  %vm3711_vm4 = vmpackc.low %vm2350_vm13, %vm2348_vm15  ;;  %vm2363_vm15 = vcmp.eq.s32.totalorder %v7470_v52, %v6148_v22  ;;  %v451_v54 = vld [vmem:[%s6766_s2 + $0xa8] sm:$0xff] }
 0x296   : > { %vm3713_vm8 = vmpackc.low %vm2355_vm12, %vm2353_vm7  ;;  %vm2360_vm12 = vcmp.eq.s32.totalorder %v7468_v45, %v6142_v57 }
 0x298   : > { %3704 = vmatpush1.bf16.msk.msra.mxu1 %vm3703_vm2, %v3937_v38  ;;  %vm2354_vm2 = vcmp.eq.s32.totalorder %v7461_v62, %v6142_v57  ;;  %v450_v62 = vld [vmem:[%s6766_s2 + $0xa0] sm:$0xff] }
 0x299   : > { %3706 = vmatprep.subr.msk.bf16.mxu1 %vm3705_vm5, %v3937_v38  ;;  %vm2357_vm5 = vcmp.eq.s32.totalorder %v7464_v32, %v6148_v22  ;;  %vm3715_vm0 = vmpackc.low %vm2354_vm2, %vm2352_vm11  ;;  %vm2367_vm11 = vcmp.eq.s32.totalorder %v7342_v58, %v6148_v22  ;;  %v7566_v32 = vld [vmem:[#allocation45_spill] sm:$0xff] }
 0x29a   : > { %vm3717_vm1 = vmpackc.low %vm2359_vm6, %vm2357_vm5  ;;  %vm2364_vm6 = vcmp.eq.s32.totalorder %v5369_v49, %v6142_v57 }
 0x29c   : > { %3708 = vmatpush1.bf16.msk.msra.mxu1 %vm3707_vm3, %v3937_v38  ;;  %vm2358_vm3 = vcmp.eq.s32.totalorder %v7466_v34, %v6142_v57  ;;  %v7567_v34 = vld [vmem:[#allocation51_spill] sm:$0xff] }
 0x29d   : > { %3710 = vmatprep.subr.msk.bf16.mxu1 %vm3709_vm9, %v3937_v38  ;;  %vm2361_vm9 = vcmp.eq.s32.totalorder %v7468_v45, %v6148_v22  ;;  %vm3719_vm13 = vmpackc.low %vm2358_vm3, %vm2356_vm14  ;;  %vm2371_vm14 = vcmp.eq.s32.totalorder %v7349_v17, %v6148_v22  ;;  %v455_v45 = vld [vmem:[%s6766_s2 + $0xc8] sm:$0xff] }
 0x29e   : > { %vm3721_vm7 = vmpackc.low %vm2363_vm15, %vm2361_vm9  ;;  %vm2368_vm15 = vcmp.eq.s32.totalorder %v5375_v51, %v6142_v57 }
 0x2a0   : > { %3712 = vmatpush1.bf16.msk.msra.mxu1 %vm3711_vm4, %v3937_v38  ;;  %vm2362_vm4 = vcmp.eq.s32.totalorder %v7470_v52, %v6142_v57  ;;  %v454_v52 = vld [vmem:[%s6766_s2 + $0xc0] sm:$0xff] }
 0x2a1   : > { %3714 = vmatprep.subr.msk.bf16.mxu1 %vm3713_vm8, %v3937_v38  ;;  %vm2365_vm8 = vcmp.eq.s32.totalorder %v5369_v49, %v6148_v22  ;;  %vm3723_vm2 = vmpackc.low %vm2362_vm4, %vm2360_vm12  ;;  %vm2375_vm12 = vcmp.eq.s32.totalorder %v7477_v2, %v6148_v22  ;;  %v439_v49 = vld [vmem:[%s6766_s2 + $0x48] sm:$0xff] }
 0x2a2   : > { %vm3725_vm5 = vmpackc.low %vm2367_vm11, %vm2365_vm8  ;;  %vm2372_vm11 = vcmp.eq.s32.totalorder %v5617_v28, %v6142_v57 }
 0x2a4   : > { %3716 = vmatpush1.bf16.msk.msra.mxu1 %vm3715_vm0, %v3937_v38  ;;  %vm2366_vm0 = vcmp.eq.s32.totalorder %v7342_v58, %v6142_v57  ;;  %v7562_v58 = vld [vmem:[#allocation29_spill] sm:$0xff] }
 0x2a5   : > { %3718 = vmatprep.subr.msk.bf16.mxu1 %vm3717_vm1, %v3937_v38  ;;  %vm2369_vm1 = vcmp.eq.s32.totalorder %v5375_v51, %v6148_v22  ;;  %vm3727_vm3 = vmpackc.low %vm2366_vm0, %vm2364_vm6  ;;  %vm2379_vm6 = vcmp.eq.s32.totalorder %v7483_v23, %v6148_v22  ;;  %v7559_v51 = vld [vmem:[#allocation23_spill] sm:$0xff] }
 0x2a6   : > { %vm3729_vm9 = vmpackc.low %vm2371_vm14, %vm2369_vm1  ;;  %vm2376_vm14 = vcmp.eq.s32.totalorder %v7480_v50, %v6142_v57 }
 0x2a8   : > { %3720 = vmatpush1.bf16.msk.msra.mxu1 %vm3719_vm13, %v3937_v38  ;;  %vm2370_vm13 = vcmp.eq.s32.totalorder %v7349_v17, %v6142_v57  ;;  %v443_v17 = vld [vmem:[%s6766_s2 + $0x68] sm:$0xff] }
 0x2a9   : > { %3722 = vmatprep.subr.msk.bf16.mxu1 %vm3721_vm7, %v3937_v38  ;;  %vm2373_vm7 = vcmp.eq.s32.totalorder %v5617_v28, %v6148_v22  ;;  %vm3731_vm4 = vmpackc.low %vm2370_vm13, %vm2368_vm15  ;;  %vm2383_vm15 = vcmp.eq.s32.totalorder %v7489_v36, %v6148_v22  ;;  %v442_v28 = vld [vmem:[%s6766_s2 + $0x60] sm:$0xff] }
 0x2aa   : > { %vm3733_vm8 = vmpackc.low %vm2375_vm12, %vm2373_vm7  ;;  %vm2380_vm12 = vcmp.eq.s32.totalorder %v7486_v10, %v6142_v57 }
 0x2ac   : > { %3724 = vmatpush1.bf16.msk.msra.mxu1 %vm3723_vm2, %v3937_v38  ;;  %vm2374_vm2 = vcmp.eq.s32.totalorder %v7477_v2, %v6142_v57  ;;  %v7568_v2 = vld [vmem:[#allocation53_spill] sm:$0xff] }
 0x2ad   : > { %3726 = vmatprep.subr.msk.bf16.mxu1 %vm3725_vm5, %v3937_v38  ;;  %vm2377_vm5 = vcmp.eq.s32.totalorder %v7480_v50, %v6148_v22  ;;  %vm3735_vm0 = vmpackc.low %vm2374_vm2, %vm2372_vm11  ;;  %vm2387_vm11 = vcmp.eq.s32.totalorder %v7559_v51, %v6148_v22  ;;  %v7569_v50 = vld [vmem:[#allocation55_spill] sm:$0xff] }
 0x2ae   : > { %vm3737_vm1 = vmpackc.low %vm2379_vm6, %vm2377_vm5  ;;  %vm2384_vm6 = vcmp.eq.s32.totalorder %v7558_v59, %v6142_v57 }
 0x2b0   : > { %3728 = vmatpush1.bf16.msk.msra.mxu1 %vm3727_vm3, %v3937_v38  ;;  %vm2378_vm3 = vcmp.eq.s32.totalorder %v7483_v23, %v6142_v57  ;;  %v459_v23 = vld [vmem:[%s6766_s2 + $0xe8] sm:$0xff] }
 0x2b1   : > { %3730 = vmatprep.subr.msk.bf16.mxu1 %vm3729_vm9, %v3937_v38  ;;  %vm2381_vm9 = vcmp.eq.s32.totalorder %v7486_v10, %v6148_v22  ;;  %vm3739_vm13 = vmpackc.low %vm2378_vm3, %vm2376_vm14  ;;  %vm2391_vm14 = vcmp.eq.s32.totalorder %v7561_v21, %v6148_v22  ;;  %v458_v10 = vld [vmem:[%s6766_s2 + $0xe0] sm:$0xff] }
 0x2b2   : > { %vm3741_vm7 = vmpackc.low %vm2383_vm15, %vm2381_vm9  ;;  %vm2388_vm15 = vcmp.eq.s32.totalorder %v7560_v43, %v6142_v57 }
 0x2b4   : > { %3732 = vmatpush1.bf16.msk.msra.mxu1 %vm3731_vm4, %v3937_v38  ;;  %vm2382_vm4 = vcmp.eq.s32.totalorder %v7489_v36, %v6142_v57  ;;  %v7570_v36 = vld [vmem:[#allocation2_spill] sm:$0xff] }
 0x2b5   : > { %3734 = vmatprep.subr.msk.bf16.mxu1 %vm3733_vm8, %v3937_v38  ;;  %vm2385_vm8 = vcmp.eq.s32.totalorder %v7558_v59, %v6148_v22  ;;  %vm3743_vm2 = vmpackc.low %vm2382_vm4, %vm2380_vm12  ;;  %vm2395_vm12 = vcmp.eq.s32.totalorder %v7563_v0, %v6148_v22  ;;  %v456_v59 = vld [vmem:[%s6766_s2 + $0xd0] sm:$0xff] }
 0x2b6   : > { %vm3745_vm5 = vmpackc.low %vm2387_vm11, %vm2385_vm8  ;;  %vm2392_vm11 = vcmp.eq.s32.totalorder %v7562_v58, %v6142_v57 }
 0x2b8   : > { %3736 = vmatpush1.bf16.msk.msra.mxu1 %vm3735_vm0, %v3937_v38  ;;  %vm2386_vm0 = vcmp.eq.s32.totalorder %v7559_v51, %v6142_v57  ;;  %v461_v51 = vld [vmem:[%s6766_s2 + $0xf8] sm:$0xff] }
 0x2b9   : > { %3738 = vmatprep.subr.msk.bf16.mxu1 %vm3737_vm1, %v3937_v38  ;;  %vm2389_vm1 = vcmp.eq.s32.totalorder %v7560_v43, %v6148_v22  ;;  %vm3747_vm3 = vmpackc.low %vm2386_vm0, %vm2384_vm6  ;;  %vm2399_vm6 = vcmp.eq.s32.totalorder %v7565_v20, %v6148_v22  ;;  %v464_v43 = vld [vmem:[%s6766_s2 + $0x110] sm:$0xff] }
 0x2ba   : > { %vm3749_vm9 = vmpackc.low %vm2391_vm14, %vm2389_vm1  ;;  %vm2396_vm14 = vcmp.eq.s32.totalorder %v7564_v53, %v6142_v57 }
 0x2bb   : > { %2761 = vmatmul.mubr.f32.vlgmr.msra.gmra.mrb[32].mxu1 %v430_v31  ;;  %v453_v31 = vld [vmem:[%s6766_s2 + $0xb8] sm:$0xff] }
 0x2bc   : > { %3740 = vmatpush1.bf16.msk.msra.mxu1 %vm3739_vm13, %v3937_v38  ;;  %2766 = vmatprep.mubr.f32.mxu1 %v435_v5  ;;  %vm2390_vm13 = vcmp.eq.s32.totalorder %v7561_v21, %v6142_v57  ;;  %v452_v5 = vld [vmem:[%s6766_s2 + $0xb0] sm:$0xff]  ;;  %v469_v21 = vld [vmem:[%s6766_s2 + $0x138] sm:$0xff] }
 0x2bd   : > { %3742 = vmatprep.subr.msk.bf16.mxu1 %vm3741_vm7, %v3937_v38  ;;  %vm2393_vm7 = vcmp.eq.s32.totalorder %v7562_v58, %v6148_v22  ;;  %vm3751_vm4 = vmpackc.low %vm2390_vm13, %vm2388_vm15  ;;  %vm2403_vm15 = vcmp.eq.s32.totalorder %v7567_v34, %v6148_v22  ;;  %v472_v58 = vld [vmem:[%s6766_s2 + $0x150] sm:$0xff] }
 0x2be   : > { %vm3753_vm8 = vmpackc.low %vm2395_vm12, %vm2393_vm7  ;;  %vm2400_vm12 = vcmp.eq.s32.totalorder %v7566_v32, %v6142_v57 }
 0x2bf   : > { %2767 = vmatmul.mubr.f32.gmra.mrb[34].mxu1 %v434_v40  ;;  %v457_v40 = vld [vmem:[%s6766_s2 + $0xd8] sm:$0xff] }
 0x2c0   : > { %3744 = vmatpush1.bf16.msk.msra.mxu1 %vm3743_vm2, %v3937_v38  ;;  %2772 = vmatprep.mubr.f32.mxu1 %v439_v49  ;;  %vm2394_vm2 = vcmp.eq.s32.totalorder %v7563_v0, %v6142_v57  ;;  %v460_v49 = vld [vmem:[%s6766_s2 + $0xf0] sm:$0xff]  ;;  %v477_v0 = vld [vmem:[%s6766_s2 + $0x178] sm:$0xff] }
 0x2c1   : > { %3746 = vmatprep.subr.msk.bf16.mxu1 %vm3745_vm5, %v3937_v38  ;;  %vm2397_vm5 = vcmp.eq.s32.totalorder %v7564_v53, %v6148_v22  ;;  %vm3755_vm0 = vmpackc.low %vm2394_vm2, %vm2392_vm11  ;;  %vm2407_vm11 = vcmp.eq.s32.totalorder %v7569_v50, %v6148_v22  ;;  %v480_v53 = vld [vmem:[%s6766_s2 + $0x190] sm:$0xff] }
 0x2c2   : > { %vm3757_vm1 = vmpackc.low %vm2399_vm6, %vm2397_vm5  ;;  %vm2404_vm6 = vcmp.eq.s32.totalorder %v7568_v2, %v6142_v57 }
 0x2c3   : > { %2773 = vmatmul.mubr.f32.gmra.mrb[36].mxu1 %v438_v4  ;;  %v465_v4 = vld [vmem:[%s6766_s2 + $0x118] sm:$0xff] }
 0x2c4   : > { %3748 = vmatpush1.bf16.msk.msra.mxu1 %vm3747_vm3, %v3937_v38  ;;  %2778 = vmatprep.mubr.f32.mxu1 %v443_v17  ;;  %vm2398_vm3 = vcmp.eq.s32.totalorder %v7565_v20, %v6142_v57  ;;  %v468_v17 = vld [vmem:[%s6766_s2 + $0x130] sm:$0xff]  ;;  %v485_v20 = vld [vmem:[%s6766_s2 + $0x1b8] sm:$0xff] }
 0x2c5   : > { %3750 = vmatprep.subr.msk.bf16.mxu1 %vm3749_vm9, %v3937_v38  ;;  %vm2401_vm9 = vcmp.eq.s32.totalorder %v7566_v32, %v6148_v22  ;;  %vm3759_vm13 = vmpackc.low %vm2398_vm3, %vm2396_vm14  ;;  %vm2411_vm14 = vcmp.eq.s32.totalorder %v7570_v36, %v6148_v22  ;;  %v488_v32 = vld [vmem:[%s6766_s2 + $0x1d0] sm:$0xff] }
 0x2c6   : > { %vm3761_vm7 = vmpackc.low %vm2403_vm15, %vm2401_vm9  ;;  %vm2408_vm15 = vcmp.eq.s32.totalorder %v7535_v55, %v6142_v57 }
 0x2c7   : > { %2779 = vmatmul.mubr.f32.gmra.mrb[38].mxu1 %v442_v28  ;;  %v473_v28 = vld [vmem:[%s6766_s2 + $0x158] sm:$0xff] }
 0x2c8   : > { %3752 = vmatpush1.bf16.msk.msra.mxu1 %vm3751_vm4, %v3937_v38  ;;  %2784 = vmatprep.mubr.f32.mxu1 %v447_v37  ;;  %vm2402_vm4 = vcmp.eq.s32.totalorder %v7567_v34, %v6142_v57  ;;  %v476_v37 = vld [vmem:[%s6766_s2 + $0x170] sm:$0xff]  ;;  %v493_v34 = vld [vmem:[%s6766_s2 + $0x1f8] sm:$0xff] }
 0x2c9   : > { %3754 = vmatprep.subr.msk.bf16.mxu1 %vm3753_vm8, %v3937_v38  ;;  %vm2405_vm8 = vcmp.eq.s32.totalorder %v7568_v2, %v6148_v22  ;;  %vm3763_vm2 = vmpackc.low %vm2402_vm4, %vm2400_vm12  ;;  %vm2415_vm12 = vcmp.eq.s32.totalorder %v7572_v60, %v6148_v22 }
 0x2ca   : > { %vm3765_vm5 = vmpackc.low %vm2407_vm11, %vm2405_vm8  ;;  %vm2412_vm11 = vcmp.eq.s32.totalorder %v7571_v39, %v6142_v57 }
 0x2cb   : > { %2785 = vmatmul.mubr.f32.gmra.mrb[40].mxu1 %v446_v12  ;;  %v481_v12 = vld [vmem:[%s6766_s2 + $0x198] sm:$0xff] }
 0x2cc   : > { %3756 = vmatpush1.bf16.msk.msra.mxu1 %vm3755_vm0, %v3937_v38  ;;  %2790 = vmatprep.mubr.f32.mxu1 %v451_v54  ;;  %vm2406_vm0 = vcmp.eq.s32.totalorder %v7569_v50, %v6142_v57  ;;  %v484_v54 = vld [vmem:[%s6766_s2 + $0x1b0] sm:$0xff]  ;;  %v3879_v50 = vld [vmem:[%s4002_s28] sm:$0xff] }
 0x2cd   : > { %3758 = vmatprep.subr.msk.bf16.mxu1 %vm3757_vm1, %v3937_v38  ;;  %vm2409_vm1 = vcmp.eq.s32.totalorder %v7535_v55, %v6148_v22  ;;  %vm3767_vm3 = vmpackc.low %vm2406_vm0, %vm2404_vm6  ;;  %v466_v55 = vld [vmem:[%s6766_s2 + $0x120] sm:$0xff]  ;;  %vm2419_vm6 = vcmp.eq.s32.totalorder %v7574_v3, %v6148_v22 }
 0x2ce   : > { %vm3769_vm9 = vmpackc.low %vm2411_vm14, %vm2409_vm1  ;;  %vm2416_vm14 = vcmp.eq.s32.totalorder %v7573_v1, %v6142_v57 }
 0x2cf   : > { %2791 = vmatmul.mubr.f32.gmra.mrb[42].mxu1 %v450_v62  ;;  %v489_v62 = vld [vmem:[%s6766_s2 + $0x1d8] sm:$0xff] }
 0x2d0   : > { %3760 = vmatpush1.bf16.msk.msra.mxu1 %vm3759_vm13, %v3937_v38  ;;  %2796 = vmatprep.mubr.f32.mxu1 %v455_v45  ;;  %vm2410_vm13 = vcmp.eq.s32.totalorder %v7570_v36, %v6142_v57  ;;  %v492_v45 = vld [vmem:[%s6766_s2 + $0x1f0] sm:$0xff] }
 0x2d1   : > { %3762 = vmatprep.subr.msk.bf16.mxu1 %vm3761_vm7, %v3937_v38  ;;  %vm2413_vm7 = vcmp.eq.s32.totalorder %v7571_v39, %v6148_v22  ;;  %vm3771_vm4 = vmpackc.low %vm2410_vm13, %vm2408_vm15  ;;  %vm2423_vm15 = vcmp.eq.s32.totalorder %v7575_v47, %v6148_v22 }
 0x2d2   : > { %vm3773_vm8 = vmpackc.low %vm2415_vm12, %vm2413_vm7  ;;  %vm2420_vm12 = vcmp.eq.s32.totalorder %v7545_v18, %v6142_v57 }
 0x2d3   : > { %2797 = vmatmul.mubr.f32.gmra.mrb[44].mxu1 %v454_v52 }
 0x2d4   : > { %3764 = vmatpush1.bf16.msk.msra.mxu1 %vm3763_vm2, %v3937_v38  ;;  %2802 = vmatprep.mubr.f32.mxu1 %v459_v23  ;;  %vm2414_vm2 = vcmp.eq.s32.totalorder %v7572_v60, %v6142_v57 }
 0x2d5   : > { %3766 = vmatprep.subr.msk.bf16.mxu1 %vm3765_vm5, %v3937_v38  ;;  %vm2417_vm5 = vcmp.eq.s32.totalorder %v7573_v1, %v6148_v22  ;;  %vm3775_vm0 = vmpackc.low %vm2414_vm2, %vm2412_vm11  ;;  %vm2427_vm11 = vcmp.eq.s32.totalorder %v7549_v61, %v6148_v22 }
 0x2d6   : > { %vm3777_vm1 = vmpackc.low %vm2419_vm6, %vm2417_vm5  ;;  %vm2424_vm6 = vcmp.eq.s32.totalorder %v7548_v46, %v6142_v57 }
 0x2d7   : > { %2803 = vmatmul.mubr.f32.gmra.mrb[46].mxu1 %v458_v10  ;;  %v3880_v10 = vld [vmem:[%s4002_s28 + $0x8] sm:$0xff] }
 0x2d8   : > { %3768 = vmatpush1.bf16.msk.msra.mxu1 %vm3767_vm3, %v3937_v38  ;;  %2808 = vmatprep.mubr.f32.mxu1 %v463_v63  ;;  %vm2418_vm3 = vcmp.eq.s32.totalorder %v7574_v3, %v6142_v57 }
 0x2d9   : > { %3770 = vmatprep.subr.msk.bf16.mxu1 %vm3769_vm9, %v3937_v38  ;;  %vm2421_vm9 = vcmp.eq.s32.totalorder %v7545_v18, %v6148_v22  ;;  %vm3779_vm13 = vmpackc.low %vm2418_vm3, %vm2416_vm14  ;;  %v478_v18 = vld [vmem:[%s6766_s2 + $0x180] sm:$0xff]  ;;  %vm2431_vm14 = vcmp.eq.s32.totalorder %v7553_v26, %v6148_v22 }
 0x2da   : > { %vm3781_vm7 = vmpackc.low %vm2423_vm15, %vm2421_vm9  ;;  %vm2428_vm15 = vcmp.eq.s32.totalorder %v7576_v15, %v6142_v57 }
 0x2db   : > { %2809 = vmatmul.mubr.f32.gmra.mrb[48].mxu1 %v462_v30  ;;  %v3881_v30 = vld [vmem:[%s4002_s28 + $0x10] sm:$0xff] }
 0x2dc   : > { %3772 = vmatpush1.bf16.msk.msra.mxu1 %vm3771_vm4, %v3937_v38  ;;  %2814 = vmatprep.mubr.f32.mxu1 %v467_v19  ;;  %vm2422_vm4 = vcmp.eq.s32.totalorder %v7575_v47, %v6142_v57  ;;  %v3882_v19 = vld [vmem:[%s4002_s28 + $0x18] sm:$0xff] }
 0x2dd   : > { %3774 = vmatprep.subr.msk.bf16.mxu1 %vm3773_vm8, %v3937_v38  ;;  %vm2425_vm8 = vcmp.eq.s32.totalorder %v7548_v46, %v6148_v22  ;;  %vm3783_vm2 = vmpackc.low %vm2422_vm4, %vm2420_vm12  ;;  %v482_v46 = vld [vmem:[%s6766_s2 + $0x1a0] sm:$0xff]  ;;  %vm2435_vm12 = vcmp.eq.s32.totalorder %v7578_v56, %v6148_v22 }
 0x2de   : > { %vm3785_vm5 = vmpackc.low %vm2427_vm11, %vm2425_vm8 }
 0x2df   : > { %2815 = vmatmul.mubr.f32.gmra.mrb[50].mxu1 %v466_v55 }
 0x2e0   : > { %3776 = vmatpush1.bf16.msk.msra.mxu1 %vm3775_vm0, %v3937_v38  ;;  %2820 = vmatprep.mubr.f32.mxu1 %v471_v9  ;;  %vm2426_vm0 = vcmp.eq.s32.totalorder %v7549_v61, %v6142_v57  ;;  %v7577_v61 = vld [vmem:[#allocation42_spill] sm:$0xff] }
 0x2e1   : > { %3778 = vmatprep.subr.msk.bf16.mxu1 %vm3777_vm1, %v3937_v38  ;;  %vm2429_vm1 = vcmp.eq.s32.totalorder %v7576_v15, %v6148_v22  ;;  %vm3787_vm3 = vmpackc.low %vm2426_vm0, %vm2424_vm6  ;;  %vm2432_vm11 = vcmp.eq.s32.totalorder %v7577_v61, %v6142_v57  ;;  %vm2439_vm6 = vcmp.eq.s32.totalorder %v7427_v48, %v6148_v22 }
 0x2e2   : > { %vm3789_vm9 = vmpackc.low %vm2431_vm14, %vm2429_vm1  ;;  %vm2436_vm14 = vcmp.eq.s32.totalorder %v7426_v42, %v6142_v57 }
 0x2e3   : > { %2821 = vmatmul.mubr.f32.gmra.mrb[52].mxu1 %v470_v6 }
 0x2e4   : > { %3780 = vmatpush1.bf16.msk.msra.mxu1 %vm3779_vm13, %v3937_v38  ;;  %2826 = vmatprep.mubr.f32.mxu1 %v475_v14  ;;  %vm2430_vm13 = vcmp.eq.s32.totalorder %v7553_v26, %v6142_v57  ;;  %v486_v26 = vld [vmem:[%s6766_s2 + $0x1c0] sm:$0xff] }
 0x2e5   : > { %3782 = vmatprep.subr.msk.bf16.mxu1 %vm3781_vm7, %v3937_v38  ;;  %vm2433_vm7 = vcmp.eq.s32.totalorder %v7577_v61, %v6148_v22  ;;  %vm3791_vm4 = vmpackc.low %vm2430_vm13, %vm2428_vm15 }
 0x2e6   : > { %vm3793_vm8 = vmpackc.low %vm2435_vm12, %vm2433_vm7 }
 0x2e7   : > { %2827 = vmatmul.mubr.f32.gmra.mrb[54].mxu1 %v474_v27  ;;  %v3883_v27 = vld [vmem:[%s4002_s28 + $0x20] sm:$0xff] }
 0x2e8   : > { %3784 = vmatpush1.bf16.msk.msra.mxu1 %vm3783_vm2, %v3937_v38  ;;  %2832 = vmatprep.mubr.f32.mxu1 %v479_v8  ;;  %vm2434_vm2 = vcmp.eq.s32.totalorder %v7578_v56, %v6142_v57 }
 0x2e9   : > { %3786 = vmatprep.subr.msk.bf16.mxu1 %vm3785_vm5, %v3937_v38  ;;  %vm2437_vm5 = vcmp.eq.s32.totalorder %v7426_v42, %v6148_v22  ;;  %vm3795_vm0 = vmpackc.low %vm2434_vm2, %vm2432_vm11  ;;  %v433_v22 = vld [vmem:[%s6766_s2 + $0x18] sm:$0xff] }
 0x2ea   : > { %vm3797_vm1 = vmpackc.low %vm2439_vm6, %vm2437_vm5  ;;  %v437_v42 = vld [vmem:[%s6766_s2 + $0x38] sm:$0xff] }
 0x2eb   : > { %2833 = vmatmul.mubr.f32.gmra.mrb[56].mxu1 %v478_v18 }
 0x2ec   : > { %3788 = vmatpush1.bf16.msk.msra.mxu1 %vm3787_vm3, %v3937_v38  ;;  %2838 = vmatprep.mubr.f32.mxu1 %v483_v33  ;;  %vm2438_vm3 = vcmp.eq.s32.totalorder %v7427_v48, %v6142_v57  ;;  %v436_v48 = vld [vmem:[%s6766_s2 + $0x30] sm:$0xff]  ;;  %v441_v57 = vld [vmem:[%s6766_s2 + $0x58] sm:$0xff]  ;;  %v3884_v33 = vld [vmem:[%s4002_s28 + $0x28] sm:$0xff] }
 0x2ed   : > { %3790 = vmatprep.subr.msk.bf16.mxu1 %vm3789_vm9, %v3937_v38  ;;  %vm3799_vm9 = vmpackc.low %vm2438_vm3, %vm2436_vm14 }
 0x2ef   : > { %2839 = vmatmul.mubr.f32.gmra.mrb[58].mxu1 %v482_v46 }
 0x2f0   : > { %3792 = vmatpush1.bf16.msk.msra.mxu1 %vm3791_vm4, %v3937_v38  ;;  %2844 = vmatprep.mubr.f32.mxu1 %v487_v29 }
 0x2f1   : > { %3794 = vmatprep.subr.msk.bf16.mxu1 %vm3793_vm8, %v3937_v38 }
 0x2f3   : > { %2845 = vmatmul.mubr.f32.gmra.mrb[60].mxu1 %v486_v26 }
 0x2f4   : > { %3796 = vmatpush1.bf16.msk.msra.mxu1 %vm3795_vm0, %v3937_v38  ;;  %2850 = vmatprep.mubr.f32.mxu1 %v491_v41  ;;  %v3885_v41 = vld [vmem:[%s4002_s28 + $0x30] sm:$0xff] }
 0x2f5   : > { %3798 = vmatprep.subr.msk.bf16.mxu1 %vm3797_vm1, %v3937_v38 }
 0x2f7   : > { %2851 = vmatmul.mubr.f32.gmra.mrb[62].mxu1 %v490_v16 }
 0x2f8   : > { %3800 = vmatpush1.bf16.msk.msra.mxu1 %vm3799_vm9, %v3937_v38  ;;  %2921 = vmatprep.mubr.f32.mxu1 %v433_v22  ;;  %v440_v38 = vld [vmem:[%s6766_s2 + $0x50] sm:$0xff] }
 0x2fb   : > { %2922 = vmatmul.mubr.f32.vlgmr.msra.gmra.mrb[32].mxu1 %v432_v35 }
 0x2fc   : > { %2927 = vmatprep.mubr.f32.mxu1 %v437_v42  ;;  %v3886_v42 = vld [vmem:[%s4002_s28 + $0x38] sm:$0xff] }
 0x2ff   : > { %2928 = vmatmul.mubr.f32.gmra.mrb[34].mxu1 %v436_v48 }
 0x300   : > { %2933 = vmatprep.mubr.f32.mxu1 %v441_v57 }
 0x303   : > { %2934 = vmatmul.mubr.f32.gmra.mrb[36].mxu1 %v440_v38 }
 0x304   : > { %2939 = vmatprep.mubr.f32.mxu1 %v445_v24 }
 0x307   : > { %2940 = vmatmul.mubr.f32.gmra.mrb[38].mxu1 %v444_v13 }
 0x308   : > { %2945 = vmatprep.mubr.f32.mxu1 %v449_v7  ;;  %v3887_v7 = vld [vmem:[%s4002_s28 + $0x40] sm:$0xff] }
 0x30b   : > { %2946 = vmatmul.mubr.f32.gmra.mrb[40].mxu1 %v448_v11 }
 0x30c   : > { %2951 = vmatprep.mubr.f32.mxu1 %v453_v31 }
 0x30f   : > { %2952 = vmatmul.mubr.f32.gmra.mrb[42].mxu1 %v452_v5 }
 0x310   : > { %2957 = vmatprep.mubr.f32.mxu1 %v457_v40  ;;  %v3888_v40 = vld [vmem:[%s4002_s28 + $0x48] sm:$0xff] }
 0x313   : > { %2958 = vmatmul.mubr.f32.gmra.mrb[44].mxu1 %v456_v59 }
 0x314   : > { %2963 = vmatprep.mubr.f32.mxu1 %v461_v51 }
 0x317   : > { %2964 = vmatmul.mubr.f32.gmra.mrb[46].mxu1 %v460_v49 }
 0x318   : > { %2969 = vmatprep.mubr.f32.mxu1 %v465_v4 }
 0x31b   : > { %2970 = vmatmul.mubr.f32.gmra.mrb[48].mxu1 %v464_v43 }
 0x31c   : > { %2975 = vmatprep.mubr.f32.mxu1 %v469_v21  ;;  %v3889_v21 = vld [vmem:[%s4002_s28 + $0x50] sm:$0xff] }
 0x31f   : > { %2976 = vmatmul.mubr.f32.gmra.mrb[50].mxu1 %v468_v17 }
 0x320   : > { %2981 = vmatprep.mubr.f32.mxu1 %v473_v28 }
 0x323   : > { %2982 = vmatmul.mubr.f32.gmra.mrb[52].mxu1 %v472_v58 }
 0x324   : > { %2987 = vmatprep.mubr.f32.mxu1 %v477_v0  ;;  %v3890_v0 = vld [vmem:[%s4002_s28 + $0x58] sm:$0xff] }
 0x327   : > { %2988 = vmatmul.mubr.f32.gmra.mrb[54].mxu1 %v476_v37 }
 0x328   : > { %2993 = vmatprep.mubr.f32.mxu1 %v481_v12 }
 0x32b   : > { %2994 = vmatmul.mubr.f32.gmra.mrb[56].mxu1 %v480_v53 }
 0x32c   : > { %2999 = vmatprep.mubr.f32.mxu1 %v485_v20 }
 0x32f   : > { %3000 = vmatmul.mubr.f32.gmra.mrb[58].mxu1 %v484_v54 }
 0x330   : > { %3005 = vmatprep.mubr.f32.mxu1 %v489_v62  ;;  %v3891_v62 = vld [vmem:[%s4002_s28 + $0x60] sm:$0xff] }
 0x333   : > { %3006 = vmatmul.mubr.f32.gmra.mrb[60].mxu1 %v488_v32 }
 0x334   : > { %3011 = vmatprep.mubr.f32.mxu1 %v493_v34 }
 0x337   : > { %3012 = vmatmul.mubr.f32.gmra.mrb[62].mxu1 %v492_v45 }
 0x3ce   : > { %v2923_v52 = vpop.f32.mrb[32].mxu1 }
 0x3cf   : > { %3018 = vst [vmem:[%s6680_s30] sm:$0xff] %v2923_v52  ;;  %v2925_v2 = vpop.f32.mrb[33].mxu1  ;;  %v3070_v23 = vsub.f32 %v3879_v50, %v2923_v52  ;;  %v3892_v52 = vld [vmem:[%s4002_s28 + $0x68] sm:$0xff] }
 0x3d0   : > { %3019 = vst [vmem:[%s6680_s30 + $0x8] sm:$0xff] %v2925_v2  ;;  %v3071_v36 = vsub.f32 %v3880_v10, %v2925_v2 }
 0x3d1   : > { %v3102_v1 = vmul.f32 %v3070_v23, %v3070_v23 }
 0x3d2   : > { %v2929_v63 = vpop.f32.mrb[34].mxu1  ;;  %v3103_v9 = vmul.f32 %v3071_v36, %v3071_v36 }
 0x3d3   : > { %3020 = vst [vmem:[%s6680_s30 + $0x10] sm:$0xff] %v2929_v63  ;;  %v3072_v39 = vsub.f32 %v3881_v30, %v2929_v63  ;;  %v2931_v60 = vpop.f32.mrb[35].mxu1  ;;  %v3893_v63 = vld [vmem:[%s4002_s28 + $0x70] sm:$0xff] }
 0x3d4   : > { %3021 = vst [vmem:[%s6680_s30 + $0x18] sm:$0xff] %v2931_v60  ;;  %v3073_v55 = vsub.f32 %v3882_v19, %v2931_v60  ;;  %v3894_v19 = vld [vmem:[%s4002_s28 + $0x78] sm:$0xff] }
 0x3d5   : > { %v3104_v3 = vmul.f32 %v3072_v39, %v3072_v39 }
 0x3d6   : > { %v3105_v6 = vmul.f32 %v3073_v55, %v3073_v55  ;;  %v2935_v47 = vpop.f32.mrb[36].mxu1 }
 0x3d7   : > { %v3134_v14 = vadd.f32 %v3104_v3, %v3102_v1  ;;  %3022 = vst [vmem:[%s6680_s30 + $0x20] sm:$0xff] %v2935_v47  ;;  %v3074_v8 = vsub.f32 %v3883_v27, %v2935_v47  ;;  %v2937_v18 = vpop.f32.mrb[37].mxu1  ;;  %v3895_v47 = vld [vmem:[%s4002_s28 + $0x80] sm:$0xff] }
 0x3d8   : > { %v3155_v15 = vadd.f32 %v3105_v6, %v3103_v9  ;;  %3023 = vst [vmem:[%s6680_s30 + $0x28] sm:$0xff] %v2937_v18  ;;  %v3075_v46 = vsub.f32 %v3884_v33, %v2937_v18  ;;  %v3896_v18 = vld [vmem:[%s4002_s28 + $0x88] sm:$0xff] }
 0x3d9   : > { %v3106_v61 = vmul.f32 %v3074_v8, %v3074_v8 }
 0x3da   : > { %v3107_v56 = vmul.f32 %v3075_v46, %v3075_v46  ;;  %v2941_v29 = vpop.f32.mrb[38].mxu1 }
 0x3db   : > { %v3135_v26 = vadd.f32 %v3134_v14, %v3106_v61  ;;  %3024 = vst [vmem:[%s6680_s30 + $0x30] sm:$0xff] %v2941_v29  ;;  %v3076_v16 = vsub.f32 %v3885_v41, %v2941_v29  ;;  %v2943_v22 = vpop.f32.mrb[39].mxu1  ;;  %v3897_v29 = vld [vmem:[%s4002_s28 + $0x90] sm:$0xff] }
 0x3dc   : > { %v3156_v35 = vadd.f32 %v3155_v15, %v3107_v56  ;;  %3025 = vst [vmem:[%s6680_s30 + $0x38] sm:$0xff] %v2943_v22  ;;  %v3077_v48 = vsub.f32 %v3886_v42, %v2943_v22  ;;  %v3898_v22 = vld [vmem:[%s4002_s28 + $0x98] sm:$0xff] }
 0x3dd   : > { %v3108_v57 = vmul.f32 %v3076_v16, %v3076_v16 }
 0x3de   : > { %v3109_v38 = vmul.f32 %v3077_v48, %v3077_v48  ;;  %v2947_v24 = vpop.f32.mrb[40].mxu1 }
 0x3df   : > { %v3136_v13 = vadd.f32 %v3135_v26, %v3108_v57  ;;  %3026 = vst [vmem:[%s6680_s30 + $0x40] sm:$0xff] %v2947_v24  ;;  %v3078_v11 = vsub.f32 %v3887_v7, %v2947_v24  ;;  %v2949_v31 = vpop.f32.mrb[41].mxu1  ;;  %v3899_v24 = vld [vmem:[%s4002_s28 + $0xa0] sm:$0xff] }
 0x3e0   : > { %v3157_v5 = vadd.f32 %v3156_v35, %v3109_v38  ;;  %3027 = vst [vmem:[%s6680_s30 + $0x48] sm:$0xff] %v2949_v31  ;;  %v3079_v59 = vsub.f32 %v3888_v40, %v2949_v31  ;;  %v3900_v31 = vld [vmem:[%s4002_s28 + $0xa8] sm:$0xff] }
 0x3e1   : > { %v3110_v51 = vmul.f32 %v3078_v11, %v3078_v11 }
 0x3e2   : > { %v3111_v49 = vmul.f32 %v3079_v59, %v3079_v59  ;;  %v2953_v4 = vpop.f32.mrb[42].mxu1 }
 0x3e3   : > { %v3137_v43 = vadd.f32 %v3136_v13, %v3110_v51  ;;  %3028 = vst [vmem:[%s6680_s30 + $0x50] sm:$0xff] %v2953_v4  ;;  %v3080_v17 = vsub.f32 %v3889_v21, %v2953_v4  ;;  %v2955_v28 = vpop.f32.mrb[43].mxu1  ;;  %v3901_v4 = vld [vmem:[%s4002_s28 + $0xb0] sm:$0xff] }
 0x3e4   : > { %v3158_v58 = vadd.f32 %v3157_v5, %v3111_v49  ;;  %3029 = vst [vmem:[%s6680_s30 + $0x58] sm:$0xff] %v2955_v28  ;;  %v3081_v37 = vsub.f32 %v3890_v0, %v2955_v28  ;;  %v3902_v28 = vld [vmem:[%s4002_s28 + $0xb8] sm:$0xff] }
 0x3e5   : > { %v3112_v12 = vmul.f32 %v3080_v17, %v3080_v17 }
 0x3e6   : > { %v3113_v53 = vmul.f32 %v3081_v37, %v3081_v37  ;;  %v2959_v20 = vpop.f32.mrb[44].mxu1 }
 0x3e7   : > { %v3138_v54 = vadd.f32 %v3137_v43, %v3112_v12  ;;  %3030 = vst [vmem:[%s6680_s30 + $0x60] sm:$0xff] %v2959_v20  ;;  %v3082_v32 = vsub.f32 %v3891_v62, %v2959_v20  ;;  %v2961_v34 = vpop.f32.mrb[45].mxu1  ;;  %v3903_v20 = vld [vmem:[%s4002_s28 + $0xc0] sm:$0xff] }
 0x3e8   : > { %v3159_v45 = vadd.f32 %v3158_v58, %v3113_v53  ;;  %3031 = vst [vmem:[%s6680_s30 + $0x68] sm:$0xff] %v2961_v34  ;;  %v3083_v2 = vsub.f32 %v3892_v52, %v2961_v34  ;;  %v3904_v34 = vld [vmem:[%s4002_s28 + $0xc8] sm:$0xff] }
 0x3e9   : > { %v3114_v50 = vmul.f32 %v3082_v32, %v3082_v32 }
 0x3ea   : > { %v3115_v23 = vmul.f32 %v3083_v2, %v3083_v2  ;;  %v2965_v10 = vpop.f32.mrb[46].mxu1 }
 0x3eb   : > { %v3139_v36 = vadd.f32 %v3138_v54, %v3114_v50  ;;  %3032 = vst [vmem:[%s6680_s30 + $0x70] sm:$0xff] %v2965_v10  ;;  %v3084_v30 = vsub.f32 %v3893_v63, %v2965_v10  ;;  %v2967_v39 = vpop.f32.mrb[47].mxu1  ;;  %v3905_v10 = vld [vmem:[%s4002_s28 + $0xd0] sm:$0xff] }
 0x3ec   : > { %v3160_v60 = vadd.f32 %v3159_v45, %v3115_v23  ;;  %3033 = vst [vmem:[%s6680_s30 + $0x78] sm:$0xff] %v2967_v39  ;;  %v3085_v55 = vsub.f32 %v3894_v19, %v2967_v39  ;;  %v3906_v39 = vld [vmem:[%s4002_s28 + $0xd8] sm:$0xff] }
 0x3ed   : > { %v3116_v1 = vmul.f32 %v3084_v30, %v3084_v30 }
 0x3ee   : > { %v3117_v3 = vmul.f32 %v3085_v55, %v3085_v55  ;;  %v2971_v9 = vpop.f32.mrb[48].mxu1 }
 0x3ef   : > { %v3140_v6 = vadd.f32 %v3139_v36, %v3116_v1  ;;  %3034 = vst [vmem:[%s6680_s30 + $0x80] sm:$0xff] %v2971_v9  ;;  %v3086_v14 = vsub.f32 %v3895_v47, %v2971_v9  ;;  %v2973_v27 = vpop.f32.mrb[49].mxu1  ;;  %v3907_v9 = vld [vmem:[%s4002_s28 + $0xe0] sm:$0xff] }
 0x3f0   : > { %v3161_v8 = vadd.f32 %v3160_v60, %v3117_v3  ;;  %3035 = vst [vmem:[%s6680_s30 + $0x88] sm:$0xff] %v2973_v27  ;;  %v3087_v15 = vsub.f32 %v3896_v18, %v2973_v27  ;;  %v3908_v27 = vld [vmem:[%s4002_s28 + $0xe8] sm:$0xff] }
 0x3f1   : > { %v3118_v33 = vmul.f32 %v3086_v14, %v3086_v14 }
 0x3f2   : > { %v3119_v46 = vmul.f32 %v3087_v15, %v3087_v15  ;;  %v2977_v61 = vpop.f32.mrb[50].mxu1 }
 0x3f3   : > { %v3141_v56 = vadd.f32 %v3140_v6, %v3118_v33  ;;  %3036 = vst [vmem:[%s6680_s30 + $0x90] sm:$0xff] %v2977_v61  ;;  %v3088_v26 = vsub.f32 %v3897_v29, %v2977_v61  ;;  %v2979_v41 = vpop.f32.mrb[51].mxu1  ;;  %v3909_v61 = vld [vmem:[%s4002_s28 + $0xf0] sm:$0xff] }
 0x3f4   : > { %v3162_v16 = vadd.f32 %v3161_v8, %v3119_v46  ;;  %3037 = vst [vmem:[%s6680_s30 + $0x98] sm:$0xff] %v2979_v41  ;;  %v3089_v35 = vsub.f32 %v3898_v22, %v2979_v41  ;;  %v3910_v41 = vld [vmem:[%s4002_s28 + $0xf8] sm:$0xff] }
 0x3f5   : > { %v3120_v42 = vmul.f32 %v3088_v26, %v3088_v26 }
 0x3f6   : > { %v3121_v48 = vmul.f32 %v3089_v35, %v3089_v35  ;;  %v2983_v57 = vpop.f32.mrb[52].mxu1 }
 0x3f7   : > { %v3142_v38 = vadd.f32 %v3141_v56, %v3120_v42  ;;  %3038 = vst [vmem:[%s6680_s30 + $0xa0] sm:$0xff] %v2983_v57  ;;  %v3090_v13 = vsub.f32 %v3899_v24, %v2983_v57  ;;  %v2985_v7 = vpop.f32.mrb[53].mxu1 }
 0x3f8   : > { %v3163_v11 = vadd.f32 %v3162_v16, %v3121_v48  ;;  %3039 = vst [vmem:[%s6680_s30 + $0xa8] sm:$0xff] %v2985_v7  ;;  %v3091_v5 = vsub.f32 %v3900_v31, %v2985_v7 }
 0x3f9   : > { %v3122_v40 = vmul.f32 %v3090_v13, %v3090_v13 }
 0x3fa   : > { %v3123_v59 = vmul.f32 %v3091_v5, %v3091_v5  ;;  %v2989_v51 = vpop.f32.mrb[54].mxu1 }
 0x3fb   : > { %v3143_v49 = vadd.f32 %v3142_v38, %v3122_v40  ;;  %3040 = vst [vmem:[%s6680_s30 + $0xb0] sm:$0xff] %v2989_v51  ;;  %v3092_v43 = vsub.f32 %v3901_v4, %v2989_v51  ;;  %v2991_v21 = vpop.f32.mrb[55].mxu1 }
 0x3fc   : > { %v3164_v17 = vadd.f32 %v3163_v11, %v3123_v59  ;;  %3041 = vst [vmem:[%s6680_s30 + $0xb8] sm:$0xff] %v2991_v21  ;;  %v3093_v58 = vsub.f32 %v3902_v28, %v2991_v21 }
 0x3fd   : > { %v3124_v0 = vmul.f32 %v3092_v43, %v3092_v43 }
 0x3fe   : > { %v3125_v37 = vmul.f32 %v3093_v58, %v3093_v58  ;;  %v2995_v12 = vpop.f32.mrb[56].mxu1 }
 0x3ff   : > { %v3144_v53 = vadd.f32 %v3143_v49, %v3124_v0  ;;  %3042 = vst [vmem:[%s6680_s30 + $0xc0] sm:$0xff] %v2995_v12  ;;  %v3094_v54 = vsub.f32 %v3903_v20, %v2995_v12  ;;  %v2997_v62 = vpop.f32.mrb[57].mxu1 }
 0x400   : > { %v3165_v32 = vadd.f32 %v3164_v17, %v3125_v37  ;;  %3043 = vst [vmem:[%s6680_s30 + $0xc8] sm:$0xff] %v2997_v62  ;;  %v3095_v45 = vsub.f32 %v3904_v34, %v2997_v62 }
 0x401   : > { %v3126_v52 = vmul.f32 %v3094_v54, %v3094_v54 }
 0x402   : > { %v3127_v2 = vmul.f32 %v3095_v45, %v3095_v45  ;;  %v3001_v50 = vpop.f32.mrb[58].mxu1 }
 0x403   : > { %v3145_v23 = vadd.f32 %v3144_v53, %v3126_v52  ;;  %3044 = vst [vmem:[%s6680_s30 + $0xd0] sm:$0xff] %v3001_v50  ;;  %v3096_v36 = vsub.f32 %v3905_v10, %v3001_v50  ;;  %v3003_v63 = vpop.f32.mrb[59].mxu1 }
 0x404   : > { %v3166_v30 = vadd.f32 %v3165_v32, %v3127_v2  ;;  %3045 = vst [vmem:[%s6680_s30 + $0xd8] sm:$0xff] %v3003_v63  ;;  %v3097_v60 = vsub.f32 %v3906_v39, %v3003_v63 }
 0x405   : > { %v3128_v19 = vmul.f32 %v3096_v36, %v3096_v36 }
 0x406   : > { %v3129_v55 = vmul.f32 %v3097_v60, %v3097_v60  ;;  %v3007_v1 = vpop.f32.mrb[60].mxu1 }
 0x407   : > { %v3146_v3 = vadd.f32 %v3145_v23, %v3128_v19  ;;  %3046 = vst [vmem:[%s6680_s30 + $0xe0] sm:$0xff] %v3007_v1  ;;  %v3098_v6 = vsub.f32 %v3907_v9, %v3007_v1  ;;  %v3009_v47 = vpop.f32.mrb[61].mxu1 }
 0x408   : > { %v3167_v14 = vadd.f32 %v3166_v30, %v3129_v55  ;;  %3047 = vst [vmem:[%s6680_s30 + $0xe8] sm:$0xff] %v3009_v47  ;;  %v3099_v8 = vsub.f32 %v3908_v27, %v3009_v47 }
 0x409   : > { %v3130_v18 = vmul.f32 %v3098_v6, %v3098_v6 }
 0x40a   : > { %v3131_v15 = vmul.f32 %v3099_v8, %v3099_v8  ;;  %v3013_v33 = vpop.f32.mrb[62].mxu1 }
 0x40b   : > { %v3147_v46 = vadd.f32 %v3146_v3, %v3130_v18  ;;  %3048 = vst [vmem:[%s6680_s30 + $0xf0] sm:$0xff] %v3013_v33  ;;  %v3100_v56 = vsub.f32 %v3909_v61, %v3013_v33  ;;  %v3015_v29 = vpop.f32.mrb[63].mxu1 }
 0x40c   : > { %v3168_v26 = vadd.f32 %v3167_v14, %v3131_v15  ;;  %3049 = vst [vmem:[%s6680_s30 + $0xf8] sm:$0xff] %v3015_v29  ;;  %v3101_v16 = vsub.f32 %v3910_v41, %v3015_v29 }
 0x40d   : > { %v3132_v22 = vmul.f32 %v3100_v56, %v3100_v56 }
 0x40e   : > { %v3133_v35 = vmul.f32 %v3101_v16, %v3101_v16 }
 0x40f   : > { %v3148_v42 = vadd.f32 %v3147_v46, %v3132_v22 }
 0x410   : > { %v3169_v48 = vadd.f32 %v3168_v26, %v3133_v35 }
 0x411   : > { %v3149_v57 = vrot.slane %v3148_v42, 4 }
 0x412   : > { %v3170_v38 = vrot.slane %v3169_v48, 4 }
 0x413   : > { %v3150_v24 = vadd.f32 %v3149_v57, %v3148_v42 }
 0x414   : > { %v3171_v13 = vadd.f32 %v3170_v38, %v3169_v48 }
 0x415   : > { %v3151_v7 = vrot.slane %v3150_v24, 2 }
 0x416   : > { %v3172_v11 = vrot.slane %v3171_v13, 2 }
 0x417   : > { %v3152_v31 = vadd.f32 %v3151_v7, %v3150_v24 }
 0x418   : > { %v3173_v5 = vadd.f32 %v3172_v11, %v3171_v13 }
 0x419   : > { %v3153_v40 = vrot.slane %v3152_v31, 1 }
 0x41a   : > { %v3174_v59 = vrot.slane %v3173_v5, 1 }
 0x41b   : > { %v3154_v51 = vadd.f32 %v3153_v40, %v3152_v31 }
 0x41c   : > { %v3175_v49 = vadd.f32 %v3174_v59, %v3173_v5 }
 0x41e   : > { %v3178_v4 = vcombine.low %v3154_v51, %v3175_v49 }
 0x420   : > { %v3185_v43 = vrot.slane %v3178_v4, %v6190_v25 }
 0x422   : > { %v3192_v21 = vrot.slane %v3185_v43, %v6190_v25 }
 0x424   : > { %3194 = vst.msk [vmem:[%s332_s7] sm:$0x3] %vm6217_vm10, %v3192_v21 }
 0x425 PF: > { %s17_s23 = sadd.s32 1, %s3933_s23   ;;  %s7579_s21 = smov %s3929_s22 }
 0x426   : > { %p14_p5 = scmp.ge.s32.totalorder %s17_s23, 4   ;;  %s7580_s22 = smov %s7582_s24 }
 0x428   :  { %16 = sbr.rel (!%p14_p5) target bundleno = 2 (0x2), region = 90 }

</bundles_post_ra>
